<compile_context>
chip_gen: v7x
topology: tpu7x:2x2x1
jax: 0.10.0
libtpu: 0.0.40
codegen_flags: <defaults>
</compile_context>

<pallas_src>
import jax
import jax.numpy as jnp
from jax.experimental import pallas as pl
from jax.experimental.pallas import tpu as pltpu

IMAGE_CHANNEL = 3
D_HIDDEN = 8            # small synthetic width (real DCGAN uses 64)
NEG_SLOPE = 0.2
BN_EPS = 1e-5

LANE = 128              # lane-dense output width (padded channel axis)
TILE_M_TARGET = 512     # row-tile target; sized well inside v7x's 64 MiB VMEM
VMEM_LIMIT = 32 * 1024 * 1024


def _round_up(n, m):
    return ((n + m - 1) // m) * m


def _pick_tile(m, target=TILE_M_TARGET):
    """Largest row tile <= target that divides m (multiple of 8 when tiling)."""
    if m <= target:
        return m
    for t in range(target, 7, -1):
        if m % t == 0 and t % 8 == 0:
            return t
    return m


# ----------------------------- Pallas kernels ------------------------------

def _matmul_lrelu_kernel(x_ref, w_ref, o_ref):
    # conv-as-matmul (bf16 in, f32 acc) + LeakyReLU(0.2); lane-dense bf16 store.
    y = jnp.dot(x_ref[...], w_ref[...], preferred_element_type=jnp.float32)
    o_ref[...] = jnp.where(y >= 0.0, y, NEG_SLOPE * y).astype(o_ref.dtype)


def _matmul_stats_kernel(x_ref, w_ref, y_ref, ssum_ref, ssq_ref):
    # conv-as-matmul + per-channel sum / sum-of-squares accumulated across the
    # M-tile grid axis (axis marked "arbitrary"; stats blocks stay resident).
    @pl.when(pl.program_id(0) == 0)
    def _():
        ssum_ref[...] = jnp.zeros_like(ssum_ref)
        ssq_ref[...] = jnp.zeros_like(ssq_ref)

    y = jnp.dot(x_ref[...], w_ref[...], preferred_element_type=jnp.float32)
    y_ref[...] = y
    ssum_ref[...] += jnp.sum(y, axis=0, keepdims=True)
    ssq_ref[...] += jnp.sum(y * y, axis=0, keepdims=True)


def _bn_lrelu_kernel(y_ref, scale_ref, shift_ref, o_ref):
    # apply precomputed per-channel affine (BatchNorm) + LeakyReLU(0.2).
    z = y_ref[...] * scale_ref[...] + shift_ref[...]
    o_ref[...] = jnp.where(z >= 0.0, z, NEG_SLOPE * z).astype(o_ref.dtype)


def _bn_lrelu_matmul_sigmoid_kernel(p_ref, scale_ref, shift_ref, w_ref, o_ref):
    # layer-4 BatchNorm + LeakyReLU folded into the final Conv(8D->1)+Sigmoid.
    z = p_ref[...] * scale_ref[...] + shift_ref[...]
    z = jnp.where(z >= 0.0, z, NEG_SLOPE * z)
    y = jnp.dot(z.astype(jnp.bfloat16), w_ref[...],
                preferred_element_type=jnp.float32)
    e = jnp.exp(-jnp.abs(y))                       # numerically stable sigmoid
    o_ref[...] = jnp.where(y >= 0.0, 1.0 / (1.0 + e), e / (1.0 + e))


# ------------------------------ kernel wrappers -----------------------------

def _conv_lrelu(patches, w):
    M, K = patches.shape
    _, C = w.shape
    tm = _pick_tile(M)
    cost = pl.CostEstimate(flops=2 * M * K * C, transcendentals=0,
                           bytes_accessed=2 * (M * K + K * C + M * C))
    return pl.pallas_call(
        _matmul_lrelu_kernel,
        out_shape=jax.ShapeDtypeStruct((M, C), jnp.bfloat16),
        grid=(M // tm,),
        in_specs=[pl.BlockSpec((tm, K), lambda i: (i, 0)),
                  pl.BlockSpec((K, C), lambda i: (0, 0))],
        out_specs=pl.BlockSpec((tm, C), lambda i: (i, 0)),
        compiler_params=pltpu.CompilerParams(
            dimension_semantics=("parallel",),
            vmem_limit_bytes=VMEM_LIMIT),
        cost_estimate=cost,
    )(patches, w)


def _conv_stats(patches, w):
    M, K = patches.shape
    _, C = w.shape
    tm = _pick_tile(M)
    cost = pl.CostEstimate(flops=2 * M * K * C, transcendentals=0,
                           bytes_accessed=2 * (M * K + K * C) + 4 * M * C)
    return pl.pallas_call(
        _matmul_stats_kernel,
        out_shape=(jax.ShapeDtypeStruct((M, C), jnp.float32),
                   jax.ShapeDtypeStruct((1, C), jnp.float32),
                   jax.ShapeDtypeStruct((1, C), jnp.float32)),
        grid=(M // tm,),
        in_specs=[pl.BlockSpec((tm, K), lambda i: (i, 0)),
                  pl.BlockSpec((K, C), lambda i: (0, 0))],
        out_specs=(pl.BlockSpec((tm, C), lambda i: (i, 0)),
                   pl.BlockSpec((1, C), lambda i: (0, 0)),
                   pl.BlockSpec((1, C), lambda i: (0, 0))),
        compiler_params=pltpu.CompilerParams(
            dimension_semantics=("arbitrary",),   # stats accumulate across M
            vmem_limit_bytes=VMEM_LIMIT),
        cost_estimate=cost,
    )(patches, w)


def _bn_lrelu(y, scale, shift):
    M, C = y.shape
    tm = _pick_tile(M)
    cost = pl.CostEstimate(flops=4 * M * C, transcendentals=0,
                           bytes_accessed=4 * M * C + 2 * M * C)
    return pl.pallas_call(
        _bn_lrelu_kernel,
        out_shape=jax.ShapeDtypeStruct((M, C), jnp.bfloat16),
        grid=(M // tm,),
        in_specs=[pl.BlockSpec((tm, C), lambda i: (i, 0)),
                  pl.BlockSpec((1, C), lambda i: (0, 0)),
                  pl.BlockSpec((1, C), lambda i: (0, 0))],
        out_specs=pl.BlockSpec((tm, C), lambda i: (i, 0)),
        compiler_params=pltpu.CompilerParams(
            dimension_semantics=("parallel",),
            vmem_limit_bytes=VMEM_LIMIT),
        cost_estimate=cost,
    )(y, scale, shift)


def _bn_lrelu_conv_sigmoid(p, scale, shift, w):
    M, K = p.shape
    _, C = w.shape
    cost = pl.CostEstimate(flops=2 * M * K * C, transcendentals=M * C,
                           bytes_accessed=4 * M * K + 2 * K * C + 4 * M * C)
    return pl.pallas_call(
        _bn_lrelu_matmul_sigmoid_kernel,
        out_shape=jax.ShapeDtypeStruct((M, C), jnp.float32),
        grid=(1,),
        in_specs=[pl.BlockSpec((M, K), lambda i: (0, 0)),
                  pl.BlockSpec((1, K), lambda i: (0, 0)),
                  pl.BlockSpec((1, K), lambda i: (0, 0)),
                  pl.BlockSpec((K, C), lambda i: (0, 0))],
        out_specs=pl.BlockSpec((M, C), lambda i: (0, 0)),
        compiler_params=pltpu.CompilerParams(
            dimension_semantics=("arbitrary",),
            vmem_limit_bytes=VMEM_LIMIT),
        cost_estimate=cost,
    )(p, scale, shift, w)


# --------------------------------- glue ------------------------------------

def _im2col_nhwc(x, k, stride, pad):
    """x: [N, H, W, C] -> patches [N*Ho*Wo, k*k*C], feature order (kh, kw, c)."""
    N, H, W, C = x.shape
    xp = jnp.pad(x, ((0, 0), (pad, pad), (pad, pad), (0, 0)))
    Ho = (H + 2 * pad - k) // stride + 1
    Wo = (W + 2 * pad - k) // stride + 1
    cols = []
    for i in range(k):
        for j in range(k):
            cols.append(xp[:, i:i + stride * Ho:stride, j:j + stride * Wo:stride, :])
    p = jnp.stack(cols, axis=3)                       # [N, Ho, Wo, k*k, C]
    p = p.reshape(N * Ho * Wo, k * k * C)
    return p, Ho, Wo


def _pad_k(p):
    """Zero-pad the contraction axis to a multiple of 128; cast to bf16."""
    K = p.shape[1]
    Kp = max(_round_up(K, 128), 128)
    if Kp != K:
        p = jnp.pad(p, ((0, 0), (0, Kp - K)))
    return p.astype(jnp.bfloat16)


def _conv_w(key, c_in, c_out, k=4):
    """torch OIHW N(0, 0.02) weight -> HWIO-flattened [K_pad, 128] bf16."""
    w = 0.02 * jax.random.normal(key, (c_out, c_in, k, k), jnp.float32)
    w = jnp.transpose(w, (2, 3, 1, 0)).reshape(k * k * c_in, c_out)  # (K, C)
    k_real = k * k * c_in
    k_pad = max(_round_up(k_real, 128), 128)
    w = jnp.pad(w, ((0, k_pad - k_real), (0, LANE - c_out)))
    return w.astype(jnp.bfloat16)


def _bn_param(c_real):
    # BatchNorm2d default init (weight=1, bias=0), zero-padded to 128 lanes so
    # padded channels stay exactly zero through scale/shift + LeakyReLU.
    g = jnp.zeros((1, LANE), jnp.float32).at[0, :c_real].set(1.0)
    b = jnp.zeros((1, LANE), jnp.float32)
    return g, b


def init_params(key):
    ks = jax.random.split(key, 5)
    p = {
        "w1": _conv_w(ks[0], IMAGE_CHANNEL, D_HIDDEN),
        "w2": _conv_w(ks[1], D_HIDDEN, D_HIDDEN * 2),
        "w3": _conv_w(ks[2], D_HIDDEN * 2, D_HIDDEN * 4),
        "w4": _conv_w(ks[3], D_HIDDEN * 4, D_HIDDEN * 8),
        "w5": _conv_w(ks[4], D_HIDDEN * 8, 1),
    }
    p["g2"], p["b2"] = _bn_param(D_HIDDEN * 2)
    p["g3"], p["b3"] = _bn_param(D_HIDDEN * 4)
    p["g4"], p["b4"] = _bn_param(D_HIDDEN * 8)
    return p


@jax.jit
def discriminator_forward(x, params):
    """x: [N, IMAGE_CHANNEL, 64, 64] (NCHW, like torch) -> [N] probabilities."""
    N = x.shape[0]
    x = jnp.transpose(x, (0, 2, 3, 1)).astype(jnp.bfloat16)   # NCHW -> NHWC once

    # ---- layer 1: Conv(IC -> D, 4, 2, 1) + LeakyReLU ----------------------
    p, Ho, Wo = _im2col_nhwc(x, 4, 2, 1)
    act = _conv_lrelu(_pad_k(p), params["w1"])                 # [M, 128] bf16
    act = act.reshape(N, Ho, Wo, LANE)

    # ---- layers 2-4: Conv(4, 2, 1) + BatchNorm (batch stats) + LeakyReLU --
    y4 = scale4 = shift4 = None
    ho4 = wo4 = 0
    cfgs = [("w2", "g2", "b2", D_HIDDEN),
            ("w3", "g3", "b3", D_HIDDEN * 2),
            ("w4", "g4", "b4", D_HIDDEN * 4)]
    for li, (wk, gk, bk, c_in) in enumerate(cfgs):
        p, Ho, Wo = _im2col_nhwc(act[..., :c_in], 4, 2, 1)
        y, ssum, ssq = _conv_stats(_pad_k(p), params[wk])      # y: [M, 128] f32
        M = y.shape[0]
        mean = ssum / M
        var = jnp.maximum(ssq / M - mean * mean, 0.0)          # biased (train)
        scale = params[gk] * jax.lax.rsqrt(var + BN_EPS)
        shift = params[bk] - mean * scale
        if li < 2:
            act = _bn_lrelu(y, scale, shift).reshape(N, Ho, Wo, LANE)
        else:                       # layer 4: fold BN+LReLU into final kernel
            y4, scale4, shift4, ho4, wo4 = y, scale, shift, Ho, Wo

    # ---- layer 5: Conv(8D -> 1, 4, 1, 0) + Sigmoid (pad=0 => pure reshape) -
    c4 = D_HIDDEN * 8
    p5 = y4.reshape(N, ho4, wo4, LANE)[..., :c4].reshape(N, ho4 * wo4 * c4)
    sc5 = jnp.tile(scale4[:, :c4], (1, ho4 * wo4))
    sh5 = jnp.tile(shift4[:, :c4], (1, ho4 * wo4))
    out = _bn_lrelu_conv_sigmoid(p5, sc5, sh5, params["w5"])   # [N, 128] f32

    # .view(-1, 1).squeeze(1)
    return out[:, 0]


if __name__ == "__main__":
    key = jax.random.PRNGKey(0)
    kx, kp = jax.random.split(key)

    # DCGAN discriminator requires 64x64 input to reach the final 4x4 conv.
    x = jax.random.normal(kx, (2, IMAGE_CHANNEL, 64, 64), jnp.float32)
    params = init_params(kp)

    out = discriminator_forward(x, params)
    jax.block_until_ready(out)
    assert out.shape == (2,), out.shape
    assert bool(jnp.all((out >= 0.0) & (out <= 1.0))), out
    print("KERNEL_OK")
</pallas_src>

<mosaic_0001>
module attributes {stable_mosaic.version = 11 : i64} {
  func.func @_matmul_lrelu_kernel(%arg0: i32, %arg1: memref<512x128xbf16, #tpu.memory_space<vmem>>, %arg2: memref<128x128xbf16, #tpu.memory_space<vmem>>, %arg3: memref<512x128xbf16, #tpu.memory_space<vmem>>) attributes {dimension_semantics = [#tpu.dimension_semantics<parallel>], iteration_bounds = array<i64: 4>, scalar_prefetch = 0 : i64, scratch_operands = 0 : i64, tpu.core_type = #tpu.core_type<tc>, window_params = [{transform_indices = @transform_0, window_bounds = array<i64: 512, 128>}, {pipeline_mode = #tpu.pipeline_mode<synchronous>, transform_indices = @transform_1, window_bounds = array<i64: 128, 128>}, {transform_indices = @transform_2, window_bounds = array<i64: 512, 128>}]} {
    %c0 = arith.constant 0 : index
    %c0_0 = arith.constant 0 : index
    %0 = vector.load %arg1[%c0, %c0_0] : memref<512x128xbf16, #tpu.memory_space<vmem>>, vector<512x128xbf16>
    %c0_1 = arith.constant 0 : index
    %c0_2 = arith.constant 0 : index
    %1 = vector.load %arg2[%c0_1, %c0_2] : memref<128x128xbf16, #tpu.memory_space<vmem>>, vector<128x128xbf16>
    %cst = arith.constant dense<0.000000e+00> : vector<512x128xf32>
    %2 = tpu.matmul %0, %1, %cst {dimension_numbers = #tpu.dot_dimension_numbers<[1], [0], [0], [1], [0, 0, 1, 1], [], []>} : vector<512x128xbf16>, vector<128x128xbf16>, vector<512x128xf32> -> vector<512x128xf32>
    %cst_3 = arith.constant 0.000000e+00 : f32
    %3 = vector.broadcast %cst_3 : f32 to vector<512x128xf32>
    %4 = arith.cmpf oge, %2, %3 : vector<512x128xf32>
    %cst_4 = arith.constant 2.000000e-01 : f32
    %5 = vector.broadcast %cst_4 : f32 to vector<512x128xf32>
    %6 = arith.mulf %5, %2 : vector<512x128xf32>
    %7 = arith.select %4, %2, %6 : vector<512x128xi1>, vector<512x128xf32>
    %8 = arith.truncf %7 : vector<512x128xf32> to vector<512x128xbf16>
    %c0_5 = arith.constant 0 : index
    %c0_6 = arith.constant 0 : index
    %9 = vector.load %arg3[%c0_5, %c0_6] : memref<512x128xbf16, #tpu.memory_space<vmem>>, vector<512x128xbf16>
    tpu.vector_store %arg3[%c0_5, %c0_6], %8 {strides = array<i32>} : memref<512x128xbf16, #tpu.memory_space<vmem>>, vector<512x128xbf16>,
    return
  }
  func.func @transform_0(%arg0: i32) -> (i32, i32) {
    %c0_i32 = arith.constant 0 : i32
    %c0_i32_0 = arith.constant 0 : i32
    return %arg0, %c0_i32 : i32, i32
  }
  func.func @transform_1(%arg0: i32) -> (i32, i32) {
    %c0_i32 = arith.constant 0 : i32
    %c0_i32_0 = arith.constant 0 : i32
    %c0_i32_1 = arith.constant 0 : i32
    return %c0_i32, %c0_i32_0 : i32, i32
  }
  func.func @transform_2(%arg0: i32) -> (i32, i32) {
    %c0_i32 = arith.constant 0 : i32
    %c0_i32_0 = arith.constant 0 : i32
    return %arg0, %c0_i32 : i32, i32
  }
}

module attributes {stable_mosaic.version = 11 : i64} {
  func.func @_matmul_stats_kernel(%arg0: i32, %arg1: memref<512x128xbf16, #tpu.memory_space<vmem>>, %arg2: memref<128x128xbf16, #tpu.memory_space<vmem>>, %arg3: memref<512x128xf32, #tpu.memory_space<vmem>>, %arg4: memref<1x128xf32, #tpu.memory_space<vmem>>, %arg5: memref<1x128xf32, #tpu.memory_space<vmem>>) attributes {dimension_semantics = [#tpu.dimension_semantics<arbitrary>], iteration_bounds = array<i64: 1>, scalar_prefetch = 0 : i64, scratch_operands = 0 : i64, tpu.core_type = #tpu.core_type<tc>, window_params = [{transform_indices = @transform_0, window_bounds = array<i64: 512, 128>}, {pipeline_mode = #tpu.pipeline_mode<synchronous>, transform_indices = @transform_1, window_bounds = array<i64: 128, 128>}, {transform_indices = @transform_2, window_bounds = array<i64: 512, 128>}, {pipeline_mode = #tpu.pipeline_mode<synchronous>, transform_indices = @transform_3, window_bounds = array<i64: 1, 128>}, {pipeline_mode = #tpu.pipeline_mode<synchronous>, transform_indices = @transform_4, window_bounds = array<i64: 1, 128>}]} {
    %c0_i32 = arith.constant 0 : i32
    %0 = arith.cmpi eq, %arg0, %c0_i32 : i32
    %1 = arith.extui %0 : i1 to i32
    %c0_i32_0 = arith.constant 0 : i32
    %2 = arith.cmpi ne, %1, %c0_i32_0 : i32
    scf.if %2 {
      %cst_16 = arith.constant 0.000000e+00 : f32
      %18 = vector.broadcast %cst_16 : f32 to vector<1x128xf32>
      %c0_17 = arith.constant 0 : index
      %c0_18 = arith.constant 0 : index
      %19 = vector.load %arg4[%c0_17, %c0_18] : memref<1x128xf32, #tpu.memory_space<vmem>>, vector<1x128xf32>
      tpu.vector_store %arg4[%c0_17, %c0_18], %18 {strides = array<i32>} : memref<1x128xf32, #tpu.memory_space<vmem>>, vector<1x128xf32>,
      %cst_19 = arith.constant 0.000000e+00 : f32
      %20 = vector.broadcast %cst_19 : f32 to vector<1x128xf32>
      %c0_20 = arith.constant 0 : index
      %c0_21 = arith.constant 0 : index
      %21 = vector.load %arg5[%c0_20, %c0_21] : memref<1x128xf32, #tpu.memory_space<vmem>>, vector<1x128xf32>
      tpu.vector_store %arg5[%c0_20, %c0_21], %20 {strides = array<i32>} : memref<1x128xf32, #tpu.memory_space<vmem>>, vector<1x128xf32>,
    } else {
    }
    %c0 = arith.constant 0 : index
    %c0_1 = arith.constant 0 : index
    %3 = vector.load %arg1[%c0, %c0_1] : memref<512x128xbf16, #tpu.memory_space<vmem>>, vector<512x128xbf16>
    %c0_2 = arith.constant 0 : index
    %c0_3 = arith.constant 0 : index
    %4 = vector.load %arg2[%c0_2, %c0_3] : memref<128x128xbf16, #tpu.memory_space<vmem>>, vector<128x128xbf16>
    %cst = arith.constant dense<0.000000e+00> : vector<512x128xf32>
    %5 = tpu.matmul %3, %4, %cst {dimension_numbers = #tpu.dot_dimension_numbers<[1], [0], [0], [1], [0, 0, 1, 1], [], []>} : vector<512x128xbf16>, vector<128x128xbf16>, vector<512x128xf32> -> vector<512x128xf32>
    %c0_4 = arith.constant 0 : index
    %c0_5 = arith.constant 0 : index
    %6 = vector.load %arg3[%c0_4, %c0_5] : memref<512x128xf32, #tpu.memory_space<vmem>>, vector<512x128xf32>
    tpu.vector_store %arg3[%c0_4, %c0_5], %5 {strides = array<i32>} : memref<512x128xf32, #tpu.memory_space<vmem>>, vector<512x128xf32>,
    %c0_6 = arith.constant 0 : index
    %c0_7 = arith.constant 0 : index
    %7 = vector.load %arg4[%c0_6, %c0_7] : memref<1x128xf32, #tpu.memory_space<vmem>>, vector<1x128xf32>
    %cst_8 = arith.constant dense<0.000000e+00> : vector<128xf32>
    %8 = vector.multi_reduction <add>, %5, %cst_8 [0] : vector<512x128xf32> to vector<128xf32>
    %9 = vector.shape_cast %8 : vector<128xf32> to vector<1x128xf32>
    %10 = arith.addf %7, %9 : vector<1x128xf32>
    %c0_9 = arith.constant 0 : index
    %c0_10 = arith.constant 0 : index
    %11 = vector.load %arg4[%c0_9, %c0_10] : memref<1x128xf32, #tpu.memory_space<vmem>>, vector<1x128xf32>
    tpu.vector_store %arg4[%c0_9, %c0_10], %10 {strides = array<i32>} : memref<1x128xf32, #tpu.memory_space<vmem>>, vector<1x128xf32>,
    %c0_11 = arith.constant 0 : index
    %c0_12 = arith.constant 0 : index
    %12 = vector.load %arg5[%c0_11, %c0_12] : memref<1x128xf32, #tpu.memory_space<vmem>>, vector<1x128xf32>
    %13 = arith.mulf %5, %5 : vector<512x128xf32>
    %cst_13 = arith.constant dense<0.000000e+00> : vector<128xf32>
    %14 = vector.multi_reduction <add>, %13, %cst_13 [0] : vector<512x128xf32> to vector<128xf32>
    %15 = vector.shape_cast %14 : vector<128xf32> to vector<1x128xf32>
    %16 = arith.addf %12, %15 : vector<1x128xf32>
    %c0_14 = arith.constant 0 : index
    %c0_15 = arith.constant 0 : index
    %17 = vector.load %arg5[%c0_14, %c0_15] : memref<1x128xf32, #tpu.memory_space<vmem>>, vector<1x128xf32>
    tpu.vector_store %arg5[%c0_14, %c0_15], %16 {strides = array<i32>} : memref<1x128xf32, #tpu.memory_space<vmem>>, vector<1x128xf32>,
    return
  }
  func.func @transform_0(%arg0: i32) -> (i32, i32) {
    %c0_i32 = arith.constant 0 : i32
    %c0_i32_0 = arith.constant 0 : i32
    return %arg0, %c0_i32 : i32, i32
  }
  func.func @transform_1(%arg0: i32) -> (i32, i32) {
    %c0_i32 = arith.constant 0 : i32
    %c0_i32_0 = arith.constant 0 : i32
    %c0_i32_1 = arith.constant 0 : i32
    return %c0_i32, %c0_i32_0 : i32, i32
  }
  func.func @transform_2(%arg0: i32) -> (i32, i32) {
    %c0_i32 = arith.constant 0 : i32
    %c0_i32_0 = arith.constant 0 : i32
    return %arg0, %c0_i32 : i32, i32
  }
  func.func @transform_3(%arg0: i32) -> (i32, i32) {
    %c0_i32 = arith.constant 0 : i32
    %c0_i32_0 = arith.constant 0 : i32
    %c0_i32_1 = arith.constant 0 : i32
    return %c0_i32, %c0_i32_0 : i32, i32
  }
  func.func @transform_4(%arg0: i32) -> (i32, i32) {
    %c0_i32 = arith.constant 0 : i32
    %c0_i32_0 = arith.constant 0 : i32
    %c0_i32_1 = arith.constant 0 : i32
    return %c0_i32, %c0_i32_0 : i32, i32
  }
}

module attributes {stable_mosaic.version = 11 : i64} {
  func.func @_bn_lrelu_kernel(%arg0: i32, %arg1: memref<512x128xf32, #tpu.memory_space<vmem>>, %arg2: memref<1x128xf32, #tpu.memory_space<vmem>>, %arg3: memref<1x128xf32, #tpu.memory_space<vmem>>, %arg4: memref<512x128xbf16, #tpu.memory_space<vmem>>) attributes {dimension_semantics = [#tpu.dimension_semantics<parallel>], iteration_bounds = array<i64: 1>, scalar_prefetch = 0 : i64, scratch_operands = 0 : i64, tpu.core_type = #tpu.core_type<tc>, window_params = [{transform_indices = @transform_0, window_bounds = array<i64: 512, 128>}, {pipeline_mode = #tpu.pipeline_mode<synchronous>, transform_indices = @transform_1, window_bounds = array<i64: 1, 128>}, {pipeline_mode = #tpu.pipeline_mode<synchronous>, transform_indices = @transform_2, window_bounds = array<i64: 1, 128>}, {transform_indices = @transform_3, window_bounds = array<i64: 512, 128>}]} {
    %c0 = arith.constant 0 : index
    %c0_0 = arith.constant 0 : index
    %0 = vector.load %arg1[%c0, %c0_0] : memref<512x128xf32, #tpu.memory_space<vmem>>, vector<512x128xf32>
    %c0_1 = arith.constant 0 : index
    %c0_2 = arith.constant 0 : index
    %1 = vector.load %arg2[%c0_1, %c0_2] : memref<1x128xf32, #tpu.memory_space<vmem>>, vector<1x128xf32>
    %2 = vector.broadcast %1 : vector<1x128xf32> to vector<512x128xf32>
    %3 = arith.mulf %0, %2 : vector<512x128xf32>
    %c0_3 = arith.constant 0 : index
    %c0_4 = arith.constant 0 : index
    %4 = vector.load %arg3[%c0_3, %c0_4] : memref<1x128xf32, #tpu.memory_space<vmem>>, vector<1x128xf32>
    %5 = vector.broadcast %4 : vector<1x128xf32> to vector<512x128xf32>
    %6 = arith.addf %3, %5 : vector<512x128xf32>
    %cst = arith.constant 0.000000e+00 : f32
    %7 = vector.broadcast %cst : f32 to vector<512x128xf32>
    %8 = arith.cmpf oge, %6, %7 : vector<512x128xf32>
    %cst_5 = arith.constant 2.000000e-01 : f32
    %9 = vector.broadcast %cst_5 : f32 to vector<512x128xf32>
    %10 = arith.mulf %9, %6 : vector<512x128xf32>
    %11 = arith.select %8, %6, %10 : vector<512x128xi1>, vector<512x128xf32>
    %12 = arith.truncf %11 : vector<512x128xf32> to vector<512x128xbf16>
    %c0_6 = arith.constant 0 : index
    %c0_7 = arith.constant 0 : index
    %13 = vector.load %arg4[%c0_6, %c0_7] : memref<512x128xbf16, #tpu.memory_space<vmem>>, vector<512x128xbf16>
    tpu.vector_store %arg4[%c0_6, %c0_7], %12 {strides = array<i32>} : memref<512x128xbf16, #tpu.memory_space<vmem>>, vector<512x128xbf16>,
    return
  }
  func.func @transform_0(%arg0: i32) -> (i32, i32) {
    %c0_i32 = arith.constant 0 : i32
    %c0_i32_0 = arith.constant 0 : i32
    return %arg0, %c0_i32 : i32, i32
  }
  func.func @transform_1(%arg0: i32) -> (i32, i32) {
    %c0_i32 = arith.constant 0 : i32
    %c0_i32_0 = arith.constant 0 : i32
    %c0_i32_1 = arith.constant 0 : i32
    return %c0_i32, %c0_i32_0 : i32, i32
  }
  func.func @transform_2(%arg0: i32) -> (i32, i32) {
    %c0_i32 = arith.constant 0 : i32
    %c0_i32_0 = arith.constant 0 : i32
    %c0_i32_1 = arith.constant 0 : i32
    return %c0_i32, %c0_i32_0 : i32, i32
  }
  func.func @transform_3(%arg0: i32) -> (i32, i32) {
    %c0_i32 = arith.constant 0 : i32
    %c0_i32_0 = arith.constant 0 : i32
    return %arg0, %c0_i32 : i32, i32
  }
}

module attributes {stable_mosaic.version = 11 : i64} {
  func.func @_matmul_stats_kernel(%arg0: i32, %arg1: memref<128x256xbf16, #tpu.memory_space<vmem>>, %arg2: memref<256x128xbf16, #tpu.memory_space<vmem>>, %arg3: memref<128x128xf32, #tpu.memory_space<vmem>>, %arg4: memref<1x128xf32, #tpu.memory_space<vmem>>, %arg5: memref<1x128xf32, #tpu.memory_space<vmem>>) attributes {dimension_semantics = [#tpu.dimension_semantics<arbitrary>], iteration_bounds = array<i64: 1>, scalar_prefetch = 0 : i64, scratch_operands = 0 : i64, tpu.core_type = #tpu.core_type<tc>, window_params = [{transform_indices = @transform_0, window_bounds = array<i64: 128, 256>}, {pipeline_mode = #tpu.pipeline_mode<synchronous>, transform_indices = @transform_1, window_bounds = array<i64: 256, 128>}, {transform_indices = @transform_2, window_bounds = array<i64: 128, 128>}, {pipeline_mode = #tpu.pipeline_mode<synchronous>, transform_indices = @transform_3, window_bounds = array<i64: 1, 128>}, {pipeline_mode = #tpu.pipeline_mode<synchronous>, transform_indices = @transform_4, window_bounds = array<i64: 1, 128>}]} {
    %c0_i32 = arith.constant 0 : i32
    %0 = arith.cmpi eq, %arg0, %c0_i32 : i32
    %1 = arith.extui %0 : i1 to i32
    %c0_i32_0 = arith.constant 0 : i32
    %2 = arith.cmpi ne, %1, %c0_i32_0 : i32
    scf.if %2 {
      %cst_16 = arith.constant 0.000000e+00 : f32
      %18 = vector.broadcast %cst_16 : f32 to vector<1x128xf32>
      %c0_17 = arith.constant 0 : index
      %c0_18 = arith.constant 0 : index
      %19 = vector.load %arg4[%c0_17, %c0_18] : memref<1x128xf32, #tpu.memory_space<vmem>>, vector<1x128xf32>
      tpu.vector_store %arg4[%c0_17, %c0_18], %18 {strides = array<i32>} : memref<1x128xf32, #tpu.memory_space<vmem>>, vector<1x128xf32>,
      %cst_19 = arith.constant 0.000000e+00 : f32
      %20 = vector.broadcast %cst_19 : f32 to vector<1x128xf32>
      %c0_20 = arith.constant 0 : index
      %c0_21 = arith.constant 0 : index
      %21 = vector.load %arg5[%c0_20, %c0_21] : memref<1x128xf32, #tpu.memory_space<vmem>>, vector<1x128xf32>
      tpu.vector_store %arg5[%c0_20, %c0_21], %20 {strides = array<i32>} : memref<1x128xf32, #tpu.memory_space<vmem>>, vector<1x128xf32>,
    } else {
    }
    %c0 = arith.constant 0 : index
    %c0_1 = arith.constant 0 : index
    %3 = vector.load %arg1[%c0, %c0_1] : memref<128x256xbf16, #tpu.memory_space<vmem>>, vector<128x256xbf16>
    %c0_2 = arith.constant 0 : index
    %c0_3 = arith.constant 0 : index
    %4 = vector.load %arg2[%c0_2, %c0_3] : memref<256x128xbf16, #tpu.memory_space<vmem>>, vector<256x128xbf16>
    %cst = arith.constant dense<0.000000e+00> : vector<128x128xf32>
    %5 = tpu.matmul %3, %4, %cst {dimension_numbers = #tpu.dot_dimension_numbers<[1], [0], [0], [1], [0, 0, 1, 1], [], []>} : vector<128x256xbf16>, vector<256x128xbf16>, vector<128x128xf32> -> vector<128x128xf32>
    %c0_4 = arith.constant 0 : index
    %c0_5 = arith.constant 0 : index
    %6 = vector.load %arg3[%c0_4, %c0_5] : memref<128x128xf32, #tpu.memory_space<vmem>>, vector<128x128xf32>
    tpu.vector_store %arg3[%c0_4, %c0_5], %5 {strides = array<i32>} : memref<128x128xf32, #tpu.memory_space<vmem>>, vector<128x128xf32>,
    %c0_6 = arith.constant 0 : index
    %c0_7 = arith.constant 0 : index
    %7 = vector.load %arg4[%c0_6, %c0_7] : memref<1x128xf32, #tpu.memory_space<vmem>>, vector<1x128xf32>
    %cst_8 = arith.constant dense<0.000000e+00> : vector<128xf32>
    %8 = vector.multi_reduction <add>, %5, %cst_8 [0] : vector<128x128xf32> to vector<128xf32>
    %9 = vector.shape_cast %8 : vector<128xf32> to vector<1x128xf32>
    %10 = arith.addf %7, %9 : vector<1x128xf32>
    %c0_9 = arith.constant 0 : index
    %c0_10 = arith.constant 0 : index
    %11 = vector.load %arg4[%c0_9, %c0_10] : memref<1x128xf32, #tpu.memory_space<vmem>>, vector<1x128xf32>
    tpu.vector_store %arg4[%c0_9, %c0_10], %10 {strides = array<i32>} : memref<1x128xf32, #tpu.memory_space<vmem>>, vector<1x128xf32>,
    %c0_11 = arith.constant 0 : index
    %c0_12 = arith.constant 0 : index
    %12 = vector.load %arg5[%c0_11, %c0_12] : memref<1x128xf32, #tpu.memory_space<vmem>>, vector<1x128xf32>
    %13 = arith.mulf %5, %5 : vector<128x128xf32>
    %cst_13 = arith.constant dense<0.000000e+00> : vector<128xf32>
    %14 = vector.multi_reduction <add>, %13, %cst_13 [0] : vector<128x128xf32> to vector<128xf32>
    %15 = vector.shape_cast %14 : vector<128xf32> to vector<1x128xf32>
    %16 = arith.addf %12, %15 : vector<1x128xf32>
    %c0_14 = arith.constant 0 : index
    %c0_15 = arith.constant 0 : index
    %17 = vector.load %arg5[%c0_14, %c0_15] : memref<1x128xf32, #tpu.memory_space<vmem>>, vector<1x128xf32>
    tpu.vector_store %arg5[%c0_14, %c0_15], %16 {strides = array<i32>} : memref<1x128xf32, #tpu.memory_space<vmem>>, vector<1x128xf32>,
    return
  }
  func.func @transform_0(%arg0: i32) -> (i32, i32) {
    %c0_i32 = arith.constant 0 : i32
    %c0_i32_0 = arith.constant 0 : i32
    return %arg0, %c0_i32 : i32, i32
  }
  func.func @transform_1(%arg0: i32) -> (i32, i32) {
    %c0_i32 = arith.constant 0 : i32
    %c0_i32_0 = arith.constant 0 : i32
    %c0_i32_1 = arith.constant 0 : i32
    return %c0_i32, %c0_i32_0 : i32, i32
  }
  func.func @transform_2(%arg0: i32) -> (i32, i32) {
    %c0_i32 = arith.constant 0 : i32
    %c0_i32_0 = arith.constant 0 : i32
    return %arg0, %c0_i32 : i32, i32
  }
  func.func @transform_3(%arg0: i32) -> (i32, i32) {
    %c0_i32 = arith.constant 0 : i32
    %c0_i32_0 = arith.constant 0 : i32
    %c0_i32_1 = arith.constant 0 : i32
    return %c0_i32, %c0_i32_0 : i32, i32
  }
  func.func @transform_4(%arg0: i32) -> (i32, i32) {
    %c0_i32 = arith.constant 0 : i32
    %c0_i32_0 = arith.constant 0 : i32
    %c0_i32_1 = arith.constant 0 : i32
    return %c0_i32, %c0_i32_0 : i32, i32
  }
}

module attributes {stable_mosaic.version = 11 : i64} {
  func.func @_bn_lrelu_kernel(%arg0: i32, %arg1: memref<128x128xf32, #tpu.memory_space<vmem>>, %arg2: memref<1x128xf32, #tpu.memory_space<vmem>>, %arg3: memref<1x128xf32, #tpu.memory_space<vmem>>, %arg4: memref<128x128xbf16, #tpu.memory_space<vmem>>) attributes {dimension_semantics = [#tpu.dimension_semantics<parallel>], iteration_bounds = array<i64: 1>, scalar_prefetch = 0 : i64, scratch_operands = 0 : i64, tpu.core_type = #tpu.core_type<tc>, window_params = [{transform_indices = @transform_0, window_bounds = array<i64: 128, 128>}, {pipeline_mode = #tpu.pipeline_mode<synchronous>, transform_indices = @transform_1, window_bounds = array<i64: 1, 128>}, {pipeline_mode = #tpu.pipeline_mode<synchronous>, transform_indices = @transform_2, window_bounds = array<i64: 1, 128>}, {transform_indices = @transform_3, window_bounds = array<i64: 128, 128>}]} {
    %c0 = arith.constant 0 : index
    %c0_0 = arith.constant 0 : index
    %0 = vector.load %arg1[%c0, %c0_0] : memref<128x128xf32, #tpu.memory_space<vmem>>, vector<128x128xf32>
    %c0_1 = arith.constant 0 : index
    %c0_2 = arith.constant 0 : index
    %1 = vector.load %arg2[%c0_1, %c0_2] : memref<1x128xf32, #tpu.memory_space<vmem>>, vector<1x128xf32>
    %2 = vector.broadcast %1 : vector<1x128xf32> to vector<128x128xf32>
    %3 = arith.mulf %0, %2 : vector<128x128xf32>
    %c0_3 = arith.constant 0 : index
    %c0_4 = arith.constant 0 : index
    %4 = vector.load %arg3[%c0_3, %c0_4] : memref<1x128xf32, #tpu.memory_space<vmem>>, vector<1x128xf32>
    %5 = vector.broadcast %4 : vector<1x128xf32> to vector<128x128xf32>
    %6 = arith.addf %3, %5 : vector<128x128xf32>
    %cst = arith.constant 0.000000e+00 : f32
    %7 = vector.broadcast %cst : f32 to vector<128x128xf32>
    %8 = arith.cmpf oge, %6, %7 : vector<128x128xf32>
    %cst_5 = arith.constant 2.000000e-01 : f32
    %9 = vector.broadcast %cst_5 : f32 to vector<128x128xf32>
    %10 = arith.mulf %9, %6 : vector<128x128xf32>
    %11 = arith.select %8, %6, %10 : vector<128x128xi1>, vector<128x128xf32>
    %12 = arith.truncf %11 : vector<128x128xf32> to vector<128x128xbf16>
    %c0_6 = arith.constant 0 : index
    %c0_7 = arith.constant 0 : index
    %13 = vector.load %arg4[%c0_6, %c0_7] : memref<128x128xbf16, #tpu.memory_space<vmem>>, vector<128x128xbf16>
    tpu.vector_store %arg4[%c0_6, %c0_7], %12 {strides = array<i32>} : memref<128x128xbf16, #tpu.memory_space<vmem>>, vector<128x128xbf16>,
    return
  }
  func.func @transform_0(%arg0: i32) -> (i32, i32) {
    %c0_i32 = arith.constant 0 : i32
    %c0_i32_0 = arith.constant 0 : i32
    return %arg0, %c0_i32 : i32, i32
  }
  func.func @transform_1(%arg0: i32) -> (i32, i32) {
    %c0_i32 = arith.constant 0 : i32
    %c0_i32_0 = arith.constant 0 : i32
    %c0_i32_1 = arith.constant 0 : i32
    return %c0_i32, %c0_i32_0 : i32, i32
  }
  func.func @transform_2(%arg0: i32) -> (i32, i32) {
    %c0_i32 = arith.constant 0 : i32
    %c0_i32_0 = arith.constant 0 : i32
    %c0_i32_1 = arith.constant 0 : i32
    return %c0_i32, %c0_i32_0 : i32, i32
  }
  func.func @transform_3(%arg0: i32) -> (i32, i32) {
    %c0_i32 = arith.constant 0 : i32
    %c0_i32_0 = arith.constant 0 : i32
    return %arg0, %c0_i32 : i32, i32
  }
}

module attributes {stable_mosaic.version = 11 : i64} {
  func.func @_matmul_stats_kernel(%arg0: i32, %arg1: memref<32x512xbf16, #tpu.memory_space<vmem>>, %arg2: memref<512x128xbf16, #tpu.memory_space<vmem>>, %arg3: memref<32x128xf32, #tpu.memory_space<vmem>>, %arg4: memref<1x128xf32, #tpu.memory_space<vmem>>, %arg5: memref<1x128xf32, #tpu.memory_space<vmem>>) attributes {dimension_semantics = [#tpu.dimension_semantics<arbitrary>], iteration_bounds = array<i64: 1>, scalar_prefetch = 0 : i64, scratch_operands = 0 : i64, tpu.core_type = #tpu.core_type<tc>, window_params = [{transform_indices = @transform_0, window_bounds = array<i64: 32, 512>}, {pipeline_mode = #tpu.pipeline_mode<synchronous>, transform_indices = @transform_1, window_bounds = array<i64: 512, 128>}, {transform_indices = @transform_2, window_bounds = array<i64: 32, 128>}, {pipeline_mode = #tpu.pipeline_mode<synchronous>, transform_indices = @transform_3, window_bounds = array<i64: 1, 128>}, {pipeline_mode = #tpu.pipeline_mode<synchronous>, transform_indices = @transform_4, window_bounds = array<i64: 1, 128>}]} {
    %c0_i32 = arith.constant 0 : i32
    %0 = arith.cmpi eq, %arg0, %c0_i32 : i32
    %1 = arith.extui %0 : i1 to i32
    %c0_i32_0 = arith.constant 0 : i32
    %2 = arith.cmpi ne, %1, %c0_i32_0 : i32
    scf.if %2 {
      %cst_16 = arith.constant 0.000000e+00 : f32
      %18 = vector.broadcast %cst_16 : f32 to vector<1x128xf32>
      %c0_17 = arith.constant 0 : index
      %c0_18 = arith.constant 0 : index
      %19 = vector.load %arg4[%c0_17, %c0_18] : memref<1x128xf32, #tpu.memory_space<vmem>>, vector<1x128xf32>
      tpu.vector_store %arg4[%c0_17, %c0_18], %18 {strides = array<i32>} : memref<1x128xf32, #tpu.memory_space<vmem>>, vector<1x128xf32>,
      %cst_19 = arith.constant 0.000000e+00 : f32
      %20 = vector.broadcast %cst_19 : f32 to vector<1x128xf32>
      %c0_20 = arith.constant 0 : index
      %c0_21 = arith.constant 0 : index
      %21 = vector.load %arg5[%c0_20, %c0_21] : memref<1x128xf32, #tpu.memory_space<vmem>>, vector<1x128xf32>
      tpu.vector_store %arg5[%c0_20, %c0_21], %20 {strides = array<i32>} : memref<1x128xf32, #tpu.memory_space<vmem>>, vector<1x128xf32>,
    } else {
    }
    %c0 = arith.constant 0 : index
    %c0_1 = arith.constant 0 : index
    %3 = vector.load %arg1[%c0, %c0_1] : memref<32x512xbf16, #tpu.memory_space<vmem>>, vector<32x512xbf16>
    %c0_2 = arith.constant 0 : index
    %c0_3 = arith.constant 0 : index
    %4 = vector.load %arg2[%c0_2, %c0_3] : memref<512x128xbf16, #tpu.memory_space<vmem>>, vector<512x128xbf16>
    %cst = arith.constant dense<0.000000e+00> : vector<32x128xf32>
    %5 = tpu.matmul %3, %4, %cst {dimension_numbers = #tpu.dot_dimension_numbers<[1], [0], [0], [1], [0, 0, 1, 1], [], []>} : vector<32x512xbf16>, vector<512x128xbf16>, vector<32x128xf32> -> vector<32x128xf32>
    %c0_4 = arith.constant 0 : index
    %c0_5 = arith.constant 0 : index
    %6 = vector.load %arg3[%c0_4, %c0_5] : memref<32x128xf32, #tpu.memory_space<vmem>>, vector<32x128xf32>
    tpu.vector_store %arg3[%c0_4, %c0_5], %5 {strides = array<i32>} : memref<32x128xf32, #tpu.memory_space<vmem>>, vector<32x128xf32>,
    %c0_6 = arith.constant 0 : index
    %c0_7 = arith.constant 0 : index
    %7 = vector.load %arg4[%c0_6, %c0_7] : memref<1x128xf32, #tpu.memory_space<vmem>>, vector<1x128xf32>
    %cst_8 = arith.constant dense<0.000000e+00> : vector<128xf32>
    %8 = vector.multi_reduction <add>, %5, %cst_8 [0] : vector<32x128xf32> to vector<128xf32>
    %9 = vector.shape_cast %8 : vector<128xf32> to vector<1x128xf32>
    %10 = arith.addf %7, %9 : vector<1x128xf32>
    %c0_9 = arith.constant 0 : index
    %c0_10 = arith.constant 0 : index
    %11 = vector.load %arg4[%c0_9, %c0_10] : memref<1x128xf32, #tpu.memory_space<vmem>>, vector<1x128xf32>
    tpu.vector_store %arg4[%c0_9, %c0_10], %10 {strides = array<i32>} : memref<1x128xf32, #tpu.memory_space<vmem>>, vector<1x128xf32>,
    %c0_11 = arith.constant 0 : index
    %c0_12 = arith.constant 0 : index
    %12 = vector.load %arg5[%c0_11, %c0_12] : memref<1x128xf32, #tpu.memory_space<vmem>>, vector<1x128xf32>
    %13 = arith.mulf %5, %5 : vector<32x128xf32>
    %cst_13 = arith.constant dense<0.000000e+00> : vector<128xf32>
    %14 = vector.multi_reduction <add>, %13, %cst_13 [0] : vector<32x128xf32> to vector<128xf32>
    %15 = vector.shape_cast %14 : vector<128xf32> to vector<1x128xf32>
    %16 = arith.addf %12, %15 : vector<1x128xf32>
    %c0_14 = arith.constant 0 : index
    %c0_15 = arith.constant 0 : index
    %17 = vector.load %arg5[%c0_14, %c0_15] : memref<1x128xf32, #tpu.memory_space<vmem>>, vector<1x128xf32>
    tpu.vector_store %arg5[%c0_14, %c0_15], %16 {strides = array<i32>} : memref<1x128xf32, #tpu.memory_space<vmem>>, vector<1x128xf32>,
    return
  }
  func.func @transform_0(%arg0: i32) -> (i32, i32) {
    %c0_i32 = arith.constant 0 : i32
    %c0_i32_0 = arith.constant 0 : i32
    return %arg0, %c0_i32 : i32, i32
  }
  func.func @transform_1(%arg0: i32) -> (i32, i32) {
    %c0_i32 = arith.constant 0 : i32
    %c0_i32_0 = arith.constant 0 : i32
    %c0_i32_1 = arith.constant 0 : i32
    return %c0_i32, %c0_i32_0 : i32, i32
  }
  func.func @transform_2(%arg0: i32) -> (i32, i32) {
    %c0_i32 = arith.constant 0 : i32
    %c0_i32_0 = arith.constant 0 : i32
    return %arg0, %c0_i32 : i32, i32
  }
  func.func @transform_3(%arg0: i32) -> (i32, i32) {
    %c0_i32 = arith.constant 0 : i32
    %c0_i32_0 = arith.constant 0 : i32
    %c0_i32_1 = arith.constant 0 : i32
    return %c0_i32, %c0_i32_0 : i32, i32
  }
  func.func @transform_4(%arg0: i32) -> (i32, i32) {
    %c0_i32 = arith.constant 0 : i32
    %c0_i32_0 = arith.constant 0 : i32
    %c0_i32_1 = arith.constant 0 : i32
    return %c0_i32, %c0_i32_0 : i32, i32
  }
}

module attributes {stable_mosaic.version = 11 : i64} {
  func.func @_bn_lrelu_matmul_sigmoid_kernel(%arg0: i32, %arg1: memref<2x1024xf32, #tpu.memory_space<vmem>>, %arg2: memref<1x1024xf32, #tpu.memory_space<vmem>>, %arg3: memref<1x1024xf32, #tpu.memory_space<vmem>>, %arg4: memref<1024x128xbf16, #tpu.memory_space<vmem>>, %arg5: memref<2x128xf32, #tpu.memory_space<vmem>>) attributes {dimension_semantics = [#tpu.dimension_semantics<arbitrary>], iteration_bounds = array<i64: 1>, scalar_prefetch = 0 : i64, scratch_operands = 0 : i64, tpu.core_type = #tpu.core_type<tc>, window_params = [{pipeline_mode = #tpu.pipeline_mode<synchronous>, transform_indices = @transform_0, window_bounds = array<i64: 2, 1024>}, {pipeline_mode = #tpu.pipeline_mode<synchronous>, transform_indices = @transform_1, window_bounds = array<i64: 1, 1024>}, {pipeline_mode = #tpu.pipeline_mode<synchronous>, transform_indices = @transform_2, window_bounds = array<i64: 1, 1024>}, {pipeline_mode = #tpu.pipeline_mode<synchronous>, transform_indices = @transform_3, window_bounds = array<i64: 1024, 128>}, {pipeline_mode = #tpu.pipeline_mode<synchronous>, transform_indices = @transform_4, window_bounds = array<i64: 2, 128>}]} {
    %c0 = arith.constant 0 : index
    %c0_0 = arith.constant 0 : index
    %0 = vector.load %arg1[%c0, %c0_0] : memref<2x1024xf32, #tpu.memory_space<vmem>>, vector<2x1024xf32>
    %c0_1 = arith.constant 0 : index
    %c0_2 = arith.constant 0 : index
    %1 = vector.load %arg2[%c0_1, %c0_2] : memref<1x1024xf32, #tpu.memory_space<vmem>>, vector<1x1024xf32>
    %2 = vector.broadcast %1 : vector<1x1024xf32> to vector<2x1024xf32>
    %3 = arith.mulf %0, %2 : vector<2x1024xf32>
    %c0_3 = arith.constant 0 : index
    %c0_4 = arith.constant 0 : index
    %4 = vector.load %arg3[%c0_3, %c0_4] : memref<1x1024xf32, #tpu.memory_space<vmem>>, vector<1x1024xf32>
    %5 = vector.broadcast %4 : vector<1x1024xf32> to vector<2x1024xf32>
    %6 = arith.addf %3, %5 : vector<2x1024xf32>
    %cst = arith.constant 0.000000e+00 : f32
    %7 = vector.broadcast %cst : f32 to vector<2x1024xf32>
    %8 = arith.cmpf oge, %6, %7 : vector<2x1024xf32>
    %cst_5 = arith.constant 2.000000e-01 : f32
    %9 = vector.broadcast %cst_5 : f32 to vector<2x1024xf32>
    %10 = arith.mulf %9, %6 : vector<2x1024xf32>
    %11 = arith.select %8, %6, %10 : vector<2x1024xi1>, vector<2x1024xf32>
    %12 = arith.truncf %11 : vector<2x1024xf32> to vector<2x1024xbf16>
    %c0_6 = arith.constant 0 : index
    %c0_7 = arith.constant 0 : index
    %13 = vector.load %arg4[%c0_6, %c0_7] : memref<1024x128xbf16, #tpu.memory_space<vmem>>, vector<1024x128xbf16>
    %cst_8 = arith.constant dense<0.000000e+00> : vector<2x128xf32>
    %14 = tpu.matmul %12, %13, %cst_8 {dimension_numbers = #tpu.dot_dimension_numbers<[1], [0], [0], [1], [0, 0, 1, 1], [], []>} : vector<2x1024xbf16>, vector<1024x128xbf16>, vector<2x128xf32> -> vector<2x128xf32>
    %15 = math.absf %14 : vector<2x128xf32>
    %cst_9 = arith.constant 0.000000e+00 : f32
    %16 = vector.broadcast %cst_9 : f32 to vector<2x128xf32>
    %17 = arith.subf %16, %15 : vector<2x128xf32>
    %18 = math.exp %17 : vector<2x128xf32>
    %cst_10 = arith.constant 0.000000e+00 : f32
    %19 = vector.broadcast %cst_10 : f32 to vector<2x128xf32>
    %20 = arith.cmpf oge, %14, %19 : vector<2x128xf32>
    %cst_11 = arith.constant 1.000000e+00 : f32
    %21 = vector.broadcast %cst_11 : f32 to vector<2x128xf32>
    %22 = arith.addf %21, %18 : vector<2x128xf32>
    %cst_12 = arith.constant 1.000000e+00 : f32
    %23 = vector.broadcast %cst_12 : f32 to vector<2x128xf32>
    %24 = arith.divf %23, %22 : vector<2x128xf32>
    %cst_13 = arith.constant 1.000000e+00 : f32
    %25 = vector.broadcast %cst_13 : f32 to vector<2x128xf32>
    %26 = arith.addf %25, %18 : vector<2x128xf32>
    %27 = arith.divf %18, %26 : vector<2x128xf32>
    %28 = arith.select %20, %24, %27 : vector<2x128xi1>, vector<2x128xf32>
    %c0_14 = arith.constant 0 : index
    %c0_15 = arith.constant 0 : index
    %29 = vector.load %arg5[%c0_14, %c0_15] : memref<2x128xf32, #tpu.memory_space<vmem>>, vector<2x128xf32>
    tpu.vector_store %arg5[%c0_14, %c0_15], %28 {strides = array<i32>} : memref<2x128xf32, #tpu.memory_space<vmem>>, vector<2x128xf32>,
    return
  }
  func.func @transform_0(%arg0: i32) -> (i32, i32) {
    %c0_i32 = arith.constant 0 : i32
    %c0_i32_0 = arith.constant 0 : i32
    %c0_i32_1 = arith.constant 0 : i32
    return %c0_i32, %c0_i32_0 : i32, i32
  }
  func.func @transform_1(%arg0: i32) -> (i32, i32) {
    %c0_i32 = arith.constant 0 : i32
    %c0_i32_0 = arith.constant 0 : i32
    %c0_i32_1 = arith.constant 0 : i32
    return %c0_i32, %c0_i32_0 : i32, i32
  }
  func.func @transform_2(%arg0: i32) -> (i32, i32) {
    %c0_i32 = arith.constant 0 : i32
    %c0_i32_0 = arith.constant 0 : i32
    %c0_i32_1 = arith.constant 0 : i32
    return %c0_i32, %c0_i32_0 : i32, i32
  }
  func.func @transform_3(%arg0: i32) -> (i32, i32) {
    %c0_i32 = arith.constant 0 : i32
    %c0_i32_0 = arith.constant 0 : i32
    %c0_i32_1 = arith.constant 0 : i32
    return %c0_i32, %c0_i32_0 : i32, i32
  }
  func.func @transform_4(%arg0: i32) -> (i32, i32) {
    %c0_i32 = arith.constant 0 : i32
    %c0_i32_0 = arith.constant 0 : i32
    %c0_i32_1 = arith.constant 0 : i32
    return %c0_i32, %c0_i32_0 : i32, i32
  }
}

</mosaic_0001>

<bundles_post_ra>
// kernel: discriminator_forward.7
= control target key start
LH: loop header
LB: loop body
LE: loop exit
PB: predicated region body
PF: predicated region fallthrough
CT: control target
= control target key end

     0   :  { %s1902_s9 = smov 0   ;;  %s2025_s0 = inlined_call_operand.vmem [shape: bf16[2048,128], index: 0, kind: input, shape index: {}]   ;;  %s2026_s1 = inlined_call_operand.vmem [shape: bf16[128,128], index: 1, kind: input, shape index: {}]   ;;  %s2027_s2 = inlined_call_operand.vmem [shape: bf16[2048,128], index: 2, kind: output, shape index: {}]  }
   0x1 LB: > { %s1325_s10 = sadd.s32 4294967295, %s1885_s9   ;;  %p1329_p0 = scmp.ge.s32.totalorder %s1885_s9, 1  ;;  %s1885_s9 = sphi %s1902_s9, %s12_s9  }
   0x2   : > { %p113_p1 = scmp.lt.s32.totalorder %s1885_s9, 5 }
   0x4   : > { %p114_p2 = pnand %p1329_p0, %p113_p1 }
   0x5   : > { %v1839_v0 = vld [vmem:[%s2026_s1] sm:$0xff] (!%p114_p2)   ;;  %s1330_s13 = sshll.u32 (!%p114_p2), %s1325_s10, 6  ;;  %v1840_v1 = vld [vmem:[%s2026_s1 + $0x8] sm:$0xff] (!%p114_p2)   ;;  %v1841_v2 = vld [vmem:[%s2026_s1 + $0x10] sm:$0xff] (!%p114_p2)  }
   0x6   : > { %117 = sbr.rel (%p114_p2) target bundleno = 317 (0x13d), region = 28  ;;  %p136_p3 = scmp.lt.s32.totalorder (!%p114_p2), %s1330_s13, 255  ;;  %1735 = vmatprep.subr.bf16.mxu0 (!%p114_p2), %v1839_v0  ;;  %1815 = vmatprep.subr.bf16.mxu1 (!%p114_p2), %v1839_v0  ;;  %v1842_v3 = vld [vmem:[%s2026_s1 + $0x18] sm:$0xff] (!%p114_p2)   ;;  %v1843_v6 = vld [vmem:[%s2026_s1 + $0x20] sm:$0xff] (!%p114_p2)   ;;  %v1844_v7 = vld [vmem:[%s2026_s1 + $0x28] sm:$0xff] (!%p114_p2)  }
   0x7   : > { %1736 = vmatpush3.bf16.msra.mxu0 (!%p114_p2), %v1839_v0  ;;  %1823 = vmatpush3.bf16.msra.mxu1 (!%p114_p2), %v1839_v0  ;;  %v1845_v8 = vld [vmem:[%s2026_s1 + $0x30] sm:$0xff] (!%p114_p2)   ;;  %v1846_v9 = vld [vmem:[%s2026_s1 + $0x38] sm:$0xff] (!%p114_p2)  }
   0x8   : > { %1737 = vmatprep.subr.bf16.mxu0 (!%p114_p2), %v1840_v1  ;;  %1816 = vmatprep.subr.bf16.mxu1 (!%p114_p2), %v1840_v1 }
   0xb   : > { %1738 = vmatpush3.bf16.msra.mxu0 (!%p114_p2), %v1840_v1  ;;  %1824 = vmatpush3.bf16.msra.mxu1 (!%p114_p2), %v1840_v1 }
   0xc   : > { %1739 = vmatprep.subr.bf16.mxu0 (!%p114_p2), %v1841_v2  ;;  %1817 = vmatprep.subr.bf16.mxu1 (!%p114_p2), %v1841_v2 }
   0xd   : > { %s2029_s13 = smov (!%p136_p3, %s1330_s13), 255 }
   0xe   : > { %s1331_s18 = sshll.u32 %s2029_s13, 2 }
   0xf   : > { %s1927_s21 = scalar_lea.vmem %s2025_s0, %s1331_s18  ;;  %1740 = vmatpush3.bf16.msra.mxu0 %v1841_v2  ;;  %1825 = vmatpush3.bf16.msra.mxu1 %v1841_v2  ;;  %s1981_s6 = scalar_lea.vmem %s2027_s2, %s1331_s18 }
  0x10   : > { %v1847_v4 = vld [vmem:[%s1927_s21] sm:$0xff]   ;;  %1741 = vmatprep.subr.bf16.mxu0 %v1842_v3  ;;  %1818 = vmatprep.subr.bf16.mxu1 %v1842_v3  ;;  %v1849_v10 = vld [vmem:[%s1927_s21 + $0x8] sm:$0xff]   ;;  %v1851_v12 = vld [vmem:[%s1927_s21 + $0x10] sm:$0xff]  }
  0x11   : > { %v1848_v5 = vld [vmem:[%s1927_s21 + $0x80] sm:$0xff]   ;;  %1751 = vmatprep.mubr.bf16.mxu0 %v1847_v4  ;;  %v1850_v11 = vld [vmem:[%s1927_s21 + $0x88] sm:$0xff]   ;;  %v1852_v13 = vld [vmem:[%s1927_s21 + $0x90] sm:$0xff]  }
  0x12   : > { %1783 = vmatprep.mubr.bf16.mxu1 %v1848_v5  ;;  %v1853_v14 = vld [vmem:[%s1927_s21 + $0x18] sm:$0xff]   ;;  %v1855_v16 = vld [vmem:[%s1927_s21 + $0x20] sm:$0xff]   ;;  %v1857_v18 = vld [vmem:[%s1927_s21 + $0x28] sm:$0xff]  }
  0x13   : > { %1742 = vmatpush3.bf16.msra.mxu0 %v1842_v3  ;;  %1826 = vmatpush3.bf16.msra.mxu1 %v1842_v3  ;;  %v1854_v15 = vld [vmem:[%s1927_s21 + $0x98] sm:$0xff]   ;;  %v1856_v17 = vld [vmem:[%s1927_s21 + $0xa0] sm:$0xff]   ;;  %v1858_v19 = vld [vmem:[%s1927_s21 + $0xa8] sm:$0xff]  }
  0x14   : > { %1743 = vmatprep.subr.bf16.mxu0 %v1843_v6  ;;  %1819 = vmatprep.subr.bf16.mxu1 %v1843_v6  ;;  %v1859_v20 = vld [vmem:[%s1927_s21 + $0x30] sm:$0xff]   ;;  %v1861_v22 = vld [vmem:[%s1927_s21 + $0x38] sm:$0xff]   ;;  %v1863_v24 = vld [vmem:[%s1927_s21 + $0x40] sm:$0xff]  }
  0x15   : > { %v1860_v21 = vld [vmem:[%s1927_s21 + $0xb0] sm:$0xff]   ;;  %v1862_v23 = vld [vmem:[%s1927_s21 + $0xb8] sm:$0xff]   ;;  %v1864_v25 = vld [vmem:[%s1927_s21 + $0xc0] sm:$0xff]  }
  0x16   : > { %v1865_v26 = vld [vmem:[%s1927_s21 + $0x48] sm:$0xff]   ;;  %v1867_v28 = vld [vmem:[%s1927_s21 + $0x50] sm:$0xff]   ;;  %v1869_v30 = vld [vmem:[%s1927_s21 + $0x58] sm:$0xff]  }
  0x17   : > { %1744 = vmatpush3.bf16.msra.mxu0 %v1843_v6  ;;  %1827 = vmatpush3.bf16.msra.mxu1 %v1843_v6  ;;  %v1866_v27 = vld [vmem:[%s1927_s21 + $0xc8] sm:$0xff]   ;;  %v1868_v29 = vld [vmem:[%s1927_s21 + $0xd0] sm:$0xff]   ;;  %v1870_v31 = vld [vmem:[%s1927_s21 + $0xd8] sm:$0xff]  }
  0x18   : > { %1745 = vmatprep.subr.bf16.mxu0 %v1844_v7  ;;  %1820 = vmatprep.subr.bf16.mxu1 %v1844_v7  ;;  %v1871_v32 = vld [vmem:[%s1927_s21 + $0x60] sm:$0xff]   ;;  %v1873_v34 = vld [vmem:[%s1927_s21 + $0x68] sm:$0xff]   ;;  %v1875_v36 = vld [vmem:[%s1927_s21 + $0x70] sm:$0xff]  }
  0x19   : > { %v1872_v33 = vld [vmem:[%s1927_s21 + $0xe0] sm:$0xff]   ;;  %v1874_v35 = vld [vmem:[%s1927_s21 + $0xe8] sm:$0xff]   ;;  %v1876_v37 = vld [vmem:[%s1927_s21 + $0xf0] sm:$0xff]  }
  0x1a   : > { %v1877_v38 = vld [vmem:[%s1927_s21 + $0x78] sm:$0xff]  }
  0x1b   : > { %1746 = vmatpush3.bf16.msra.mxu0 %v1844_v7  ;;  %1828 = vmatpush3.bf16.msra.mxu1 %v1844_v7  ;;  %v1878_v39 = vld [vmem:[%s1927_s21 + $0xf8] sm:$0xff]  }
  0x1c   : > { %1747 = vmatprep.subr.bf16.mxu0 %v1845_v8  ;;  %1821 = vmatprep.subr.bf16.mxu1 %v1845_v8 }
  0x1f   : > { %1748 = vmatpush3.bf16.msra.mxu0 %v1845_v8  ;;  %1829 = vmatpush3.bf16.msra.mxu1 %v1845_v8 }
  0x20   : > { %1749 = vmatprep.subr.bf16.mxu0 %v1846_v9  ;;  %1822 = vmatprep.subr.bf16.mxu1 %v1846_v9 }
  0x23   : > { %1750 = vmatpush3.bf16.msra.mxu0 %v1846_v9  ;;  %1830 = vmatpush3.bf16.msra.mxu1 %v1846_v9 }
  0x26   : > { %1752 = vmatmul.mubr.bf16.vlgmr.msra.gmra.mrb[0].mxu0 %v1849_v10  ;;  %1784 = vmatmul.mubr.bf16.vlgmr.msra.gmra.mrb[0].mxu1 %v1850_v11 }
  0x27   : > { %1755 = vmatprep.mubr.bf16.mxu0 %v1851_v12  ;;  %1787 = vmatprep.mubr.bf16.mxu1 %v1852_v13 }
  0x2e   : > { %1756 = vmatmul.mubr.bf16.gmra.mrb[4].mxu0 %v1853_v14  ;;  %1788 = vmatmul.mubr.bf16.gmra.mrb[4].mxu1 %v1854_v15 }
  0x2f   : > { %1759 = vmatprep.mubr.bf16.mxu0 %v1855_v16  ;;  %1791 = vmatprep.mubr.bf16.mxu1 %v1856_v17 }
  0x36   : > { %1760 = vmatmul.mubr.bf16.gmra.mrb[8].mxu0 %v1857_v18  ;;  %1792 = vmatmul.mubr.bf16.gmra.mrb[8].mxu1 %v1858_v19 }
  0x37   : > { %1763 = vmatprep.mubr.bf16.mxu0 %v1859_v20  ;;  %1795 = vmatprep.mubr.bf16.mxu1 %v1860_v21 }
  0x3e   : > { %1764 = vmatmul.mubr.bf16.gmra.mrb[12].mxu0 %v1861_v22  ;;  %1796 = vmatmul.mubr.bf16.gmra.mrb[12].mxu1 %v1862_v23 }
  0x3f   : > { %1767 = vmatprep.mubr.bf16.mxu0 %v1863_v24  ;;  %1799 = vmatprep.mubr.bf16.mxu1 %v1864_v25 }
  0x46   : > { %1768 = vmatmul.mubr.bf16.gmra.mrb[16].mxu0 %v1865_v26  ;;  %1800 = vmatmul.mubr.bf16.gmra.mrb[16].mxu1 %v1866_v27 }
  0x47   : > { %1771 = vmatprep.mubr.bf16.mxu0 %v1867_v28  ;;  %1803 = vmatprep.mubr.bf16.mxu1 %v1868_v29 }
  0x4e   : > { %1772 = vmatmul.mubr.bf16.gmra.mrb[20].mxu0 %v1869_v30  ;;  %1804 = vmatmul.mubr.bf16.gmra.mrb[20].mxu1 %v1870_v31 }
  0x4f   : > { %1775 = vmatprep.mubr.bf16.mxu0 %v1871_v32  ;;  %1807 = vmatprep.mubr.bf16.mxu1 %v1872_v33 }
  0x56   : > { %1776 = vmatmul.mubr.bf16.gmra.mrb[24].mxu0 %v1873_v34  ;;  %1808 = vmatmul.mubr.bf16.gmra.mrb[24].mxu1 %v1874_v35 }
  0x57   : > { %1779 = vmatprep.mubr.bf16.mxu0 %v1875_v36  ;;  %1811 = vmatprep.mubr.bf16.mxu1 %v1876_v37 }
  0x5e   : > { %1780 = vmatmul.mubr.bf16.gmra.mrb[28].mxu0 %v1877_v38  ;;  %1812 = vmatmul.mubr.bf16.gmra.mrb[28].mxu1 %v1878_v39 }
  0xf9   : > { %v1753_v40 = vpop.f32.mrb[0].mxu0  ;;  %v1785_v41 = vpop.f32.mrb[0].mxu1 }
  0xfa   : > { %vm759_vm0 = vcmp.ge.f32.partialorder %v1753_v40, 0.0  ;;  %v823_v42 = vmul.f32 0.2, %v1753_v40  ;;  %v855_v43 = vmul.f32 0.2, %v1785_v41  ;;  %vm791_vm1 = vcmp.ge.f32.partialorder %v1785_v41, 0.0 }
  0xfb   : > { %v502_v44 = vpop.f32.mrb[1].mxu0  ;;  %v630_v45 = vpop.f32.mrb[1].mxu1 }
  0xfc   : > { %v821_v46 = vmul.f32 0.2, %v502_v44  ;;  %v1754_v47 = vpop.f32.mrb[2].mxu0  ;;  %v1786_v48 = vpop.f32.mrb[2].mxu1  ;;  %v887_v49 = vsel %vm759_vm0, %v1753_v40, %v823_v42  ;;  %v853_v50 = vmul.f32 0.2, %v630_v45  ;;  %v919_v52 = vsel %vm791_vm1, %v1785_v41, %v855_v43 }
  0xfd   : > { %vm760_vm2 = vcmp.ge.f32.partialorder %v1754_v47, 0.0  ;;  %v824_v51 = vmul.f32 0.2, %v1754_v47  ;;  %vm757_vm3 = vcmp.ge.f32.partialorder %v502_v44, 0.0  ;;  %vm792_vm4 = vcmp.ge.f32.partialorder %v1786_v48, 0.0  ;;  %v505_v54 = vpop.f32.mrb[3].mxu0 }
  0xfe   : > { %v856_v53 = vmul.f32 0.2, %v1786_v48  ;;  %v633_v55 = vpop.f32.mrb[3].mxu1  ;;  %vm789_vm5 = vcmp.ge.f32.partialorder %v630_v45, 0.0  ;;  %vm758_vm6 = vcmp.ge.f32.partialorder %v505_v54, 0.0  ;;  %v885_v61 = vsel %vm757_vm3, %v502_v44, %v821_v46 }
  0xff   : > { %v888_v56 = vsel %vm760_vm2, %v1754_v47, %v824_v51  ;;  %v822_v57 = vmul.f32 0.2, %v505_v54  ;;  %vm790_vm7 = vcmp.ge.f32.partialorder %v633_v55, 0.0  ;;  %v854_v60 = vmul.f32 0.2, %v633_v55 }
 0x100   : > { %v1512_v58 = vpack.c.bf16 %v888_v56, %v887_v49  ;;  %v920_v59 = vsel %vm792_vm4, %v1786_v48, %v856_v53  ;;  %v917_v2 = vsel %vm789_vm5, %v630_v45, %v853_v50 }
 0x101   : > { %v1592_v62 = vpack.c.bf16 %v920_v59, %v919_v52  ;;  %v886_v63 = vsel %vm758_vm6, %v505_v54, %v822_v57  ;;  %v1757_v0 = vpop.f32.mrb[4].mxu0  ;;  %v1789_v1 = vpop.f32.mrb[4].mxu1  ;;  %v918_v4 = vsel %vm790_vm7, %v633_v55, %v854_v60 }
 0x102   : > { %1664 = vst [vmem:[%s1981_s6 + $0x8] sm:$0xff] %v1512_v58   ;;  %v1507_v3 = vpack.c.bf16 %v886_v63, %v885_v61  ;;  %v827_v5 = vmul.f32 0.2, %v1757_v0  ;;  %v518_v6 = vpop.f32.mrb[5].mxu0  ;;  %v646_v7 = vpop.f32.mrb[5].mxu1  ;;  %v1587_v8 = vpack.c.bf16 %v918_v4, %v917_v2  ;;  %vm763_vm8 = vcmp.ge.f32.partialorder %v1757_v0, 0.0 }
 0x103   : > { %1680 = vst [vmem:[%s1981_s6 + $0x88] sm:$0xff] %v1592_v62   ;;  %v859_v9 = vmul.f32 0.2, %v1789_v1  ;;  %v1758_v10 = vpop.f32.mrb[6].mxu0  ;;  %v1790_v11 = vpop.f32.mrb[6].mxu1  ;;  %vm795_vm9 = vcmp.ge.f32.partialorder %v1789_v1, 0.0 }
 0x104   : > { %1508 = vst [vmem:[%s1981_s6] sm:$0xff] %v1507_v3   ;;  %v825_v12 = vmul.f32 0.2, %v518_v6  ;;  %v857_v13 = vmul.f32 0.2, %v646_v7  ;;  %v521_v14 = vpop.f32.mrb[7].mxu0  ;;  %1679 = vst [vmem:[%s1981_s6 + $0x80] sm:$0xff] %v1587_v8   ;;  %v891_v17 = vsel %vm763_vm8, %v1757_v0, %v827_v5 }
 0x105   : > { %vm761_vm10 = vcmp.ge.f32.partialorder %v518_v6, 0.0  ;;  %vm764_vm11 = vcmp.ge.f32.partialorder %v1758_v10, 0.0  ;;  %v828_v15 = vmul.f32 0.2, %v1758_v10  ;;  %vm796_vm12 = vcmp.ge.f32.partialorder %v1790_v11, 0.0  ;;  %v649_v16 = vpop.f32.mrb[7].mxu1 }
 0x106   : > { %vm793_vm13 = vcmp.ge.f32.partialorder %v646_v7, 0.0  ;;  %v860_v18 = vmul.f32 0.2, %v1790_v11  ;;  %vm762_vm14 = vcmp.ge.f32.partialorder %v521_v14, 0.0  ;;  %v826_v20 = vmul.f32 0.2, %v521_v14 }
 0x107   : > { %v892_v19 = vsel %vm764_vm11, %v1758_v10, %v828_v15  ;;  %vm794_vm15 = vcmp.ge.f32.partialorder %v649_v16, 0.0  ;;  %v858_v21 = vmul.f32 0.2, %v649_v16  ;;  %v923_v22 = vsel %vm795_vm9, %v1789_v1, %v859_v9 }
 0x108   : > { %v889_v23 = vsel %vm761_vm10, %v518_v6, %v825_v12  ;;  %v1522_v24 = vpack.c.bf16 %v892_v19, %v891_v17  ;;  %v924_v25 = vsel %vm796_vm12, %v1790_v11, %v860_v18  ;;  %v921_v26 = vsel %vm793_vm13, %v646_v7, %v857_v13 }
 0x109   : > { %v1602_v27 = vpack.c.bf16 %v924_v25, %v923_v22  ;;  %v890_v28 = vsel %vm762_vm14, %v521_v14, %v826_v20  ;;  %v922_v29 = vsel %vm794_vm15, %v649_v16, %v858_v21  ;;  %v1761_v30 = vpop.f32.mrb[8].mxu0  ;;  %v1793_v31 = vpop.f32.mrb[8].mxu1 }
 0x10a   : > { %1666 = vst [vmem:[%s1981_s6 + $0x18] sm:$0xff] %v1522_v24   ;;  %v1517_v32 = vpack.c.bf16 %v890_v28, %v889_v23  ;;  %v1597_v33 = vpack.c.bf16 %v922_v29, %v921_v26  ;;  %vm767_vm0 = vcmp.ge.f32.partialorder %v1761_v30, 0.0  ;;  %v831_v34 = vmul.f32 0.2, %v1761_v30  ;;  %v534_v35 = vpop.f32.mrb[9].mxu0  ;;  %v662_v36 = vpop.f32.mrb[9].mxu1 }
 0x10b   : > { %1682 = vst [vmem:[%s1981_s6 + $0x98] sm:$0xff] %v1602_v27   ;;  %vm799_vm1 = vcmp.ge.f32.partialorder %v1793_v31, 0.0  ;;  %v863_v37 = vmul.f32 0.2, %v1793_v31  ;;  %v829_v38 = vmul.f32 0.2, %v534_v35 }
 0x10c   : > { %1665 = vst [vmem:[%s1981_s6 + $0x10] sm:$0xff] %v1517_v32   ;;  %1681 = vst [vmem:[%s1981_s6 + $0x90] sm:$0xff] %v1597_v33   ;;  %v861_v39 = vmul.f32 0.2, %v662_v36  ;;  %v1762_v40 = vpop.f32.mrb[10].mxu0  ;;  %v1794_v41 = vpop.f32.mrb[10].mxu1  ;;  %v895_v42 = vsel %vm767_vm0, %v1761_v30, %v831_v34 }
 0x10d   : > { %vm765_vm2 = vcmp.ge.f32.partialorder %v534_v35, 0.0  ;;  %vm768_vm3 = vcmp.ge.f32.partialorder %v1762_v40, 0.0  ;;  %v832_v43 = vmul.f32 0.2, %v1762_v40  ;;  %v537_v44 = vpop.f32.mrb[11].mxu0  ;;  %v665_v45 = vpop.f32.mrb[11].mxu1  ;;  %v927_v50 = vsel %vm799_vm1, %v1793_v31, %v863_v37 }
 0x10e   : > { %vm797_vm4 = vcmp.ge.f32.partialorder %v662_v36, 0.0  ;;  %vm800_vm5 = vcmp.ge.f32.partialorder %v1794_v41, 0.0  ;;  %v864_v46 = vmul.f32 0.2, %v1794_v41  ;;  %vm766_vm6 = vcmp.ge.f32.partialorder %v537_v44, 0.0 }
 0x10f   : > { %v896_v47 = vsel %vm768_vm3, %v1762_v40, %v832_v43  ;;  %v830_v48 = vmul.f32 0.2, %v537_v44  ;;  %vm798_vm7 = vcmp.ge.f32.partialorder %v665_v45, 0.0  ;;  %v862_v49 = vmul.f32 0.2, %v665_v45 }
 0x110   : > { %v893_v51 = vsel %vm765_vm2, %v534_v35, %v829_v38  ;;  %v1532_v52 = vpack.c.bf16 %v896_v47, %v895_v42  ;;  %v928_v53 = vsel %vm800_vm5, %v1794_v41, %v864_v46  ;;  %v925_v54 = vsel %vm797_vm4, %v662_v36, %v861_v39 }
 0x111   : > { %v1612_v55 = vpack.c.bf16 %v928_v53, %v927_v50  ;;  %v894_v56 = vsel %vm766_vm6, %v537_v44, %v830_v48  ;;  %v926_v57 = vsel %vm798_vm7, %v665_v45, %v862_v49  ;;  %v1765_v58 = vpop.f32.mrb[12].mxu0  ;;  %v1797_v59 = vpop.f32.mrb[12].mxu1 }
 0x112   : > { %1668 = vst [vmem:[%s1981_s6 + $0x28] sm:$0xff] %v1532_v52   ;;  %v1527_v60 = vpack.c.bf16 %v894_v56, %v893_v51  ;;  %v1607_v61 = vpack.c.bf16 %v926_v57, %v925_v54  ;;  %vm771_vm8 = vcmp.ge.f32.partialorder %v1765_v58, 0.0  ;;  %v835_v62 = vmul.f32 0.2, %v1765_v58  ;;  %v550_v63 = vpop.f32.mrb[13].mxu0  ;;  %v678_v0 = vpop.f32.mrb[13].mxu1 }
 0x113   : > { %1684 = vst [vmem:[%s1981_s6 + $0xa8] sm:$0xff] %v1612_v55   ;;  %vm803_vm9 = vcmp.ge.f32.partialorder %v1797_v59, 0.0  ;;  %v867_v1 = vmul.f32 0.2, %v1797_v59  ;;  %v833_v2 = vmul.f32 0.2, %v550_v63 }
 0x114   : > { %1667 = vst [vmem:[%s1981_s6 + $0x20] sm:$0xff] %v1527_v60   ;;  %1683 = vst [vmem:[%s1981_s6 + $0xa0] sm:$0xff] %v1607_v61   ;;  %v865_v3 = vmul.f32 0.2, %v678_v0  ;;  %v1766_v4 = vpop.f32.mrb[14].mxu0  ;;  %v1798_v5 = vpop.f32.mrb[14].mxu1  ;;  %v899_v6 = vsel %vm771_vm8, %v1765_v58, %v835_v62 }
 0x115   : > { %vm769_vm10 = vcmp.ge.f32.partialorder %v550_v63, 0.0  ;;  %vm772_vm11 = vcmp.ge.f32.partialorder %v1766_v4, 0.0  ;;  %v836_v7 = vmul.f32 0.2, %v1766_v4  ;;  %v553_v8 = vpop.f32.mrb[15].mxu0  ;;  %v681_v9 = vpop.f32.mrb[15].mxu1  ;;  %v931_v14 = vsel %vm803_vm9, %v1797_v59, %v867_v1 }
 0x116   : > { %vm801_vm12 = vcmp.ge.f32.partialorder %v678_v0, 0.0  ;;  %vm804_vm13 = vcmp.ge.f32.partialorder %v1798_v5, 0.0  ;;  %v868_v10 = vmul.f32 0.2, %v1798_v5  ;;  %vm770_vm14 = vcmp.ge.f32.partialorder %v553_v8, 0.0 }
 0x117   : > { %v900_v11 = vsel %vm772_vm11, %v1766_v4, %v836_v7  ;;  %v834_v12 = vmul.f32 0.2, %v553_v8  ;;  %vm802_vm15 = vcmp.ge.f32.partialorder %v681_v9, 0.0  ;;  %v866_v13 = vmul.f32 0.2, %v681_v9 }
 0x118   : > { %v897_v15 = vsel %vm769_vm10, %v550_v63, %v833_v2  ;;  %v1542_v16 = vpack.c.bf16 %v900_v11, %v899_v6  ;;  %v932_v17 = vsel %vm804_vm13, %v1798_v5, %v868_v10  ;;  %v929_v18 = vsel %vm801_vm12, %v678_v0, %v865_v3 }
 0x119   : > { %v1622_v19 = vpack.c.bf16 %v932_v17, %v931_v14  ;;  %v898_v20 = vsel %vm770_vm14, %v553_v8, %v834_v12  ;;  %v930_v21 = vsel %vm802_vm15, %v681_v9, %v866_v13  ;;  %v1769_v22 = vpop.f32.mrb[16].mxu0  ;;  %v1801_v23 = vpop.f32.mrb[16].mxu1 }
 0x11a   : > { %1670 = vst [vmem:[%s1981_s6 + $0x38] sm:$0xff] %v1542_v16   ;;  %v1537_v24 = vpack.c.bf16 %v898_v20, %v897_v15  ;;  %v1617_v25 = vpack.c.bf16 %v930_v21, %v929_v18  ;;  %vm775_vm0 = vcmp.ge.f32.partialorder %v1769_v22, 0.0  ;;  %v839_v26 = vmul.f32 0.2, %v1769_v22  ;;  %v566_v27 = vpop.f32.mrb[17].mxu0  ;;  %v694_v28 = vpop.f32.mrb[17].mxu1 }
 0x11b   : > { %1686 = vst [vmem:[%s1981_s6 + $0xb8] sm:$0xff] %v1622_v19   ;;  %vm807_vm1 = vcmp.ge.f32.partialorder %v1801_v23, 0.0  ;;  %v871_v29 = vmul.f32 0.2, %v1801_v23  ;;  %v837_v30 = vmul.f32 0.2, %v566_v27 }
 0x11c   : > { %1669 = vst [vmem:[%s1981_s6 + $0x30] sm:$0xff] %v1537_v24   ;;  %1685 = vst [vmem:[%s1981_s6 + $0xb0] sm:$0xff] %v1617_v25   ;;  %v869_v31 = vmul.f32 0.2, %v694_v28  ;;  %v1770_v32 = vpop.f32.mrb[18].mxu0  ;;  %v1802_v33 = vpop.f32.mrb[18].mxu1  ;;  %v903_v34 = vsel %vm775_vm0, %v1769_v22, %v839_v26 }
 0x11d   : > { %vm773_vm2 = vcmp.ge.f32.partialorder %v566_v27, 0.0  ;;  %vm776_vm3 = vcmp.ge.f32.partialorder %v1770_v32, 0.0  ;;  %v840_v35 = vmul.f32 0.2, %v1770_v32  ;;  %v569_v36 = vpop.f32.mrb[19].mxu0  ;;  %v697_v37 = vpop.f32.mrb[19].mxu1  ;;  %v935_v42 = vsel %vm807_vm1, %v1801_v23, %v871_v29 }
 0x11e   : > { %vm805_vm4 = vcmp.ge.f32.partialorder %v694_v28, 0.0  ;;  %vm808_vm5 = vcmp.ge.f32.partialorder %v1802_v33, 0.0  ;;  %v872_v38 = vmul.f32 0.2, %v1802_v33  ;;  %vm774_vm6 = vcmp.ge.f32.partialorder %v569_v36, 0.0 }
 0x11f   : > { %v904_v39 = vsel %vm776_vm3, %v1770_v32, %v840_v35  ;;  %v838_v40 = vmul.f32 0.2, %v569_v36  ;;  %vm806_vm7 = vcmp.ge.f32.partialorder %v697_v37, 0.0  ;;  %v870_v41 = vmul.f32 0.2, %v697_v37 }
 0x120   : > { %v901_v43 = vsel %vm773_vm2, %v566_v27, %v837_v30  ;;  %v1552_v44 = vpack.c.bf16 %v904_v39, %v903_v34  ;;  %v936_v45 = vsel %vm808_vm5, %v1802_v33, %v872_v38  ;;  %v933_v46 = vsel %vm805_vm4, %v694_v28, %v869_v31 }
 0x121   : > { %v1632_v47 = vpack.c.bf16 %v936_v45, %v935_v42  ;;  %v902_v48 = vsel %vm774_vm6, %v569_v36, %v838_v40  ;;  %v934_v49 = vsel %vm806_vm7, %v697_v37, %v870_v41  ;;  %v1773_v50 = vpop.f32.mrb[20].mxu0  ;;  %v1805_v51 = vpop.f32.mrb[20].mxu1 }
 0x122   : > { %1672 = vst [vmem:[%s1981_s6 + $0x48] sm:$0xff] %v1552_v44   ;;  %v1547_v52 = vpack.c.bf16 %v902_v48, %v901_v43  ;;  %v1627_v53 = vpack.c.bf16 %v934_v49, %v933_v46  ;;  %vm779_vm8 = vcmp.ge.f32.partialorder %v1773_v50, 0.0  ;;  %v843_v54 = vmul.f32 0.2, %v1773_v50  ;;  %v582_v55 = vpop.f32.mrb[21].mxu0  ;;  %v710_v56 = vpop.f32.mrb[21].mxu1 }
 0x123   : > { %1688 = vst [vmem:[%s1981_s6 + $0xc8] sm:$0xff] %v1632_v47   ;;  %vm811_vm9 = vcmp.ge.f32.partialorder %v1805_v51, 0.0  ;;  %v875_v57 = vmul.f32 0.2, %v1805_v51  ;;  %v841_v58 = vmul.f32 0.2, %v582_v55 }
 0x124   : > { %1671 = vst [vmem:[%s1981_s6 + $0x40] sm:$0xff] %v1547_v52   ;;  %1687 = vst [vmem:[%s1981_s6 + $0xc0] sm:$0xff] %v1627_v53   ;;  %v873_v59 = vmul.f32 0.2, %v710_v56  ;;  %v1774_v60 = vpop.f32.mrb[22].mxu0  ;;  %v1806_v61 = vpop.f32.mrb[22].mxu1  ;;  %v907_v62 = vsel %vm779_vm8, %v1773_v50, %v843_v54 }
 0x125   : > { %vm777_vm10 = vcmp.ge.f32.partialorder %v582_v55, 0.0  ;;  %vm780_vm11 = vcmp.ge.f32.partialorder %v1774_v60, 0.0  ;;  %v844_v63 = vmul.f32 0.2, %v1774_v60  ;;  %v585_v0 = vpop.f32.mrb[23].mxu0  ;;  %v713_v1 = vpop.f32.mrb[23].mxu1  ;;  %v939_v6 = vsel %vm811_vm9, %v1805_v51, %v875_v57 }
 0x126   : > { %vm809_vm12 = vcmp.ge.f32.partialorder %v710_v56, 0.0  ;;  %vm812_vm13 = vcmp.ge.f32.partialorder %v1806_v61, 0.0  ;;  %v876_v2 = vmul.f32 0.2, %v1806_v61  ;;  %vm778_vm14 = vcmp.ge.f32.partialorder %v585_v0, 0.0 }
 0x127   : > { %v908_v3 = vsel %vm780_vm11, %v1774_v60, %v844_v63  ;;  %v842_v4 = vmul.f32 0.2, %v585_v0  ;;  %vm810_vm15 = vcmp.ge.f32.partialorder %v713_v1, 0.0  ;;  %v874_v5 = vmul.f32 0.2, %v713_v1 }
 0x128   : > { %v905_v7 = vsel %vm777_vm10, %v582_v55, %v841_v58  ;;  %v1562_v8 = vpack.c.bf16 %v908_v3, %v907_v62  ;;  %v940_v9 = vsel %vm812_vm13, %v1806_v61, %v876_v2  ;;  %v937_v10 = vsel %vm809_vm12, %v710_v56, %v873_v59 }
 0x129   : > { %v1642_v11 = vpack.c.bf16 %v940_v9, %v939_v6  ;;  %v906_v12 = vsel %vm778_vm14, %v585_v0, %v842_v4  ;;  %v938_v13 = vsel %vm810_vm15, %v713_v1, %v874_v5  ;;  %v1777_v14 = vpop.f32.mrb[24].mxu0  ;;  %v1809_v15 = vpop.f32.mrb[24].mxu1 }
 0x12a   : > { %1674 = vst [vmem:[%s1981_s6 + $0x58] sm:$0xff] %v1562_v8   ;;  %v1557_v16 = vpack.c.bf16 %v906_v12, %v905_v7  ;;  %v1637_v17 = vpack.c.bf16 %v938_v13, %v937_v10  ;;  %vm783_vm0 = vcmp.ge.f32.partialorder %v1777_v14, 0.0  ;;  %v847_v18 = vmul.f32 0.2, %v1777_v14  ;;  %v598_v19 = vpop.f32.mrb[25].mxu0  ;;  %v726_v20 = vpop.f32.mrb[25].mxu1 }
 0x12b   : > { %1690 = vst [vmem:[%s1981_s6 + $0xd8] sm:$0xff] %v1642_v11   ;;  %vm815_vm1 = vcmp.ge.f32.partialorder %v1809_v15, 0.0  ;;  %v879_v21 = vmul.f32 0.2, %v1809_v15  ;;  %v845_v22 = vmul.f32 0.2, %v598_v19 }
 0x12c   : > { %1673 = vst [vmem:[%s1981_s6 + $0x50] sm:$0xff] %v1557_v16   ;;  %1689 = vst [vmem:[%s1981_s6 + $0xd0] sm:$0xff] %v1637_v17   ;;  %v877_v23 = vmul.f32 0.2, %v726_v20  ;;  %v1778_v24 = vpop.f32.mrb[26].mxu0  ;;  %v1810_v25 = vpop.f32.mrb[26].mxu1  ;;  %v911_v26 = vsel %vm783_vm0, %v1777_v14, %v847_v18 }
 0x12d   : > { %vm781_vm2 = vcmp.ge.f32.partialorder %v598_v19, 0.0  ;;  %vm784_vm3 = vcmp.ge.f32.partialorder %v1778_v24, 0.0  ;;  %v848_v27 = vmul.f32 0.2, %v1778_v24  ;;  %v601_v28 = vpop.f32.mrb[27].mxu0  ;;  %v729_v29 = vpop.f32.mrb[27].mxu1  ;;  %v943_v34 = vsel %vm815_vm1, %v1809_v15, %v879_v21 }
 0x12e   : > { %vm813_vm4 = vcmp.ge.f32.partialorder %v726_v20, 0.0  ;;  %vm816_vm5 = vcmp.ge.f32.partialorder %v1810_v25, 0.0  ;;  %v880_v30 = vmul.f32 0.2, %v1810_v25  ;;  %vm782_vm6 = vcmp.ge.f32.partialorder %v601_v28, 0.0 }
 0x12f   : > { %v912_v31 = vsel %vm784_vm3, %v1778_v24, %v848_v27  ;;  %v846_v32 = vmul.f32 0.2, %v601_v28  ;;  %vm814_vm7 = vcmp.ge.f32.partialorder %v729_v29, 0.0  ;;  %v878_v33 = vmul.f32 0.2, %v729_v29 }
 0x130   : > { %v909_v35 = vsel %vm781_vm2, %v598_v19, %v845_v22  ;;  %v1572_v36 = vpack.c.bf16 %v912_v31, %v911_v26  ;;  %v944_v37 = vsel %vm816_vm5, %v1810_v25, %v880_v30  ;;  %v941_v38 = vsel %vm813_vm4, %v726_v20, %v877_v23 }
 0x131   : > { %v1652_v39 = vpack.c.bf16 %v944_v37, %v943_v34  ;;  %v910_v40 = vsel %vm782_vm6, %v601_v28, %v846_v32  ;;  %v942_v41 = vsel %vm814_vm7, %v729_v29, %v878_v33  ;;  %v1781_v42 = vpop.f32.mrb[28].mxu0  ;;  %v1813_v43 = vpop.f32.mrb[28].mxu1 }
 0x132   : > { %1676 = vst [vmem:[%s1981_s6 + $0x68] sm:$0xff] %v1572_v36   ;;  %v1567_v44 = vpack.c.bf16 %v910_v40, %v909_v35  ;;  %v1647_v45 = vpack.c.bf16 %v942_v41, %v941_v38  ;;  %vm787_vm8 = vcmp.ge.f32.partialorder %v1781_v42, 0.0  ;;  %v851_v46 = vmul.f32 0.2, %v1781_v42  ;;  %v614_v47 = vpop.f32.mrb[29].mxu0  ;;  %v742_v48 = vpop.f32.mrb[29].mxu1 }
 0x133   : > { %1692 = vst [vmem:[%s1981_s6 + $0xe8] sm:$0xff] %v1652_v39   ;;  %vm819_vm9 = vcmp.ge.f32.partialorder %v1813_v43, 0.0  ;;  %v883_v49 = vmul.f32 0.2, %v1813_v43  ;;  %v849_v50 = vmul.f32 0.2, %v614_v47 }
 0x134   : > { %1675 = vst [vmem:[%s1981_s6 + $0x60] sm:$0xff] %v1567_v44   ;;  %1691 = vst [vmem:[%s1981_s6 + $0xe0] sm:$0xff] %v1647_v45   ;;  %v881_v51 = vmul.f32 0.2, %v742_v48  ;;  %v1782_v52 = vpop.f32.mrb[30].mxu0  ;;  %v1814_v53 = vpop.f32.mrb[30].mxu1  ;;  %v915_v54 = vsel %vm787_vm8, %v1781_v42, %v851_v46 }
 0x135   : > { %vm785_vm10 = vcmp.ge.f32.partialorder %v614_v47, 0.0  ;;  %vm788_vm11 = vcmp.ge.f32.partialorder %v1782_v52, 0.0  ;;  %v852_v55 = vmul.f32 0.2, %v1782_v52  ;;  %v617_v56 = vpop.f32.mrb[31].mxu0  ;;  %v745_v57 = vpop.f32.mrb[31].mxu1  ;;  %v947_v62 = vsel %vm819_vm9, %v1813_v43, %v883_v49 }
 0x136   : > { %vm817_vm12 = vcmp.ge.f32.partialorder %v742_v48, 0.0  ;;  %vm820_vm13 = vcmp.ge.f32.partialorder %v1814_v53, 0.0  ;;  %v884_v58 = vmul.f32 0.2, %v1814_v53  ;;  %vm786_vm14 = vcmp.ge.f32.partialorder %v617_v56, 0.0 }
 0x137   : > { %v916_v59 = vsel %vm788_vm11, %v1782_v52, %v852_v55  ;;  %v850_v60 = vmul.f32 0.2, %v617_v56  ;;  %vm818_vm15 = vcmp.ge.f32.partialorder %v745_v57, 0.0  ;;  %v882_v61 = vmul.f32 0.2, %v745_v57 }
 0x138   : > { %v913_v63 = vsel %vm785_vm10, %v614_v47, %v849_v50  ;;  %v1582_v0 = vpack.c.bf16 %v916_v59, %v915_v54  ;;  %v948_v1 = vsel %vm820_vm13, %v1814_v53, %v884_v58  ;;  %v945_v2 = vsel %vm817_vm12, %v742_v48, %v881_v51 }
 0x139   : > { %v1662_v3 = vpack.c.bf16 %v948_v1, %v947_v62  ;;  %v914_v4 = vsel %vm786_vm14, %v617_v56, %v850_v60  ;;  %v946_v5 = vsel %vm818_vm15, %v745_v57, %v882_v61 }
 0x13a   : > { %1678 = vst [vmem:[%s1981_s6 + $0x78] sm:$0xff] %v1582_v0   ;;  %v1577_v6 = vpack.c.bf16 %v914_v4, %v913_v63  ;;  %v1657_v7 = vpack.c.bf16 %v946_v5, %v945_v2 }
 0x13b   : > { %1694 = vst [vmem:[%s1981_s6 + $0xf8] sm:$0xff] %v1662_v3  }
 0x13c   : > { %1677 = vst [vmem:[%s1981_s6 + $0x70] sm:$0xff] %v1577_v6   ;;  %1693 = vst [vmem:[%s1981_s6 + $0xf0] sm:$0xff] %v1657_v7  }
 0x13d PF: > { %s12_s9 = sadd.s32 1, %s1885_s9  }
 0x13e   : > { %p9_p4 = scmp.ge.s32.totalorder %s12_s9, 6  }
 0x140   :  { %11 = sbr.rel (!%p9_p4) target bundleno = 1 (0x1), region = 58 }

// kernel: discriminator_forward.8
= control target key start
LH: loop header
LB: loop body
LE: loop exit
PB: predicated region body
PF: predicated region fallthrough
CT: control target
= control target key end

     0   :  { %v1131_v40 = vmov 0.0   ;;  %s1679_s1 = inlined_call_operand.vmem [shape: bf16[128,128], index: 1, kind: input, shape index: {}]   ;;  %s1680_s0 = inlined_call_operand.vmem [shape: bf16[512,128], index: 0, kind: input, shape index: {}]   ;;  %s1681_s3 = inlined_call_operand.vmem [shape: f32[1,128], index: 3, kind: output, shape index: {1}]   ;;  %s1682_s4 = inlined_call_operand.vmem [shape: f32[1,128], index: 4, kind: output, shape index: {2}]   ;;  %s1683_s2 = inlined_call_operand.vmem [shape: f32[512,128], index: 2, kind: output, shape index: {0}]  }
   0x1   :  { %v1091_v0 = vld [vmem:[%s1679_s1] sm:$0xff]   ;;  %v1092_v1 = vld [vmem:[%s1679_s1 + $0x8] sm:$0xff]   ;;  %v1093_v2 = vld [vmem:[%s1679_s1 + $0x10] sm:$0xff]   ;;  %19 = vst [vmem:[%s1681_s3] sm:$0x1] %v1131_v40 }
   0x2   :  { %994 = vmatprep.subr.bf16.mxu0 %v1091_v0  ;;  %1074 = vmatprep.subr.bf16.mxu1 %v1091_v0  ;;  %v1094_v3 = vld [vmem:[%s1679_s1 + $0x18] sm:$0xff]   ;;  %v1099_v4 = vld [vmem:[%s1680_s0] sm:$0xff]   ;;  %v1096_v6 = vld [vmem:[%s1679_s1 + $0x28] sm:$0xff]   ;;  %20 = vst [vmem:[%s1682_s4] sm:$0x1] %v1131_v40 }
   0x3   :  { %995 = vmatpush3.bf16.msra.mxu0 %v1091_v0  ;;  %1082 = vmatpush3.bf16.msra.mxu1 %v1091_v0  ;;  %v1095_v5 = vld [vmem:[%s1679_s1 + $0x20] sm:$0xff]   ;;  %v1097_v7 = vld [vmem:[%s1679_s1 + $0x30] sm:$0xff]   ;;  %v1098_v8 = vld [vmem:[%s1679_s1 + $0x38] sm:$0xff]  }
   0x4   :  { %996 = vmatprep.subr.bf16.mxu0 %v1092_v1  ;;  %1075 = vmatprep.subr.bf16.mxu1 %v1092_v1  ;;  %v1115_v9 = vld [vmem:[%s1680_s0 + $0x80] sm:$0xff]   ;;  %v1100_v10 = vld [vmem:[%s1680_s0 + $0x8] sm:$0xff]   ;;  %v1101_v11 = vld [vmem:[%s1680_s0 + $0x10] sm:$0xff]  }
   0x5   :  { %1010 = vmatprep.mubr.bf16.mxu0 %v1099_v4  ;;  %1042 = vmatprep.mubr.bf16.mxu1 %v1115_v9  ;;  %v1116_v12 = vld [vmem:[%s1680_s0 + $0x88] sm:$0xff]   ;;  %v1117_v13 = vld [vmem:[%s1680_s0 + $0x90] sm:$0xff]   ;;  %v1102_v14 = vld [vmem:[%s1680_s0 + $0x18] sm:$0xff]  }
   0x6   :  { %v1103_v15 = vld [vmem:[%s1680_s0 + $0x20] sm:$0xff]   ;;  %v1118_v16 = vld [vmem:[%s1680_s0 + $0x98] sm:$0xff]   ;;  %v1104_v18 = vld [vmem:[%s1680_s0 + $0x28] sm:$0xff]  }
   0x7   :  { %997 = vmatpush3.bf16.msra.mxu0 %v1092_v1  ;;  %1083 = vmatpush3.bf16.msra.mxu1 %v1092_v1  ;;  %v1119_v17 = vld [vmem:[%s1680_s0 + $0xa0] sm:$0xff]   ;;  %v1120_v19 = vld [vmem:[%s1680_s0 + $0xa8] sm:$0xff]   ;;  %v1105_v20 = vld [vmem:[%s1680_s0 + $0x30] sm:$0xff]  }
   0x8   :  { %998 = vmatprep.subr.bf16.mxu0 %v1093_v2  ;;  %1076 = vmatprep.subr.bf16.mxu1 %v1093_v2  ;;  %v1121_v21 = vld [vmem:[%s1680_s0 + $0xb0] sm:$0xff]   ;;  %v1106_v22 = vld [vmem:[%s1680_s0 + $0x38] sm:$0xff]   ;;  %v1107_v24 = vld [vmem:[%s1680_s0 + $0x40] sm:$0xff]  }
   0x9   :  { %v1122_v23 = vld [vmem:[%s1680_s0 + $0xb8] sm:$0xff]   ;;  %v1123_v25 = vld [vmem:[%s1680_s0 + $0xc0] sm:$0xff]   ;;  %v1108_v26 = vld [vmem:[%s1680_s0 + $0x48] sm:$0xff]  }
   0xa   :  { %v1124_v27 = vld [vmem:[%s1680_s0 + $0xc8] sm:$0xff]   ;;  %v1109_v28 = vld [vmem:[%s1680_s0 + $0x50] sm:$0xff]   ;;  %v1110_v30 = vld [vmem:[%s1680_s0 + $0x58] sm:$0xff]  }
   0xb   :  { %999 = vmatpush3.bf16.msra.mxu0 %v1093_v2  ;;  %1084 = vmatpush3.bf16.msra.mxu1 %v1093_v2  ;;  %v1125_v29 = vld [vmem:[%s1680_s0 + $0xd0] sm:$0xff]   ;;  %v1126_v31 = vld [vmem:[%s1680_s0 + $0xd8] sm:$0xff]   ;;  %v1111_v32 = vld [vmem:[%s1680_s0 + $0x60] sm:$0xff]  }
   0xc   :  { %1000 = vmatprep.subr.bf16.mxu0 %v1094_v3  ;;  %1077 = vmatprep.subr.bf16.mxu1 %v1094_v3  ;;  %v1127_v33 = vld [vmem:[%s1680_s0 + $0xe0] sm:$0xff]   ;;  %v1112_v34 = vld [vmem:[%s1680_s0 + $0x68] sm:$0xff]   ;;  %v1113_v36 = vld [vmem:[%s1680_s0 + $0x70] sm:$0xff]  }
   0xd   :  { %v1128_v35 = vld [vmem:[%s1680_s0 + $0xe8] sm:$0xff]   ;;  %v1129_v37 = vld [vmem:[%s1680_s0 + $0xf0] sm:$0xff]   ;;  %v1114_v38 = vld [vmem:[%s1680_s0 + $0x78] sm:$0xff]  }
   0xe   :  { %v1130_v39 = vld [vmem:[%s1680_s0 + $0xf8] sm:$0xff]  }
   0xf   :  { %1001 = vmatpush3.bf16.msra.mxu0 %v1094_v3  ;;  %1085 = vmatpush3.bf16.msra.mxu1 %v1094_v3 }
  0x10   :  { %1002 = vmatprep.subr.bf16.mxu0 %v1095_v5  ;;  %1078 = vmatprep.subr.bf16.mxu1 %v1095_v5 }
  0x13   :  { %1003 = vmatpush3.bf16.msra.mxu0 %v1095_v5  ;;  %1086 = vmatpush3.bf16.msra.mxu1 %v1095_v5 }
  0x14   :  { %1004 = vmatprep.subr.bf16.mxu0 %v1096_v6  ;;  %1079 = vmatprep.subr.bf16.mxu1 %v1096_v6 }
  0x17   :  { %1005 = vmatpush3.bf16.msra.mxu0 %v1096_v6  ;;  %1087 = vmatpush3.bf16.msra.mxu1 %v1096_v6 }
  0x18   :  { %1006 = vmatprep.subr.bf16.mxu0 %v1097_v7  ;;  %1080 = vmatprep.subr.bf16.mxu1 %v1097_v7 }
  0x1b   :  { %1007 = vmatpush3.bf16.msra.mxu0 %v1097_v7  ;;  %1088 = vmatpush3.bf16.msra.mxu1 %v1097_v7 }
  0x1c   :  { %1008 = vmatprep.subr.bf16.mxu0 %v1098_v8  ;;  %1081 = vmatprep.subr.bf16.mxu1 %v1098_v8 }
  0x1f   :  { %1009 = vmatpush3.bf16.msra.mxu0 %v1098_v8  ;;  %1089 = vmatpush3.bf16.msra.mxu1 %v1098_v8 }
  0x22   :  { %1011 = vmatmul.mubr.bf16.vlgmr.msra.gmra.mrb[0].mxu0 %v1100_v10  ;;  %1043 = vmatmul.mubr.bf16.vlgmr.msra.gmra.mrb[0].mxu1 %v1116_v12 }
  0x23   :  { %1014 = vmatprep.mubr.bf16.mxu0 %v1101_v11  ;;  %1046 = vmatprep.mubr.bf16.mxu1 %v1117_v13 }
  0x2a   :  { %1015 = vmatmul.mubr.bf16.gmra.mrb[4].mxu0 %v1102_v14  ;;  %1047 = vmatmul.mubr.bf16.gmra.mrb[4].mxu1 %v1118_v16 }
  0x2b   :  { %1018 = vmatprep.mubr.bf16.mxu0 %v1103_v15  ;;  %1050 = vmatprep.mubr.bf16.mxu1 %v1119_v17 }
  0x32   :  { %1019 = vmatmul.mubr.bf16.gmra.mrb[8].mxu0 %v1104_v18  ;;  %1051 = vmatmul.mubr.bf16.gmra.mrb[8].mxu1 %v1120_v19 }
  0x33   :  { %1022 = vmatprep.mubr.bf16.mxu0 %v1105_v20  ;;  %1054 = vmatprep.mubr.bf16.mxu1 %v1121_v21 }
  0x3a   :  { %1023 = vmatmul.mubr.bf16.gmra.mrb[12].mxu0 %v1106_v22  ;;  %1055 = vmatmul.mubr.bf16.gmra.mrb[12].mxu1 %v1122_v23 }
  0x3b   :  { %1026 = vmatprep.mubr.bf16.mxu0 %v1107_v24  ;;  %1058 = vmatprep.mubr.bf16.mxu1 %v1123_v25 }
  0x42   :  { %1027 = vmatmul.mubr.bf16.gmra.mrb[16].mxu0 %v1108_v26  ;;  %1059 = vmatmul.mubr.bf16.gmra.mrb[16].mxu1 %v1124_v27 }
  0x43   :  { %1030 = vmatprep.mubr.bf16.mxu0 %v1109_v28  ;;  %1062 = vmatprep.mubr.bf16.mxu1 %v1125_v29 }
  0x4a   :  { %1031 = vmatmul.mubr.bf16.gmra.mrb[20].mxu0 %v1110_v30  ;;  %1063 = vmatmul.mubr.bf16.gmra.mrb[20].mxu1 %v1126_v31 }
  0x4b   :  { %1034 = vmatprep.mubr.bf16.mxu0 %v1111_v32  ;;  %1066 = vmatprep.mubr.bf16.mxu1 %v1127_v33 }
  0x52   :  { %1035 = vmatmul.mubr.bf16.gmra.mrb[24].mxu0 %v1112_v34  ;;  %1067 = vmatmul.mubr.bf16.gmra.mrb[24].mxu1 %v1128_v35 }
  0x53   :  { %1038 = vmatprep.mubr.bf16.mxu0 %v1113_v36  ;;  %1070 = vmatprep.mubr.bf16.mxu1 %v1129_v37 }
  0x5a   :  { %1039 = vmatmul.mubr.bf16.gmra.mrb[28].mxu0 %v1114_v38  ;;  %1071 = vmatmul.mubr.bf16.gmra.mrb[28].mxu1 %v1130_v39 }
  0xf5   :  { %v1012_v41 = vpop.f32.mrb[0].mxu0  ;;  %v1283_v42 = vpop.f32.mrb[0].mxu1 }
  0xf6   :  { %632 = vst [vmem:[%s1683_s2 + $0x10] sm:$0xff] %v1012_v41  ;;  %v375_v43 = vpop.f32.mrb[1].mxu0  ;;  %664 = vst [vmem:[%s1683_s2 + $0x110] sm:$0xff] %v1283_v42  ;;  %v1292_v44 = vpop.f32.mrb[1].mxu1  ;;  %v769_v52 = vmul.f32 %v1012_v41, %v1012_v41 }
  0xf7   :  { %630 = vst [vmem:[%s1683_s2] sm:$0xff] %v375_v43  ;;  %v1013_v45 = vpop.f32.mrb[2].mxu0  ;;  %662 = vst [vmem:[%s1683_s2 + $0x100] sm:$0xff] %v1292_v44  ;;  %v1301_v46 = vpop.f32.mrb[2].mxu1  ;;  %v767_v49 = vmul.f32 %v375_v43, %v375_v43 }
  0xf8   :  { %633 = vst [vmem:[%s1683_s2 + $0x18] sm:$0xff] %v1013_v45  ;;  %v378_v47 = vpop.f32.mrb[3].mxu0  ;;  %665 = vst [vmem:[%s1683_s2 + $0x118] sm:$0xff] %v1301_v46  ;;  %v1310_v48 = vpop.f32.mrb[3].mxu1  ;;  %v770_v55 = vmul.f32 %v1013_v45, %v1013_v45 }
  0xf9   :  { %631 = vst [vmem:[%s1683_s2 + $0x8] sm:$0xff] %v378_v47  ;;  %v695_v50 = vadd.f32 %v378_v47, %v375_v43  ;;  %v768_v51 = vmul.f32 %v378_v47, %v378_v47  ;;  %663 = vst [vmem:[%s1683_s2 + $0x108] sm:$0xff] %v1310_v48 }
  0xfb   :  { %v696_v53 = vadd.f32 %v1012_v41, %v695_v50  ;;  %v831_v54 = vadd.f32 %v768_v51, %v767_v49 }
  0xfd   :  { %v832_v56 = vadd.f32 %v831_v54, %v769_v52  ;;  %v1016_v57 = vpop.f32.mrb[4].mxu0  ;;  %v697_v58 = vadd.f32 %v1013_v45, %v696_v53  ;;  %v1319_v59 = vpop.f32.mrb[4].mxu1 }
  0xfe   :  { %636 = vst [vmem:[%s1683_s2 + $0x30] sm:$0xff] %v1016_v57  ;;  %v391_v60 = vpop.f32.mrb[5].mxu0  ;;  %668 = vst [vmem:[%s1683_s2 + $0x130] sm:$0xff] %v1319_v59  ;;  %v1328_v61 = vpop.f32.mrb[5].mxu1  ;;  %v773_v8 = vmul.f32 %v1016_v57, %v1016_v57 }
  0xff   :  { %634 = vst [vmem:[%s1683_s2 + $0x20] sm:$0xff] %v391_v60  ;;  %v698_v62 = vadd.f32 %v697_v58, %v391_v60  ;;  %v771_v63 = vmul.f32 %v391_v60, %v391_v60  ;;  %v833_v0 = vadd.f32 %v832_v56, %v770_v55  ;;  %v1017_v1 = vpop.f32.mrb[6].mxu0  ;;  %666 = vst [vmem:[%s1683_s2 + $0x120] sm:$0xff] %v1328_v61  ;;  %v1337_v2 = vpop.f32.mrb[6].mxu1 }
 0x100   :  { %637 = vst [vmem:[%s1683_s2 + $0x38] sm:$0xff] %v1017_v1  ;;  %v394_v3 = vpop.f32.mrb[7].mxu0  ;;  %669 = vst [vmem:[%s1683_s2 + $0x138] sm:$0xff] %v1337_v2  ;;  %v1346_v4 = vpop.f32.mrb[7].mxu1  ;;  %v774_v11 = vmul.f32 %v1017_v1, %v1017_v1 }
 0x101   :  { %v834_v5 = vadd.f32 %v833_v0, %v771_v63  ;;  %635 = vst [vmem:[%s1683_s2 + $0x28] sm:$0xff] %v394_v3  ;;  %v699_v6 = vadd.f32 %v698_v62, %v394_v3  ;;  %v772_v7 = vmul.f32 %v394_v3, %v394_v3  ;;  %667 = vst [vmem:[%s1683_s2 + $0x128] sm:$0xff] %v1346_v4 }
 0x103   :  { %v700_v9 = vadd.f32 %v1016_v57, %v699_v6  ;;  %v835_v10 = vadd.f32 %v834_v5, %v772_v7 }
 0x105   :  { %v836_v12 = vadd.f32 %v835_v10, %v773_v8  ;;  %v1020_v13 = vpop.f32.mrb[8].mxu0  ;;  %v701_v14 = vadd.f32 %v1017_v1, %v700_v9  ;;  %v1355_v15 = vpop.f32.mrb[8].mxu1 }
 0x106   :  { %640 = vst [vmem:[%s1683_s2 + $0x50] sm:$0xff] %v1020_v13  ;;  %v407_v16 = vpop.f32.mrb[9].mxu0  ;;  %672 = vst [vmem:[%s1683_s2 + $0x150] sm:$0xff] %v1355_v15  ;;  %v1364_v17 = vpop.f32.mrb[9].mxu1  ;;  %v777_v28 = vmul.f32 %v1020_v13, %v1020_v13 }
 0x107   :  { %638 = vst [vmem:[%s1683_s2 + $0x40] sm:$0xff] %v407_v16  ;;  %v702_v18 = vadd.f32 %v701_v14, %v407_v16  ;;  %v775_v19 = vmul.f32 %v407_v16, %v407_v16  ;;  %v837_v20 = vadd.f32 %v836_v12, %v774_v11  ;;  %v1021_v21 = vpop.f32.mrb[10].mxu0  ;;  %670 = vst [vmem:[%s1683_s2 + $0x140] sm:$0xff] %v1364_v17  ;;  %v1373_v22 = vpop.f32.mrb[10].mxu1 }
 0x108   :  { %641 = vst [vmem:[%s1683_s2 + $0x58] sm:$0xff] %v1021_v21  ;;  %v410_v23 = vpop.f32.mrb[11].mxu0  ;;  %673 = vst [vmem:[%s1683_s2 + $0x158] sm:$0xff] %v1373_v22  ;;  %v1382_v24 = vpop.f32.mrb[11].mxu1  ;;  %v778_v31 = vmul.f32 %v1021_v21, %v1021_v21 }
 0x109   :  { %v838_v25 = vadd.f32 %v837_v20, %v775_v19  ;;  %639 = vst [vmem:[%s1683_s2 + $0x48] sm:$0xff] %v410_v23  ;;  %v703_v26 = vadd.f32 %v702_v18, %v410_v23  ;;  %v776_v27 = vmul.f32 %v410_v23, %v410_v23  ;;  %671 = vst [vmem:[%s1683_s2 + $0x148] sm:$0xff] %v1382_v24 }
 0x10b   :  { %v704_v29 = vadd.f32 %v1020_v13, %v703_v26  ;;  %v839_v30 = vadd.f32 %v838_v25, %v776_v27 }
 0x10d   :  { %v840_v32 = vadd.f32 %v839_v30, %v777_v28  ;;  %v1024_v33 = vpop.f32.mrb[12].mxu0  ;;  %v705_v34 = vadd.f32 %v1021_v21, %v704_v29  ;;  %v1391_v35 = vpop.f32.mrb[12].mxu1 }
 0x10e   :  { %644 = vst [vmem:[%s1683_s2 + $0x70] sm:$0xff] %v1024_v33  ;;  %v423_v36 = vpop.f32.mrb[13].mxu0  ;;  %676 = vst [vmem:[%s1683_s2 + $0x170] sm:$0xff] %v1391_v35  ;;  %v1400_v37 = vpop.f32.mrb[13].mxu1  ;;  %v781_v52 = vmul.f32 %v1024_v33, %v1024_v33 }
 0x10f   :  { %642 = vst [vmem:[%s1683_s2 + $0x60] sm:$0xff] %v423_v36  ;;  %v706_v38 = vadd.f32 %v705_v34, %v423_v36  ;;  %v779_v39 = vmul.f32 %v423_v36, %v423_v36  ;;  %v841_v40 = vadd.f32 %v840_v32, %v778_v31  ;;  %v1025_v41 = vpop.f32.mrb[14].mxu0  ;;  %674 = vst [vmem:[%s1683_s2 + $0x160] sm:$0xff] %v1400_v37  ;;  %v1409_v43 = vpop.f32.mrb[14].mxu1 }
 0x110   :  { %645 = vst [vmem:[%s1683_s2 + $0x78] sm:$0xff] %v1025_v41  ;;  %v426_v45 = vpop.f32.mrb[15].mxu0  ;;  %677 = vst [vmem:[%s1683_s2 + $0x178] sm:$0xff] %v1409_v43  ;;  %v1418_v47 = vpop.f32.mrb[15].mxu1  ;;  %v782_v55 = vmul.f32 %v1025_v41, %v1025_v41 }
 0x111   :  { %v842_v49 = vadd.f32 %v841_v40, %v779_v39  ;;  %643 = vst [vmem:[%s1683_s2 + $0x68] sm:$0xff] %v426_v45  ;;  %v707_v50 = vadd.f32 %v706_v38, %v426_v45  ;;  %v780_v51 = vmul.f32 %v426_v45, %v426_v45  ;;  %675 = vst [vmem:[%s1683_s2 + $0x168] sm:$0xff] %v1418_v47 }
 0x113   :  { %v708_v53 = vadd.f32 %v1024_v33, %v707_v50  ;;  %v843_v54 = vadd.f32 %v842_v49, %v780_v51 }
 0x115   :  { %v844_v56 = vadd.f32 %v843_v54, %v781_v52  ;;  %v1028_v57 = vpop.f32.mrb[16].mxu0  ;;  %v709_v58 = vadd.f32 %v1025_v41, %v708_v53  ;;  %v1427_v60 = vpop.f32.mrb[16].mxu1 }
 0x116   :  { %648 = vst [vmem:[%s1683_s2 + $0x90] sm:$0xff] %v1028_v57  ;;  %v439_v62 = vpop.f32.mrb[17].mxu0  ;;  %680 = vst [vmem:[%s1683_s2 + $0x190] sm:$0xff] %v1427_v60  ;;  %v1436_v63 = vpop.f32.mrb[17].mxu1  ;;  %v785_v12 = vmul.f32 %v1028_v57, %v1028_v57 }
 0x117   :  { %646 = vst [vmem:[%s1683_s2 + $0x80] sm:$0xff] %v439_v62  ;;  %v710_v0 = vadd.f32 %v709_v58, %v439_v62  ;;  %v783_v1 = vmul.f32 %v439_v62, %v439_v62  ;;  %v845_v3 = vadd.f32 %v844_v56, %v782_v55  ;;  %v1029_v5 = vpop.f32.mrb[18].mxu0  ;;  %678 = vst [vmem:[%s1683_s2 + $0x180] sm:$0xff] %v1436_v63  ;;  %v1445_v6 = vpop.f32.mrb[18].mxu1 }
 0x118   :  { %649 = vst [vmem:[%s1683_s2 + $0x98] sm:$0xff] %v1029_v5  ;;  %v442_v7 = vpop.f32.mrb[19].mxu0  ;;  %681 = vst [vmem:[%s1683_s2 + $0x198] sm:$0xff] %v1445_v6  ;;  %v1454_v8 = vpop.f32.mrb[19].mxu1  ;;  %v786_v16 = vmul.f32 %v1029_v5, %v1029_v5 }
 0x119   :  { %v846_v9 = vadd.f32 %v845_v3, %v783_v1  ;;  %647 = vst [vmem:[%s1683_s2 + $0x88] sm:$0xff] %v442_v7  ;;  %v711_v10 = vadd.f32 %v710_v0, %v442_v7  ;;  %v784_v11 = vmul.f32 %v442_v7, %v442_v7  ;;  %679 = vst [vmem:[%s1683_s2 + $0x188] sm:$0xff] %v1454_v8 }
 0x11b   :  { %v712_v13 = vadd.f32 %v1028_v57, %v711_v10  ;;  %v847_v14 = vadd.f32 %v846_v9, %v784_v11 }
 0x11d   :  { %v848_v18 = vadd.f32 %v847_v14, %v785_v12  ;;  %v1032_v19 = vpop.f32.mrb[20].mxu0  ;;  %v713_v20 = vadd.f32 %v1029_v5, %v712_v13  ;;  %v1463_v21 = vpop.f32.mrb[20].mxu1 }
 0x11e   :  { %652 = vst [vmem:[%s1683_s2 + $0xb0] sm:$0xff] %v1032_v19  ;;  %v455_v23 = vpop.f32.mrb[21].mxu0  ;;  %684 = vst [vmem:[%s1683_s2 + $0x1b0] sm:$0xff] %v1463_v21  ;;  %v1472_v25 = vpop.f32.mrb[21].mxu1  ;;  %v789_v38 = vmul.f32 %v1032_v19, %v1032_v19 }
 0x11f   :  { %650 = vst [vmem:[%s1683_s2 + $0xa0] sm:$0xff] %v455_v23  ;;  %v714_v26 = vadd.f32 %v713_v20, %v455_v23  ;;  %v787_v27 = vmul.f32 %v455_v23, %v455_v23  ;;  %v849_v28 = vadd.f32 %v848_v18, %v786_v16  ;;  %v1033_v29 = vpop.f32.mrb[22].mxu0  ;;  %682 = vst [vmem:[%s1683_s2 + $0x1a0] sm:$0xff] %v1472_v25  ;;  %v1481_v30 = vpop.f32.mrb[22].mxu1 }
 0x120   :  { %653 = vst [vmem:[%s1683_s2 + $0xb8] sm:$0xff] %v1033_v29  ;;  %v458_v31 = vpop.f32.mrb[23].mxu0  ;;  %685 = vst [vmem:[%s1683_s2 + $0x1b8] sm:$0xff] %v1481_v30  ;;  %v1490_v32 = vpop.f32.mrb[23].mxu1  ;;  %v790_v41 = vmul.f32 %v1033_v29, %v1033_v29 }
 0x121   :  { %v850_v33 = vadd.f32 %v849_v28, %v787_v27  ;;  %651 = vst [vmem:[%s1683_s2 + $0xa8] sm:$0xff] %v458_v31  ;;  %v715_v34 = vadd.f32 %v714_v26, %v458_v31  ;;  %v788_v36 = vmul.f32 %v458_v31, %v458_v31  ;;  %683 = vst [vmem:[%s1683_s2 + $0x1a8] sm:$0xff] %v1490_v32 }
 0x123   :  { %v716_v39 = vadd.f32 %v1032_v19, %v715_v34  ;;  %v851_v40 = vadd.f32 %v850_v33, %v788_v36 }
 0x125   :  { %v852_v45 = vadd.f32 %v851_v40, %v789_v38  ;;  %v1036_v49 = vpop.f32.mrb[24].mxu0  ;;  %v717_v50 = vadd.f32 %v1033_v29, %v716_v39  ;;  %v1499_v51 = vpop.f32.mrb[24].mxu1 }
 0x126   :  { %656 = vst [vmem:[%s1683_s2 + $0xd0] sm:$0xff] %v1036_v49  ;;  %v471_v52 = vpop.f32.mrb[25].mxu0  ;;  %688 = vst [vmem:[%s1683_s2 + $0x1d0] sm:$0xff] %v1499_v51  ;;  %v1508_v53 = vpop.f32.mrb[25].mxu1  ;;  %v793_v7 = vmul.f32 %v1036_v49, %v1036_v49 }
 0x127   :  { %654 = vst [vmem:[%s1683_s2 + $0xc0] sm:$0xff] %v471_v52  ;;  %v718_v54 = vadd.f32 %v717_v50, %v471_v52  ;;  %v791_v55 = vmul.f32 %v471_v52, %v471_v52  ;;  %v853_v56 = vadd.f32 %v852_v45, %v790_v41  ;;  %v1037_v57 = vpop.f32.mrb[26].mxu0  ;;  %686 = vst [vmem:[%s1683_s2 + $0x1c0] sm:$0xff] %v1508_v53  ;;  %v1517_v58 = vpop.f32.mrb[26].mxu1 }
 0x128   :  { %657 = vst [vmem:[%s1683_s2 + $0xd8] sm:$0xff] %v1037_v57  ;;  %v474_v62 = vpop.f32.mrb[27].mxu0  ;;  %689 = vst [vmem:[%s1683_s2 + $0x1d8] sm:$0xff] %v1517_v58  ;;  %v1526_v0 = vpop.f32.mrb[27].mxu1  ;;  %v794_v11 = vmul.f32 %v1037_v57, %v1037_v57  ;;  %v799_v50 = vmul.f32 %v1292_v44, %v1292_v44 }
 0x129   :  { %v854_v1 = vadd.f32 %v853_v56, %v791_v55  ;;  %655 = vst [vmem:[%s1683_s2 + $0xc8] sm:$0xff] %v474_v62  ;;  %v719_v3 = vadd.f32 %v718_v54, %v474_v62  ;;  %v792_v5 = vmul.f32 %v474_v62, %v474_v62  ;;  %687 = vst [vmem:[%s1683_s2 + $0x1c8] sm:$0xff] %v1526_v0 }
 0x12a   :  { %v801_v62 = vmul.f32 %v1283_v42, %v1283_v42 }
 0x12b   :  { %v720_v9 = vadd.f32 %v1036_v49, %v719_v3  ;;  %v855_v10 = vadd.f32 %v854_v1, %v792_v5  ;;  %v802_v5 = vmul.f32 %v1301_v46, %v1301_v46 }
 0x12d   :  { %v856_v12 = vadd.f32 %v855_v10, %v793_v7  ;;  %v1040_v13 = vpop.f32.mrb[28].mxu0  ;;  %v721_v14 = vadd.f32 %v1037_v57, %v720_v9  ;;  %v1535_v16 = vpop.f32.mrb[28].mxu1  ;;  %v800_v57 = vmul.f32 %v1310_v48, %v1310_v48 }
 0x12e   :  { %660 = vst [vmem:[%s1683_s2 + $0xf0] sm:$0xff] %v1040_v13  ;;  %v487_v18 = vpop.f32.mrb[29].mxu0  ;;  %692 = vst [vmem:[%s1683_s2 + $0x1f0] sm:$0xff] %v1535_v16  ;;  %v1544_v19 = vpop.f32.mrb[29].mxu1  ;;  %v797_v38 = vmul.f32 %v1040_v13, %v1040_v13 }
 0x12f   :  { %658 = vst [vmem:[%s1683_s2 + $0xe0] sm:$0xff] %v487_v18  ;;  %v722_v20 = vadd.f32 %v721_v14, %v487_v18  ;;  %v795_v23 = vmul.f32 %v487_v18, %v487_v18  ;;  %v857_v26 = vadd.f32 %v856_v12, %v794_v11  ;;  %v1041_v27 = vpop.f32.mrb[30].mxu0  ;;  %690 = vst [vmem:[%s1683_s2 + $0x1e0] sm:$0xff] %v1544_v19  ;;  %v1553_v28 = vpop.f32.mrb[30].mxu1 }
 0x130   :  { %661 = vst [vmem:[%s1683_s2 + $0xf8] sm:$0xff] %v1041_v27  ;;  %v490_v29 = vpop.f32.mrb[31].mxu0  ;;  %693 = vst [vmem:[%s1683_s2 + $0x1f8] sm:$0xff] %v1553_v28  ;;  %v1562_v31 = vpop.f32.mrb[31].mxu1  ;;  %v798_v41 = vmul.f32 %v1041_v27, %v1041_v27 }
 0x131   :  { %v858_v33 = vadd.f32 %v857_v26, %v795_v23  ;;  %659 = vst [vmem:[%s1683_s2 + $0xe8] sm:$0xff] %v490_v29  ;;  %v723_v34 = vadd.f32 %v722_v20, %v490_v29  ;;  %v796_v36 = vmul.f32 %v490_v29, %v490_v29  ;;  %691 = vst [vmem:[%s1683_s2 + $0x1e8] sm:$0xff] %v1562_v31 }
 0x133   :  { %v724_v39 = vadd.f32 %v1040_v13, %v723_v34  ;;  %v859_v40 = vadd.f32 %v858_v33, %v796_v36  ;;  %v804_v13 = vmul.f32 %v1346_v4, %v1346_v4  ;;  %v808_v33 = vmul.f32 %v1382_v24, %v1382_v24 }
 0x135   :  { %v860_v45 = vadd.f32 %v859_v40, %v797_v38  ;;  %v725_v49 = vadd.f32 %v1041_v27, %v724_v39 }
 0x137   :  { %v726_v52 = vadd.f32 %v725_v49, %v1292_v44  ;;  %v861_v54 = vadd.f32 %v860_v45, %v798_v41  ;;  %v803_v44 = vmul.f32 %v1328_v61, %v1328_v61  ;;  %v812_v49 = vmul.f32 %v1418_v47, %v1418_v47 }
 0x139   :  { %v862_v55 = vadd.f32 %v861_v54, %v799_v50  ;;  %v727_v56 = vadd.f32 %v726_v52, %v1310_v48 }
 0x13b   :  { %v728_v1 = vadd.f32 %v1283_v42, %v727_v56  ;;  %v863_v3 = vadd.f32 %v862_v55, %v800_v57  ;;  %v805_v42 = vmul.f32 %v1319_v59, %v1319_v59 }
 0x13d   :  { %v864_v7 = vadd.f32 %v863_v3, %v801_v62  ;;  %v729_v9 = vadd.f32 %v1301_v46, %v728_v1  ;;  %v806_v46 = vmul.f32 %v1337_v2, %v1337_v2  ;;  %v816_v1 = vmul.f32 %v1454_v8, %v1454_v8 }
 0x13f   :  { %v730_v10 = vadd.f32 %v729_v9, %v1328_v61  ;;  %v865_v11 = vadd.f32 %v864_v7, %v802_v5  ;;  %v807_v61 = vmul.f32 %v1364_v17, %v1364_v17 }
 0x141   :  { %v866_v12 = vadd.f32 %v865_v11, %v803_v44  ;;  %v731_v48 = vadd.f32 %v730_v10, %v1346_v4 }
 0x143   :  { %v732_v14 = vadd.f32 %v1319_v59, %v731_v48  ;;  %v867_v18 = vadd.f32 %v866_v12, %v804_v13  ;;  %v809_v59 = vmul.f32 %v1355_v15, %v1355_v15  ;;  %v820_v12 = vmul.f32 %v1490_v32, %v1490_v32 }
 0x145   :  { %v868_v20 = vadd.f32 %v867_v18, %v805_v42  ;;  %v733_v23 = vadd.f32 %v1337_v2, %v732_v14  ;;  %v810_v2 = vmul.f32 %v1373_v22, %v1373_v22 }
 0x147   :  { %v734_v26 = vadd.f32 %v733_v23, %v1364_v17  ;;  %v869_v27 = vadd.f32 %v868_v20, %v806_v46  ;;  %v811_v17 = vmul.f32 %v1400_v37, %v1400_v37  ;;  %v824_v23 = vmul.f32 %v1526_v0, %v1526_v0 }
 0x149   :  { %v870_v29 = vadd.f32 %v869_v27, %v807_v61  ;;  %v735_v4 = vadd.f32 %v734_v26, %v1382_v24 }
 0x14b   :  { %v736_v34 = vadd.f32 %v1355_v15, %v735_v4  ;;  %v871_v36 = vadd.f32 %v870_v29, %v808_v33  ;;  %v813_v15 = vmul.f32 %v1391_v35, %v1391_v35 }
 0x14d   :  { %v872_v38 = vadd.f32 %v871_v36, %v809_v59  ;;  %v737_v39 = vadd.f32 %v1373_v22, %v736_v34  ;;  %v814_v22 = vmul.f32 %v1409_v43, %v1409_v43  ;;  %v828_v34 = vmul.f32 %v1562_v31, %v1562_v31 }
 0x14f   :  { %v738_v40 = vadd.f32 %v737_v39, %v1400_v37  ;;  %v873_v41 = vadd.f32 %v872_v38, %v810_v2  ;;  %v815_v37 = vmul.f32 %v1436_v63, %v1436_v63 }
 0x151   :  { %v874_v45 = vadd.f32 %v873_v41, %v811_v17  ;;  %v739_v24 = vadd.f32 %v738_v40, %v1418_v47 }
 0x153   :  { %v740_v50 = vadd.f32 %v1391_v35, %v739_v24  ;;  %v875_v52 = vadd.f32 %v874_v45, %v812_v49  ;;  %v817_v35 = vmul.f32 %v1427_v60, %v1427_v60 }
 0x155   :  { %v876_v54 = vadd.f32 %v875_v52, %v813_v15  ;;  %v741_v55 = vadd.f32 %v1409_v43, %v740_v50  ;;  %v818_v43 = vmul.f32 %v1445_v6, %v1445_v6 }
 0x157   :  { %v742_v56 = vadd.f32 %v741_v55, %v1436_v63  ;;  %v877_v57 = vadd.f32 %v876_v54, %v814_v22  ;;  %v819_v63 = vmul.f32 %v1472_v25, %v1472_v25 }
 0x159   :  { %v878_v62 = vadd.f32 %v877_v57, %v815_v37  ;;  %v743_v47 = vadd.f32 %v742_v56, %v1454_v8 }
 0x15b   :  { %v744_v3 = vadd.f32 %v1427_v60, %v743_v47  ;;  %v879_v5 = vadd.f32 %v878_v62, %v816_v1  ;;  %v821_v60 = vmul.f32 %v1463_v21, %v1463_v21 }
 0x15d   :  { %v880_v7 = vadd.f32 %v879_v5, %v817_v35  ;;  %v745_v9 = vadd.f32 %v1445_v6, %v744_v3  ;;  %v822_v6 = vmul.f32 %v1481_v30, %v1481_v30 }
 0x15f   :  { %v746_v44 = vadd.f32 %v745_v9, %v1472_v25  ;;  %v881_v10 = vadd.f32 %v880_v7, %v818_v43  ;;  %v823_v25 = vmul.f32 %v1508_v53, %v1508_v53 }
 0x161   :  { %v882_v11 = vadd.f32 %v881_v10, %v819_v63  ;;  %v747_v8 = vadd.f32 %v746_v44, %v1490_v32 }
 0x163   :  { %v748_v48 = vadd.f32 %v1463_v21, %v747_v8  ;;  %v883_v13 = vadd.f32 %v882_v11, %v820_v12  ;;  %v825_v21 = vmul.f32 %v1499_v51, %v1499_v51 }
 0x165   :  { %v884_v42 = vadd.f32 %v883_v13, %v821_v60  ;;  %v749_v14 = vadd.f32 %v1481_v30, %v748_v48  ;;  %v826_v30 = vmul.f32 %v1517_v58, %v1517_v58 }
 0x167   :  { %v750_v18 = vadd.f32 %v749_v14, %v1508_v53  ;;  %v885_v46 = vadd.f32 %v884_v42, %v822_v6  ;;  %v827_v53 = vmul.f32 %v1544_v19, %v1544_v19 }
 0x169   :  { %v886_v20 = vadd.f32 %v885_v46, %v823_v25  ;;  %v751_v32 = vadd.f32 %v750_v18, %v1526_v0 }
 0x16b   :  { %v752_v61 = vadd.f32 %v1499_v51, %v751_v32  ;;  %v887_v26 = vadd.f32 %v886_v20, %v824_v23  ;;  %v829_v51 = vmul.f32 %v1535_v16, %v1535_v16 }
 0x16d   :  { %v888_v27 = vadd.f32 %v887_v26, %v825_v21  ;;  %v753_v29 = vadd.f32 %v1517_v58, %v752_v61  ;;  %v830_v58 = vmul.f32 %v1553_v28, %v1553_v28 }
 0x16f   :  { %v754_v4 = vadd.f32 %v753_v29, %v1544_v19  ;;  %v889_v33 = vadd.f32 %v888_v27, %v826_v30 }
 0x171   :  { %v890_v59 = vadd.f32 %v889_v33, %v827_v53  ;;  %v755_v0 = vadd.f32 %v754_v4, %v1562_v31 }
 0x173   :  { %v756_v36 = vadd.f32 %v1535_v16, %v755_v0  ;;  %v891_v2 = vadd.f32 %v890_v59, %v828_v34  ;;  %v694_v16 = vld [vmem:[%s1681_s3] sm:$0x1] }
 0x175   :  { %v757_v38 = vadd.f32 %v1553_v28, %v756_v36  ;;  %v892_v39 = vadd.f32 %v891_v2, %v829_v51  ;;  %v766_v28 = vld [vmem:[%s1682_s4] sm:$0x1] }
 0x177   :  { %v758_v19 = vrot.slane %v757_v38, 4  ;;  %v893_v17 = vadd.f32 %v892_v39, %v830_v58 }
 0x179   :  { %v759_v40 = vadd.f32 %v758_v19, %v757_v38  ;;  %v894_v41 = vrot.slane %v893_v17, 4 }
 0x17b   :  { %v760_v45 = vrot.slane %v759_v40, 2  ;;  %v895_v24 = vadd.f32 %v894_v41, %v893_v17 }
 0x17d   :  { %v761_v49 = vadd.f32 %v760_v45, %v759_v40  ;;  %v896_v31 = vrot.slane %v895_v24, 2 }
 0x17f   :  { %v762_v15 = vrot.slane %v761_v49, 1  ;;  %v897_v50 = vadd.f32 %v896_v31, %v895_v24 }
 0x181   :  { %v763_v52 = vadd.f32 %v762_v15, %v761_v49  ;;  %v898_v22 = vrot.slane %v897_v50, 1 }
 0x183   :  { %v764_v54 = vadd.f32 %v763_v52, %v694_v16  ;;  %v899_v55 = vadd.f32 %v898_v22, %v897_v50 }
 0x185   :  { %765 = vst [vmem:[%s1681_s3] sm:$0x1] %v764_v54  ;;  %v900_v37 = vadd.f32 %v899_v55, %v766_v28 }
 0x187   :  { %901 = vst [vmem:[%s1682_s4] sm:$0x1] %v900_v37 }

// kernel: discriminator_forward.9
= control target key start
LH: loop header
LB: loop body
LE: loop exit
PB: predicated region body
PF: predicated region fallthrough
CT: control target
= control target key end

     0   :  { %s1503_s0 = inlined_call_operand.vmem [shape: f32[512,128], index: 0, kind: input, shape index: {}]   ;;  %s1504_s1 = inlined_call_operand.vmem [shape: f32[1,128], index: 1, kind: input, shape index: {}]   ;;  %s1505_s2 = inlined_call_operand.vmem [shape: f32[1,128], index: 2, kind: input, shape index: {}]   ;;  %s1506_s3 = inlined_call_operand.vmem [shape: bf16[512,128], index: 3, kind: output, shape index: {}]  }
   0x1   :  { %v14_v0 = vld [vmem:[%s1503_s0] sm:$0xff]  ;;  %v15_v1 = vld [vmem:[%s1503_s0 + $0x8] sm:$0xff]  ;;  %v16_v6 = vld [vmem:[%s1503_s0 + $0x10] sm:$0xff] }
   0x2   :  { %v1086_v2 = vld [vmem:[%s1504_s1] ss:$0 sm:$0xff]  ;;  %v17_v7 = vld [vmem:[%s1503_s0 + $0x18] sm:$0xff]  ;;  %v19_v11 = vld [vmem:[%s1503_s0 + $0x28] sm:$0xff] }
   0x3   :  { %v85_v3 = vmul.f32 %v1086_v2, %v14_v0  ;;  %v86_v4 = vmul.f32 %v1086_v2, %v15_v1  ;;  %v1093_v5 = vld [vmem:[%s1505_s2] ss:$0 sm:$0xff]  ;;  %v87_v8 = vmul.f32 %v1086_v2, %v16_v6  ;;  %v88_v9 = vmul.f32 %v1086_v2, %v17_v7  ;;  %v20_v12 = vld [vmem:[%s1503_s0 + $0x30] sm:$0xff]  ;;  %v21_v17 = vld [vmem:[%s1503_s0 + $0x38] sm:$0xff] }
   0x4   :  { %v18_v10 = vld [vmem:[%s1503_s0 + $0x20] sm:$0xff]  ;;  %v90_v16 = vmul.f32 %v1086_v2, %v19_v11  ;;  %v91_v20 = vmul.f32 %v1086_v2, %v20_v12  ;;  %v92_v21 = vmul.f32 %v1086_v2, %v21_v17  ;;  %v23_v35 = vld [vmem:[%s1503_s0 + $0x48] sm:$0xff]  ;;  %v24_v36 = vld [vmem:[%s1503_s0 + $0x50] sm:$0xff] }
   0x5   :  { %v156_v13 = vadd.f32 %v1093_v5, %v85_v3  ;;  %v157_v14 = vadd.f32 %v1093_v5, %v86_v4  ;;  %v89_v15 = vmul.f32 %v1086_v2, %v18_v10  ;;  %v158_v18 = vadd.f32 %v1093_v5, %v87_v8  ;;  %v22_v34 = vld [vmem:[%s1503_s0 + $0x40] sm:$0xff]  ;;  %v25_v42 = vld [vmem:[%s1503_s0 + $0x58] sm:$0xff]  ;;  %v27_v48 = vld [vmem:[%s1503_s0 + $0x68] sm:$0xff] }
   0x6   :  { %v159_v19 = vadd.f32 %v1093_v5, %v88_v9  ;;  %v161_v29 = vadd.f32 %v1093_v5, %v90_v16  ;;  %v162_v33 = vadd.f32 %v1093_v5, %v91_v20  ;;  %v163_v40 = vadd.f32 %v1093_v5, %v92_v21  ;;  %v26_v47 = vld [vmem:[%s1503_s0 + $0x60] sm:$0xff]  ;;  %v28_v60 = vld [vmem:[%s1503_s0 + $0x70] sm:$0xff]  ;;  %v29_v7 = vld [vmem:[%s1503_s0 + $0x78] sm:$0xff] }
   0x7   :  { %vm220_vm0 = vcmp.ge.f32.partialorder %v156_v13, 0.0  ;;  %vm221_vm1 = vcmp.ge.f32.partialorder %v157_v14, 0.0  ;;  %v284_v22 = vmul.f32 0.2, %v156_v13  ;;  %v285_v23 = vmul.f32 0.2, %v157_v14 }
   0x8   :  { %vm222_vm2 = vcmp.ge.f32.partialorder %v158_v18, 0.0  ;;  %vm223_vm3 = vcmp.ge.f32.partialorder %v159_v19, 0.0  ;;  %v286_v24 = vmul.f32 0.2, %v158_v18  ;;  %v287_v25 = vmul.f32 0.2, %v159_v19 }
   0x9   :  { %v348_v26 = vsel %vm220_vm0, %v156_v13, %v284_v22  ;;  %v349_v27 = vsel %vm221_vm1, %v157_v14, %v285_v23  ;;  %v160_v28 = vadd.f32 %v1093_v5, %v89_v15  ;;  %vm225_vm5 = vcmp.ge.f32.partialorder %v161_v29, 0.0  ;;  %v30_v12 = vld [vmem:[%s1503_s0 + $0x80] sm:$0xff]  ;;  %v31_v13 = vld [vmem:[%s1503_s0 + $0x88] sm:$0xff]  ;;  %v32_v20 = vld [vmem:[%s1503_s0 + $0x90] sm:$0xff] }
   0xa   :  { %v869_v30 = vpack.c.bf16 %v349_v27, %v348_v26  ;;  %v350_v31 = vsel %vm222_vm2, %v158_v18, %v286_v24  ;;  %v351_v32 = vsel %vm223_vm3, %v159_v19, %v287_v25  ;;  %v289_v39 = vmul.f32 0.2, %v161_v29  ;;  %v33_v25 = vld [vmem:[%s1503_s0 + $0x98] sm:$0xff] }
   0xb   :  { %v874_v37 = vpack.c.bf16 %v351_v32, %v350_v31  ;;  %vm224_vm4 = vcmp.ge.f32.partialorder %v160_v28, 0.0  ;;  %v288_v38 = vmul.f32 0.2, %v160_v28  ;;  %vm226_vm6 = vcmp.ge.f32.partialorder %v162_v33, 0.0 }
   0xc   :  { %870 = vst [vmem:[%s1506_s3] sm:$0xff] %v869_v30   ;;  %v290_v41 = vmul.f32 0.2, %v162_v33  ;;  %v93_v44 = vmul.f32 %v1086_v2, %v22_v34  ;;  %v94_v45 = vmul.f32 %v1086_v2, %v23_v35  ;;  %v95_v46 = vmul.f32 %v1086_v2, %v24_v36 }
   0xd   :  { %1026 = vst [vmem:[%s1506_s3 + $0x8] sm:$0xff] %v874_v37   ;;  %v352_v43 = vsel %vm224_vm4, %v160_v28, %v288_v38  ;;  %v353_v49 = vsel %vm225_vm5, %v161_v29, %v289_v39  ;;  %vm227_vm7 = vcmp.ge.f32.partialorder %v163_v40, 0.0  ;;  %v291_v50 = vmul.f32 0.2, %v163_v40  ;;  %v35_v37 = vld [vmem:[%s1503_s0 + $0xa8] sm:$0xff] }
   0xe   :  { %v354_v51 = vsel %vm226_vm6, %v162_v33, %v290_v41  ;;  %v879_v52 = vpack.c.bf16 %v353_v49, %v352_v43  ;;  %v164_v53 = vadd.f32 %v1093_v5, %v93_v44  ;;  %v165_v54 = vadd.f32 %v1093_v5, %v94_v45  ;;  %v34_v33 = vld [vmem:[%s1503_s0 + $0xa0] sm:$0xff]  ;;  %v36_v44 = vld [vmem:[%s1503_s0 + $0xb0] sm:$0xff]  ;;  %v37_v49 = vld [vmem:[%s1503_s0 + $0xb8] sm:$0xff] }
   0xf   :  { %v96_v55 = vmul.f32 %v1086_v2, %v25_v42  ;;  %v355_v56 = vsel %vm227_vm7, %v163_v40, %v291_v50  ;;  %v166_v57 = vadd.f32 %v1093_v5, %v95_v46  ;;  %v97_v58 = vmul.f32 %v1086_v2, %v26_v47  ;;  %v38_v50 = vld [vmem:[%s1503_s0 + $0xc0] sm:$0xff] }
  0x10   :  { %v98_v59 = vmul.f32 %v1086_v2, %v27_v48  ;;  %1027 = vst [vmem:[%s1506_s3 + $0x10] sm:$0xff] %v879_v52   ;;  %v884_v61 = vpack.c.bf16 %v355_v56, %v354_v51  ;;  %vm228_vm8 = vcmp.ge.f32.partialorder %v164_v53, 0.0  ;;  %vm229_vm9 = vcmp.ge.f32.partialorder %v165_v54, 0.0  ;;  %v39_v51 = vld [vmem:[%s1503_s0 + $0xc8] sm:$0xff] }
  0x11   :  { %v292_v62 = vmul.f32 0.2, %v164_v53  ;;  %v293_v63 = vmul.f32 0.2, %v165_v54  ;;  %v167_v0 = vadd.f32 %v1093_v5, %v96_v55  ;;  %vm230_vm10 = vcmp.ge.f32.partialorder %v166_v57, 0.0 }
  0x12   :  { %v294_v1 = vmul.f32 0.2, %v166_v57  ;;  %1028 = vst [vmem:[%s1506_s3 + $0x18] sm:$0xff] %v884_v61   ;;  %v168_v4 = vadd.f32 %v1093_v5, %v97_v58  ;;  %v169_v6 = vadd.f32 %v1093_v5, %v98_v59  ;;  %v99_v8 = vmul.f32 %v1086_v2, %v28_v60 }
  0x13   :  { %v356_v3 = vsel %vm228_vm8, %v164_v53, %v292_v62  ;;  %v357_v9 = vsel %vm229_vm9, %v165_v54, %v293_v63  ;;  %vm231_vm11 = vcmp.ge.f32.partialorder %v167_v0, 0.0  ;;  %v295_v10 = vmul.f32 0.2, %v167_v0  ;;  %v40_v62 = vld [vmem:[%s1503_s0 + $0xd0] sm:$0xff] }
  0x14   :  { %v358_v11 = vsel %vm230_vm10, %v166_v57, %v294_v1  ;;  %v889_v14 = vpack.c.bf16 %v357_v9, %v356_v3  ;;  %vm232_vm12 = vcmp.ge.f32.partialorder %v168_v4, 0.0  ;;  %vm233_vm13 = vcmp.ge.f32.partialorder %v169_v6, 0.0 }
  0x15   :  { %v296_v15 = vmul.f32 0.2, %v168_v4  ;;  %v359_v16 = vsel %vm231_vm11, %v167_v0, %v295_v10  ;;  %v297_v17 = vmul.f32 0.2, %v169_v6  ;;  %v100_v18 = vmul.f32 %v1086_v2, %v29_v7  ;;  %v41_v10 = vld [vmem:[%s1503_s0 + $0xd8] sm:$0xff] }
  0x16   :  { %v170_v19 = vadd.f32 %v1093_v5, %v99_v8  ;;  %1029 = vst [vmem:[%s1506_s3 + $0x20] sm:$0xff] %v889_v14   ;;  %v894_v21 = vpack.c.bf16 %v359_v16, %v358_v11  ;;  %v101_v23 = vmul.f32 %v1086_v2, %v30_v12  ;;  %v102_v24 = vmul.f32 %v1086_v2, %v31_v13  ;;  %v42_v14 = vld [vmem:[%s1503_s0 + $0xe0] sm:$0xff] }
  0x17   :  { %v360_v22 = vsel %vm232_vm12, %v168_v4, %v296_v15  ;;  %v361_v26 = vsel %vm233_vm13, %v169_v6, %v297_v17  ;;  %v171_v27 = vadd.f32 %v1093_v5, %v100_v18  ;;  %v103_v32 = vmul.f32 %v1086_v2, %v32_v20  ;;  %v43_v15 = vld [vmem:[%s1503_s0 + $0xe8] sm:$0xff] }
  0x18   :  { %vm234_vm14 = vcmp.ge.f32.partialorder %v170_v19, 0.0  ;;  %v298_v28 = vmul.f32 0.2, %v170_v19  ;;  %1030 = vst [vmem:[%s1506_s3 + $0x28] sm:$0xff] %v894_v21   ;;  %v899_v29 = vpack.c.bf16 %v361_v26, %v360_v22  ;;  %v172_v30 = vadd.f32 %v1093_v5, %v101_v23  ;;  %v44_v26 = vld [vmem:[%s1503_s0 + $0xf0] sm:$0xff] }
  0x19   :  { %v173_v31 = vadd.f32 %v1093_v5, %v102_v24  ;;  %vm235_vm15 = vcmp.ge.f32.partialorder %v171_v27, 0.0  ;;  %v299_v34 = vmul.f32 0.2, %v171_v27  ;;  %v104_v36 = vmul.f32 %v1086_v2, %v33_v25 }
  0x1a   :  { %v362_v35 = vsel %vm234_vm14, %v170_v19, %v298_v28  ;;  %1031 = vst [vmem:[%s1506_s3 + $0x30] sm:$0xff] %v899_v29   ;;  %vm236_vm0 = vcmp.ge.f32.partialorder %v172_v30, 0.0  ;;  %v300_v38 = vmul.f32 0.2, %v172_v30  ;;  %v174_v41 = vadd.f32 %v1093_v5, %v103_v32 }
  0x1b   :  { %vm237_vm1 = vcmp.ge.f32.partialorder %v173_v31, 0.0  ;;  %v301_v39 = vmul.f32 0.2, %v173_v31  ;;  %v363_v40 = vsel %vm235_vm15, %v171_v27, %v299_v34  ;;  %v175_v42 = vadd.f32 %v1093_v5, %v104_v36 }
  0x1c   :  { %v105_v43 = vmul.f32 %v1086_v2, %v34_v33  ;;  %v904_v45 = vpack.c.bf16 %v363_v40, %v362_v35  ;;  %v364_v46 = vsel %vm236_vm0, %v172_v30, %v300_v38  ;;  %v106_v48 = vmul.f32 %v1086_v2, %v35_v37  ;;  %v46_v38 = vld [vmem:[%s1503_s0 + $0x100] sm:$0xff] }
  0x1d   :  { %v365_v47 = vsel %vm237_vm1, %v173_v31, %v301_v39  ;;  %vm238_vm2 = vcmp.ge.f32.partialorder %v174_v41, 0.0  ;;  %vm239_vm3 = vcmp.ge.f32.partialorder %v175_v42, 0.0  ;;  %v302_v53 = vmul.f32 0.2, %v174_v41  ;;  %v45_v31 = vld [vmem:[%s1503_s0 + $0xf8] sm:$0xff] }
  0x1e   :  { %v909_v52 = vpack.c.bf16 %v365_v47, %v364_v46  ;;  %1032 = vst [vmem:[%s1506_s3 + $0x38] sm:$0xff] %v904_v45   ;;  %v303_v54 = vmul.f32 0.2, %v175_v42  ;;  %v176_v55 = vadd.f32 %v1093_v5, %v105_v43  ;;  %v177_v56 = vadd.f32 %v1093_v5, %v106_v48 }
  0x1f   :  { %v107_v57 = vmul.f32 %v1086_v2, %v36_v44  ;;  %v366_v58 = vsel %vm238_vm2, %v174_v41, %v302_v53  ;;  %v108_v59 = vmul.f32 %v1086_v2, %v37_v49  ;;  %v109_v60 = vmul.f32 %v1086_v2, %v38_v50  ;;  %v48_v50 = vld [vmem:[%s1503_s0 + $0x110] sm:$0xff] }
  0x20   :  { %1033 = vst [vmem:[%s1506_s3 + $0x40] sm:$0xff] %v909_v52   ;;  %v110_v61 = vmul.f32 %v1086_v2, %v39_v51  ;;  %v367_v63 = vsel %vm239_vm3, %v175_v42, %v303_v54  ;;  %vm240_vm4 = vcmp.ge.f32.partialorder %v176_v55, 0.0  ;;  %vm241_vm5 = vcmp.ge.f32.partialorder %v177_v56, 0.0  ;;  %v47_v42 = vld [vmem:[%s1503_s0 + $0x108] sm:$0xff]  ;;  %v49_v51 = vld [vmem:[%s1503_s0 + $0x118] sm:$0xff] }
  0x21   :  { %v304_v0 = vmul.f32 0.2, %v176_v55  ;;  %v914_v1 = vpack.c.bf16 %v367_v63, %v366_v58  ;;  %v305_v3 = vmul.f32 0.2, %v177_v56  ;;  %v178_v4 = vadd.f32 %v1093_v5, %v107_v57  ;;  %v51_v63 = vld [vmem:[%s1503_s0 + $0x128] sm:$0xff] }
  0x22   :  { %v179_v6 = vadd.f32 %v1093_v5, %v108_v59  ;;  %v180_v8 = vadd.f32 %v1093_v5, %v109_v60  ;;  %v181_v9 = vadd.f32 %v1093_v5, %v110_v61  ;;  %v111_v11 = vmul.f32 %v1086_v2, %v40_v62 }
  0x23   :  { %v368_v7 = vsel %vm240_vm4, %v176_v55, %v304_v0  ;;  %1034 = vst [vmem:[%s1506_s3 + $0x48] sm:$0xff] %v914_v1   ;;  %v369_v12 = vsel %vm241_vm5, %v177_v56, %v305_v3  ;;  %vm242_vm6 = vcmp.ge.f32.partialorder %v178_v4, 0.0  ;;  %v306_v13 = vmul.f32 0.2, %v178_v4  ;;  %v50_v55 = vld [vmem:[%s1503_s0 + $0x120] sm:$0xff] }
  0x24   :  { %vm243_vm7 = vcmp.ge.f32.partialorder %v179_v6, 0.0  ;;  %v919_v16 = vpack.c.bf16 %v369_v12, %v368_v7  ;;  %v307_v17 = vmul.f32 0.2, %v179_v6  ;;  %vm244_vm8 = vcmp.ge.f32.partialorder %v180_v8, 0.0 }
  0x25   :  { %vm245_vm9 = vcmp.ge.f32.partialorder %v181_v9, 0.0  ;;  %v370_v18 = vsel %vm242_vm6, %v178_v4, %v306_v13  ;;  %v308_v19 = vmul.f32 0.2, %v180_v8  ;;  %v309_v20 = vmul.f32 0.2, %v181_v9  ;;  %v52_v4 = vld [vmem:[%s1503_s0 + $0x130] sm:$0xff] }
  0x26   :  { %v112_v21 = vmul.f32 %v1086_v2, %v41_v10  ;;  %1035 = vst [vmem:[%s1506_s3 + $0x50] sm:$0xff] %v919_v16   ;;  %v371_v22 = vsel %vm243_vm7, %v179_v6, %v307_v17  ;;  %v182_v23 = vadd.f32 %v1093_v5, %v111_v11  ;;  %v113_v24 = vmul.f32 %v1086_v2, %v42_v14  ;;  %v53_v13 = vld [vmem:[%s1503_s0 + $0x138] sm:$0xff] }
  0x27   :  { %v114_v25 = vmul.f32 %v1086_v2, %v43_v15  ;;  %v924_v27 = vpack.c.bf16 %v371_v22, %v370_v18  ;;  %v372_v28 = vsel %vm244_vm8, %v180_v8, %v308_v19  ;;  %v373_v29 = vsel %vm245_vm9, %v181_v9, %v309_v20  ;;  %v54_v20 = vld [vmem:[%s1503_s0 + $0x140] sm:$0xff] }
  0x28   :  { %v183_v30 = vadd.f32 %v1093_v5, %v112_v21  ;;  %v929_v32 = vpack.c.bf16 %v373_v29, %v372_v28  ;;  %vm246_vm10 = vcmp.ge.f32.partialorder %v182_v23, 0.0  ;;  %v310_v33 = vmul.f32 0.2, %v182_v23 }
  0x29   :  { %v184_v34 = vadd.f32 %v1093_v5, %v113_v24  ;;  %1036 = vst [vmem:[%s1506_s3 + $0x58] sm:$0xff] %v924_v27   ;;  %v185_v36 = vadd.f32 %v1093_v5, %v114_v25  ;;  %v115_v37 = vmul.f32 %v1086_v2, %v44_v26  ;;  %v116_v41 = vmul.f32 %v1086_v2, %v45_v31  ;;  %v55_v24 = vld [vmem:[%s1503_s0 + $0x148] sm:$0xff] }
  0x2a   :  { %vm247_vm11 = vcmp.ge.f32.partialorder %v183_v30, 0.0  ;;  %v311_v35 = vmul.f32 0.2, %v183_v30  ;;  %1037 = vst [vmem:[%s1506_s3 + $0x60] sm:$0xff] %v929_v32   ;;  %v374_v39 = vsel %vm246_vm10, %v182_v23, %v310_v33  ;;  %v117_v49 = vmul.f32 %v1086_v2, %v46_v38  ;;  %v56_v32 = vld [vmem:[%s1503_s0 + $0x150] sm:$0xff]  ;;  %v57_v33 = vld [vmem:[%s1503_s0 + $0x158] sm:$0xff] }
  0x2b   :  { %vm248_vm12 = vcmp.ge.f32.partialorder %v184_v34, 0.0  ;;  %v312_v40 = vmul.f32 0.2, %v184_v34  ;;  %vm249_vm13 = vcmp.ge.f32.partialorder %v185_v36, 0.0  ;;  %v313_v44 = vmul.f32 0.2, %v185_v36 }
  0x2c   :  { %v375_v43 = vsel %vm247_vm11, %v183_v30, %v311_v35  ;;  %v186_v45 = vadd.f32 %v1093_v5, %v115_v37  ;;  %v187_v48 = vadd.f32 %v1093_v5, %v116_v41  ;;  %v118_v54 = vmul.f32 %v1086_v2, %v47_v42  ;;  %v58_v37 = vld [vmem:[%s1503_s0 + $0x160] sm:$0xff] }
  0x2d   :  { %v934_v46 = vpack.c.bf16 %v375_v43, %v374_v39  ;;  %v376_v47 = vsel %vm248_vm12, %v184_v34, %v312_v40  ;;  %v377_v52 = vsel %vm249_vm13, %v185_v36, %v313_v44  ;;  %v188_v58 = vadd.f32 %v1093_v5, %v117_v49  ;;  %v60_v49 = vld [vmem:[%s1503_s0 + $0x170] sm:$0xff] }
  0x2e   :  { %vm250_vm14 = vcmp.ge.f32.partialorder %v186_v45, 0.0  ;;  %v314_v53 = vmul.f32 0.2, %v186_v45  ;;  %v939_v56 = vpack.c.bf16 %v377_v52, %v376_v47  ;;  %vm251_vm15 = vcmp.ge.f32.partialorder %v187_v48, 0.0 }
  0x2f   :  { %1038 = vst [vmem:[%s1506_s3 + $0x68] sm:$0xff] %v934_v46   ;;  %v315_v57 = vmul.f32 0.2, %v187_v48  ;;  %v189_v60 = vadd.f32 %v1093_v5, %v118_v54  ;;  %v119_v61 = vmul.f32 %v1086_v2, %v48_v50  ;;  %v120_v62 = vmul.f32 %v1086_v2, %v49_v51 }
  0x30   :  { %v378_v59 = vsel %vm250_vm14, %v186_v45, %v314_v53  ;;  %1039 = vst [vmem:[%s1506_s3 + $0x70] sm:$0xff] %v939_v56   ;;  %vm252_vm0 = vcmp.ge.f32.partialorder %v188_v58, 0.0  ;;  %v316_v1 = vmul.f32 0.2, %v188_v58  ;;  %v121_v3 = vmul.f32 %v1086_v2, %v50_v55  ;;  %v59_v45 = vld [vmem:[%s1503_s0 + $0x168] sm:$0xff] }
  0x31   :  { %v379_v0 = vsel %vm251_vm15, %v187_v48, %v315_v57  ;;  %vm253_vm1 = vcmp.ge.f32.partialorder %v189_v60, 0.0  ;;  %v317_v7 = vmul.f32 0.2, %v189_v60  ;;  %v190_v8 = vadd.f32 %v1093_v5, %v119_v61  ;;  %v61_v57 = vld [vmem:[%s1503_s0 + $0x178] sm:$0xff] }
  0x32   :  { %v944_v6 = vpack.c.bf16 %v379_v0, %v378_v59  ;;  %v380_v9 = vsel %vm252_vm0, %v188_v58, %v316_v1  ;;  %v191_v10 = vadd.f32 %v1093_v5, %v120_v62  ;;  %v122_v11 = vmul.f32 %v1086_v2, %v51_v63  ;;  %v62_v0 = vld [vmem:[%s1503_s0 + $0x180] sm:$0xff] }
  0x33   :  { %v192_v12 = vadd.f32 %v1093_v5, %v121_v3  ;;  %v381_v14 = vsel %vm253_vm1, %v189_v60, %v317_v7  ;;  %vm254_vm2 = vcmp.ge.f32.partialorder %v190_v8, 0.0  ;;  %v318_v15 = vmul.f32 0.2, %v190_v8 }
  0x34   :  { %1040 = vst [vmem:[%s1506_s3 + $0x78] sm:$0xff] %v944_v6   ;;  %v123_v16 = vmul.f32 %v1086_v2, %v52_v4  ;;  %v949_v17 = vpack.c.bf16 %v381_v14, %v380_v9  ;;  %vm255_vm3 = vcmp.ge.f32.partialorder %v191_v10, 0.0  ;;  %v319_v18 = vmul.f32 0.2, %v191_v10  ;;  %v63_v6 = vld [vmem:[%s1503_s0 + $0x188] sm:$0xff]  ;;  %v64_v14 = vld [vmem:[%s1503_s0 + $0x190] sm:$0xff] }
  0x35   :  { %v193_v19 = vadd.f32 %v1093_v5, %v122_v11  ;;  %v382_v21 = vsel %vm254_vm2, %v190_v8, %v318_v15  ;;  %vm256_vm4 = vcmp.ge.f32.partialorder %v192_v12, 0.0  ;;  %v320_v22 = vmul.f32 0.2, %v192_v12  ;;  %v65_v15 = vld [vmem:[%s1503_s0 + $0x198] sm:$0xff] }
  0x36   :  { %v124_v23 = vmul.f32 %v1086_v2, %v53_v13  ;;  %1041 = vst [vmem:[%s1506_s3 + $0x80] sm:$0xff] %v949_v17   ;;  %v383_v25 = vsel %vm255_vm3, %v191_v10, %v319_v18  ;;  %v194_v27 = vadd.f32 %v1093_v5, %v123_v16  ;;  %v125_v31 = vmul.f32 %v1086_v2, %v54_v20 }
  0x37   :  { %vm257_vm5 = vcmp.ge.f32.partialorder %v193_v19, 0.0  ;;  %v321_v26 = vmul.f32 0.2, %v193_v19  ;;  %v954_v28 = vpack.c.bf16 %v383_v25, %v382_v21  ;;  %v384_v29 = vsel %vm256_vm4, %v192_v12, %v320_v22 }
  0x38   :  { %v195_v30 = vadd.f32 %v1093_v5, %v124_v23  ;;  %vm258_vm6 = vcmp.ge.f32.partialorder %v194_v27, 0.0  ;;  %v322_v35 = vmul.f32 0.2, %v194_v27  ;;  %v126_v36 = vmul.f32 %v1086_v2, %v55_v24 }
  0x39   :  { %v385_v34 = vsel %vm257_vm5, %v193_v19, %v321_v26  ;;  %1042 = vst [vmem:[%s1506_s3 + $0x88] sm:$0xff] %v954_v28   ;;  %v196_v40 = vadd.f32 %v1093_v5, %v125_v31  ;;  %v127_v43 = vmul.f32 %v1086_v2, %v56_v32  ;;  %v128_v44 = vmul.f32 %v1086_v2, %v57_v33  ;;  %v66_v19 = vld [vmem:[%s1503_s0 + $0x1a0] sm:$0xff]  ;;  %v68_v31 = vld [vmem:[%s1503_s0 + $0x1b0] sm:$0xff] }
  0x3a   :  { %v959_v38 = vpack.c.bf16 %v385_v34, %v384_v29  ;;  %vm259_vm7 = vcmp.ge.f32.partialorder %v195_v30, 0.0  ;;  %v323_v39 = vmul.f32 0.2, %v195_v30  ;;  %v386_v41 = vsel %vm258_vm6, %v194_v27, %v322_v35  ;;  %v67_v27 = vld [vmem:[%s1503_s0 + $0x1a8] sm:$0xff] }
  0x3b   :  { %v197_v42 = vadd.f32 %v1093_v5, %v126_v36  ;;  %vm260_vm8 = vcmp.ge.f32.partialorder %v196_v40, 0.0  ;;  %v324_v47 = vmul.f32 0.2, %v196_v40  ;;  %v129_v48 = vmul.f32 %v1086_v2, %v58_v37 }
  0x3c   :  { %1043 = vst [vmem:[%s1506_s3 + $0x90] sm:$0xff] %v959_v38   ;;  %v387_v46 = vsel %vm259_vm7, %v195_v30, %v323_v39  ;;  %v198_v52 = vadd.f32 %v1093_v5, %v127_v43  ;;  %v199_v54 = vadd.f32 %v1093_v5, %v128_v44  ;;  %v130_v55 = vmul.f32 %v1086_v2, %v59_v45  ;;  %v69_v39 = vld [vmem:[%s1503_s0 + $0x1b8] sm:$0xff] }
  0x3d   :  { %v964_v50 = vpack.c.bf16 %v387_v46, %v386_v41  ;;  %vm261_vm9 = vcmp.ge.f32.partialorder %v197_v42, 0.0  ;;  %v325_v51 = vmul.f32 0.2, %v197_v42  ;;  %v388_v53 = vsel %vm260_vm8, %v196_v40, %v324_v47  ;;  %v70_v46 = vld [vmem:[%s1503_s0 + $0x1c0] sm:$0xff] }
  0x3e   :  { %v200_v56 = vadd.f32 %v1093_v5, %v129_v48  ;;  %vm262_vm10 = vcmp.ge.f32.partialorder %v198_v52, 0.0  ;;  %v326_v59 = vmul.f32 0.2, %v198_v52  ;;  %v131_v60 = vmul.f32 %v1086_v2, %v60_v49 }
  0x3f   :  { %1044 = vst [vmem:[%s1506_s3 + $0x98] sm:$0xff] %v964_v50   ;;  %v389_v58 = vsel %vm261_vm9, %v197_v42, %v325_v51  ;;  %vm263_vm11 = vcmp.ge.f32.partialorder %v199_v54, 0.0  ;;  %v327_v62 = vmul.f32 0.2, %v199_v54  ;;  %v201_v63 = vadd.f32 %v1093_v5, %v130_v55  ;;  %v71_v50 = vld [vmem:[%s1503_s0 + $0x1c8] sm:$0xff] }
  0x40   :  { %v969_v61 = vpack.c.bf16 %v389_v58, %v388_v53  ;;  %v390_v1 = vsel %vm262_vm10, %v198_v52, %v326_v59  ;;  %vm264_vm12 = vcmp.ge.f32.partialorder %v200_v56, 0.0  ;;  %v328_v3 = vmul.f32 0.2, %v200_v56  ;;  %v72_v58 = vld [vmem:[%s1503_s0 + $0x1d0] sm:$0xff]  ;;  %v73_v59 = vld [vmem:[%s1503_s0 + $0x1d8] sm:$0xff] }
  0x41   :  { %v132_v4 = vmul.f32 %v1086_v2, %v61_v57  ;;  %v391_v7 = vsel %vm263_vm11, %v199_v54, %v327_v62  ;;  %vm265_vm13 = vcmp.ge.f32.partialorder %v201_v63, 0.0  ;;  %v329_v8 = vmul.f32 0.2, %v201_v63 }
  0x42   :  { %1045 = vst [vmem:[%s1506_s3 + $0xa0] sm:$0xff] %v969_v61   ;;  %v202_v9 = vadd.f32 %v1093_v5, %v131_v60  ;;  %v974_v10 = vpack.c.bf16 %v391_v7, %v390_v1  ;;  %v392_v11 = vsel %vm264_vm12, %v200_v56, %v328_v3  ;;  %v133_v13 = vmul.f32 %v1086_v2, %v62_v0 }
  0x43   :  { %v203_v12 = vadd.f32 %v1093_v5, %v132_v4  ;;  %v393_v16 = vsel %vm265_vm13, %v201_v63, %v329_v8  ;;  %v134_v18 = vmul.f32 %v1086_v2, %v63_v6  ;;  %v135_v25 = vmul.f32 %v1086_v2, %v64_v14  ;;  %v74_v63 = vld [vmem:[%s1503_s0 + $0x1e0] sm:$0xff] }
  0x44   :  { %vm266_vm14 = vcmp.ge.f32.partialorder %v202_v9, 0.0  ;;  %v330_v17 = vmul.f32 0.2, %v202_v9  ;;  %1046 = vst [vmem:[%s1506_s3 + $0xa8] sm:$0xff] %v974_v10   ;;  %v979_v20 = vpack.c.bf16 %v393_v16, %v392_v11  ;;  %v204_v22 = vadd.f32 %v1093_v5, %v133_v13  ;;  %v76_v13 = vld [vmem:[%s1503_s0 + $0x1f0] sm:$0xff] }
  0x45   :  { %vm267_vm15 = vcmp.ge.f32.partialorder %v203_v12, 0.0  ;;  %v331_v21 = vmul.f32 0.2, %v203_v12  ;;  %v205_v24 = vadd.f32 %v1093_v5, %v134_v18  ;;  %v136_v26 = vmul.f32 %v1086_v2, %v65_v15 }
  0x46   :  { %v394_v23 = vsel %vm266_vm14, %v202_v9, %v330_v17  ;;  %1047 = vst [vmem:[%s1506_s3 + $0xb0] sm:$0xff] %v979_v20   ;;  %vm268_vm0 = vcmp.ge.f32.partialorder %v204_v22, 0.0  ;;  %v332_v29 = vmul.f32 0.2, %v204_v22  ;;  %v137_v30 = vmul.f32 %v1086_v2, %v66_v19  ;;  %v75_v9 = vld [vmem:[%s1503_s0 + $0x1e8] sm:$0xff] }
  0x47   :  { %v395_v28 = vsel %vm267_vm15, %v203_v12, %v331_v21  ;;  %vm269_vm1 = vcmp.ge.f32.partialorder %v205_v24, 0.0  ;;  %v333_v33 = vmul.f32 0.2, %v205_v24  ;;  %v206_v34 = vadd.f32 %v1093_v5, %v135_v25  ;;  %v77_v21 = vld [vmem:[%s1503_s0 + $0x1f8] sm:$0xff] }
  0x48   :  { %v984_v32 = vpack.c.bf16 %v395_v28, %v394_v23  ;;  %v396_v35 = vsel %vm268_vm0, %v204_v22, %v332_v29  ;;  %v207_v36 = vadd.f32 %v1093_v5, %v136_v26  ;;  %v138_v37 = vmul.f32 %v1086_v2, %v67_v27 }
  0x49   :  { %v208_v38 = vadd.f32 %v1093_v5, %v137_v30  ;;  %v397_v40 = vsel %vm269_vm1, %v205_v24, %v333_v33  ;;  %vm270_vm2 = vcmp.ge.f32.partialorder %v206_v34, 0.0  ;;  %v334_v41 = vmul.f32 0.2, %v206_v34 }
  0x4a   :  { %1048 = vst [vmem:[%s1506_s3 + $0xb8] sm:$0xff] %v984_v32   ;;  %v139_v42 = vmul.f32 %v1086_v2, %v68_v31  ;;  %v989_v43 = vpack.c.bf16 %v397_v40, %v396_v35  ;;  %vm271_vm3 = vcmp.ge.f32.partialorder %v207_v36, 0.0  ;;  %v335_v44 = vmul.f32 0.2, %v207_v36 }
  0x4b   :  { %v209_v45 = vadd.f32 %v1093_v5, %v138_v37  ;;  %v398_v47 = vsel %vm270_vm2, %v206_v34, %v334_v41  ;;  %vm272_vm4 = vcmp.ge.f32.partialorder %v208_v38, 0.0  ;;  %v336_v48 = vmul.f32 0.2, %v208_v38 }
  0x4c   :  { %v140_v49 = vmul.f32 %v1086_v2, %v69_v39  ;;  %1049 = vst [vmem:[%s1506_s3 + $0xc0] sm:$0xff] %v989_v43   ;;  %v399_v51 = vsel %vm271_vm3, %v207_v36, %v335_v44  ;;  %v210_v53 = vadd.f32 %v1093_v5, %v139_v42  ;;  %v141_v57 = vmul.f32 %v1086_v2, %v70_v46 }
  0x4d   :  { %vm273_vm5 = vcmp.ge.f32.partialorder %v209_v45, 0.0  ;;  %v337_v52 = vmul.f32 0.2, %v209_v45  ;;  %v994_v54 = vpack.c.bf16 %v399_v51, %v398_v47  ;;  %v400_v55 = vsel %vm272_vm4, %v208_v38, %v336_v48 }
  0x4e   :  { %v211_v56 = vadd.f32 %v1093_v5, %v140_v49  ;;  %vm274_vm6 = vcmp.ge.f32.partialorder %v210_v53, 0.0  ;;  %v338_v61 = vmul.f32 0.2, %v210_v53  ;;  %v142_v62 = vmul.f32 %v1086_v2, %v71_v50 }
  0x4f   :  { %v401_v60 = vsel %vm273_vm5, %v209_v45, %v337_v52  ;;  %1050 = vst [vmem:[%s1506_s3 + $0xc8] sm:$0xff] %v994_v54   ;;  %v212_v3 = vadd.f32 %v1093_v5, %v141_v57  ;;  %v143_v7 = vmul.f32 %v1086_v2, %v72_v58  ;;  %v144_v8 = vmul.f32 %v1086_v2, %v73_v59 }
  0x50   :  { %v999_v0 = vpack.c.bf16 %v401_v60, %v400_v55  ;;  %vm275_vm7 = vcmp.ge.f32.partialorder %v211_v56, 0.0  ;;  %v339_v1 = vmul.f32 0.2, %v211_v56  ;;  %v402_v4 = vsel %vm274_vm6, %v210_v53, %v338_v61 }
  0x51   :  { %v213_v6 = vadd.f32 %v1093_v5, %v142_v62  ;;  %vm276_vm8 = vcmp.ge.f32.partialorder %v212_v3, 0.0  ;;  %v340_v11 = vmul.f32 0.2, %v212_v3  ;;  %v145_v12 = vmul.f32 %v1086_v2, %v74_v63 }
  0x52   :  { %1051 = vst [vmem:[%s1506_s3 + $0xd0] sm:$0xff] %v999_v0   ;;  %v403_v10 = vsel %vm275_vm7, %v211_v56, %v339_v1  ;;  %v214_v16 = vadd.f32 %v1093_v5, %v143_v7  ;;  %v215_v18 = vadd.f32 %v1093_v5, %v144_v8  ;;  %v146_v19 = vmul.f32 %v1086_v2, %v75_v9 }
  0x53   :  { %v1004_v14 = vpack.c.bf16 %v403_v10, %v402_v4  ;;  %vm277_vm9 = vcmp.ge.f32.partialorder %v213_v6, 0.0  ;;  %v341_v15 = vmul.f32 0.2, %v213_v6  ;;  %v404_v17 = vsel %vm276_vm8, %v212_v3, %v340_v11 }
  0x54   :  { %v216_v20 = vadd.f32 %v1093_v5, %v145_v12  ;;  %vm278_vm10 = vcmp.ge.f32.partialorder %v214_v16, 0.0  ;;  %v342_v23 = vmul.f32 0.2, %v214_v16  ;;  %v147_v24 = vmul.f32 %v1086_v2, %v76_v13 }
  0x55   :  { %1052 = vst [vmem:[%s1506_s3 + $0xd8] sm:$0xff] %v1004_v14   ;;  %v405_v22 = vsel %vm277_vm9, %v213_v6, %v341_v15  ;;  %vm279_vm11 = vcmp.ge.f32.partialorder %v215_v18, 0.0  ;;  %v343_v26 = vmul.f32 0.2, %v215_v18  ;;  %v217_v27 = vadd.f32 %v1093_v5, %v146_v19 }
  0x56   :  { %v1009_v25 = vpack.c.bf16 %v405_v22, %v404_v17  ;;  %v406_v28 = vsel %vm278_vm10, %v214_v16, %v342_v23  ;;  %vm280_vm12 = vcmp.ge.f32.partialorder %v216_v20, 0.0  ;;  %v344_v29 = vmul.f32 0.2, %v216_v20 }
  0x57   :  { %v148_v30 = vmul.f32 %v1086_v2, %v77_v21  ;;  %v407_v31 = vsel %vm279_vm11, %v215_v18, %v343_v26  ;;  %vm281_vm13 = vcmp.ge.f32.partialorder %v217_v27, 0.0  ;;  %v345_v32 = vmul.f32 0.2, %v217_v27 }
  0x58   :  { %1053 = vst [vmem:[%s1506_s3 + $0xe0] sm:$0xff] %v1009_v25   ;;  %v218_v33 = vadd.f32 %v1093_v5, %v147_v24  ;;  %v1014_v34 = vpack.c.bf16 %v407_v31, %v406_v28  ;;  %v408_v35 = vsel %vm280_vm12, %v216_v20, %v344_v29 }
  0x59   :  { %v219_v36 = vadd.f32 %v1093_v5, %v148_v30  ;;  %v409_v37 = vsel %vm281_vm13, %v217_v27, %v345_v32 }
  0x5a   :  { %vm282_vm14 = vcmp.ge.f32.partialorder %v218_v33, 0.0  ;;  %v346_v38 = vmul.f32 0.2, %v218_v33  ;;  %1054 = vst [vmem:[%s1506_s3 + $0xe8] sm:$0xff] %v1014_v34   ;;  %v1019_v2 = vpack.c.bf16 %v409_v37, %v408_v35 }
  0x5b   :  { %vm283_vm15 = vcmp.ge.f32.partialorder %v219_v36, 0.0  ;;  %v347_v39 = vmul.f32 0.2, %v219_v36 }
  0x5c   :  { %v410_v40 = vsel %vm282_vm14, %v218_v33, %v346_v38  ;;  %1055 = vst [vmem:[%s1506_s3 + $0xf0] sm:$0xff] %v1019_v2  }
  0x5d   :  { %v411_v41 = vsel %vm283_vm15, %v219_v36, %v347_v39 }
  0x5e   :  { %v1024_v42 = vpack.c.bf16 %v411_v41, %v410_v40 }
  0x60   :  { %1056 = vst [vmem:[%s1506_s3 + $0xf8] sm:$0xff] %v1024_v42  }

// kernel: discriminator_forward.10
= control target key start
LH: loop header
LB: loop body
LE: loop exit
PB: predicated region body
PF: predicated region fallthrough
CT: control target
= control target key end

     0   :  { %v587_v32 = vmov 0.0   ;;  %s793_s1 = inlined_call_operand.vmem [shape: bf16[256,128], index: 1, kind: input, shape index: {}]   ;;  %s794_s0 = inlined_call_operand.vmem [shape: bf16[128,256], index: 0, kind: input, shape index: {}]   ;;  %s795_s3 = inlined_call_operand.vmem [shape: f32[1,128], index: 3, kind: output, shape index: {1}]   ;;  %s796_s4 = inlined_call_operand.vmem [shape: f32[1,128], index: 4, kind: output, shape index: {2}]   ;;  %s797_s2 = inlined_call_operand.vmem [shape: f32[128,128], index: 2, kind: output, shape index: {0}]  }
   0x1   :  { %v547_v0 = vld [vmem:[%s793_s1 + $0x40] sm:$0xff]   ;;  %v549_v2 = vld [vmem:[%s793_s1 + $0x48] sm:$0xff]   ;;  %v551_v4 = vld [vmem:[%s793_s1 + $0x50] sm:$0xff]   ;;  %19 = vst [vmem:[%s795_s3] sm:$0x1] %v587_v32 }
   0x2   :  { %v548_v1 = vld [vmem:[%s793_s1] sm:$0xff]   ;;  %466 = vmatprep.subr.bf16.mxu0 %v547_v0  ;;  %530 = vmatprep.subr.bf16.mxu1 %v547_v0  ;;  %v550_v3 = vld [vmem:[%s793_s1 + $0x8] sm:$0xff]   ;;  %v552_v5 = vld [vmem:[%s793_s1 + $0x10] sm:$0xff]   ;;  %20 = vst [vmem:[%s796_s4] sm:$0x1] %v587_v32 }
   0x3   :  { %467 = vmatpush3.bf16.msra.mxu0 %v548_v1  ;;  %538 = vmatpush3.bf16.msra.mxu1 %v548_v1  ;;  %v553_v6 = vld [vmem:[%s793_s1 + $0x58] sm:$0xff]   ;;  %v555_v8 = vld [vmem:[%s793_s1 + $0x60] sm:$0xff]   ;;  %v557_v10 = vld [vmem:[%s793_s1 + $0x68] sm:$0xff]  }
   0x4   :  { %468 = vmatprep.subr.bf16.mxu0 %v549_v2  ;;  %531 = vmatprep.subr.bf16.mxu1 %v549_v2  ;;  %v554_v7 = vld [vmem:[%s793_s1 + $0x18] sm:$0xff]   ;;  %v556_v9 = vld [vmem:[%s793_s1 + $0x20] sm:$0xff]   ;;  %v558_v12 = vld [vmem:[%s793_s1 + $0x28] sm:$0xff]  }
   0x5   :  { %v565_v11 = vld [vmem:[%s794_s0 + $0x4] ss:$8 sps:$4 sm:$0xff]   ;;  %v559_v14 = vld [vmem:[%s793_s1 + $0x70] sm:$0xff]   ;;  %v561_v16 = vld [vmem:[%s793_s1 + $0x78] sm:$0xff]  }
   0x6   :  { %v571_v13 = vld [vmem:[%s794_s0 + $0x44] ss:$8 sps:$4 sm:$0xff]   ;;  %277 = vmatprep.mubr.bf16.mxu0 %v565_v11  ;;  %v560_v15 = vld [vmem:[%s793_s1 + $0x30] sm:$0xff]   ;;  %v562_v17 = vld [vmem:[%s793_s1 + $0x38] sm:$0xff]  }
   0x7   :  { %469 = vmatpush3.bf16.msra.mxu0 %v550_v3  ;;  %539 = vmatpush3.bf16.msra.mxu1 %v550_v3  ;;  %v563_v18 = vld [vmem:[%s794_s0] ss:$8 sps:$4 sm:$0xff]   ;;  %v566_v20 = vld [vmem:[%s794_s0 + $0x14] ss:$8 sps:$4 sm:$0xff]   ;;  %v568_v22 = vld [vmem:[%s794_s0 + $0x10] ss:$8 sps:$4 sm:$0xff]  }
   0x8   :  { %470 = vmatprep.subr.bf16.mxu0 %v551_v4  ;;  %532 = vmatprep.subr.bf16.mxu1 %v551_v4  ;;  %v569_v19 = vld [vmem:[%s794_s0 + $0x40] ss:$8 sps:$4 sm:$0xff]   ;;  %v575_v21 = vld [vmem:[%s794_s0 + $0x54] ss:$8 sps:$4 sm:$0xff]   ;;  %v577_v23 = vld [vmem:[%s794_s0 + $0x50] ss:$8 sps:$4 sm:$0xff]  }
   0x9   :  { %309 = vmatprep.mubr.bf16.mxu1 %v571_v13  ;;  %v572_v24 = vld [vmem:[%s794_s0 + $0x24] ss:$8 sps:$4 sm:$0xff]   ;;  %v574_v26 = vld [vmem:[%s794_s0 + $0x20] ss:$8 sps:$4 sm:$0xff]   ;;  %v578_v28 = vld [vmem:[%s794_s0 + $0x34] ss:$8 sps:$4 sm:$0xff]  }
   0xa   :  { %v581_v25 = vld [vmem:[%s794_s0 + $0x64] ss:$8 sps:$4 sm:$0xff]   ;;  %v583_v27 = vld [vmem:[%s794_s0 + $0x60] ss:$8 sps:$4 sm:$0xff]   ;;  %v584_v29 = vld [vmem:[%s794_s0 + $0x74] ss:$8 sps:$4 sm:$0xff]  }
   0xb   :  { %471 = vmatpush3.bf16.msra.mxu0 %v552_v5  ;;  %540 = vmatpush3.bf16.msra.mxu1 %v552_v5  ;;  %v580_v30 = vld [vmem:[%s794_s0 + $0x30] ss:$8 sps:$4 sm:$0xff]  }
   0xc   :  { %472 = vmatprep.subr.bf16.mxu0 %v553_v6  ;;  %533 = vmatprep.subr.bf16.mxu1 %v553_v6  ;;  %v586_v31 = vld [vmem:[%s794_s0 + $0x70] ss:$8 sps:$4 sm:$0xff]  }
   0xf   :  { %473 = vmatpush3.bf16.msra.mxu0 %v554_v7  ;;  %541 = vmatpush3.bf16.msra.mxu1 %v554_v7 }
  0x10   :  { %474 = vmatprep.subr.bf16.mxu0 %v555_v8  ;;  %534 = vmatprep.subr.bf16.mxu1 %v555_v8 }
  0x13   :  { %475 = vmatpush3.bf16.msra.mxu0 %v556_v9  ;;  %542 = vmatpush3.bf16.msra.mxu1 %v556_v9 }
  0x14   :  { %476 = vmatprep.subr.bf16.mxu0 %v557_v10  ;;  %535 = vmatprep.subr.bf16.mxu1 %v557_v10 }
  0x17   :  { %477 = vmatpush3.bf16.msra.mxu0 %v558_v12  ;;  %543 = vmatpush3.bf16.msra.mxu1 %v558_v12 }
  0x18   :  { %478 = vmatprep.subr.bf16.mxu0 %v559_v14  ;;  %536 = vmatprep.subr.bf16.mxu1 %v559_v14 }
  0x1b   :  { %479 = vmatpush3.bf16.msra.mxu0 %v560_v15  ;;  %544 = vmatpush3.bf16.msra.mxu1 %v560_v15 }
  0x1c   :  { %480 = vmatprep.subr.bf16.mxu0 %v561_v16  ;;  %537 = vmatprep.subr.bf16.mxu1 %v561_v16 }
  0x1f   :  { %481 = vmatpush3.bf16.msra.mxu0 %v562_v17  ;;  %545 = vmatpush3.bf16.msra.mxu1 %v562_v17 }
  0x22   :  { %278 = vmatmul.mubr.bf16.vlgmr.msra.gmra.mrb[0].mxu0 %v563_v18  ;;  %310 = vmatmul.mubr.bf16.vlgmr.msra.gmra.mrb[0].mxu1 %v569_v19 }
  0x23   :  { %285 = vmatprep.mubr.bf16.mxu0 %v566_v20  ;;  %317 = vmatprep.mubr.bf16.mxu1 %v575_v21 }
  0x2a   :  { %286 = vmatmul.mubr.bf16.gmra.mrb[4].mxu0 %v568_v22  ;;  %318 = vmatmul.mubr.bf16.gmra.mrb[4].mxu1 %v577_v23 }
  0x2b   :  { %293 = vmatprep.mubr.bf16.mxu0 %v572_v24  ;;  %325 = vmatprep.mubr.bf16.mxu1 %v581_v25 }
  0x32   :  { %294 = vmatmul.mubr.bf16.gmra.mrb[8].mxu0 %v574_v26  ;;  %326 = vmatmul.mubr.bf16.gmra.mrb[8].mxu1 %v583_v27 }
  0x33   :  { %301 = vmatprep.mubr.bf16.mxu0 %v578_v28  ;;  %333 = vmatprep.mubr.bf16.mxu1 %v584_v29 }
  0x3a   :  { %302 = vmatmul.mubr.bf16.gmra.mrb[12].mxu0 %v580_v30  ;;  %334 = vmatmul.mubr.bf16.gmra.mrb[12].mxu1 %v586_v31 }
  0xf5   :  { %v482_v33 = vpop.f32.mrb[0].mxu0  ;;  %v506_v34 = vpop.f32.mrb[0].mxu1 }
  0xf6   :  { %v483_v35 = vpop.f32.mrb[1].mxu0  ;;  %v507_v36 = vpop.f32.mrb[1].mxu1 }
  0xf7   :  { %v484_v37 = vadd.f32 %v483_v35, %v482_v33  ;;  %v485_v38 = vpop.f32.mrb[2].mxu0  ;;  %v715_v39 = vadd.f32 %v507_v36, %v506_v34  ;;  %v509_v40 = vpop.f32.mrb[2].mxu1 }
  0xf8   :  { %v486_v41 = vpop.f32.mrb[3].mxu0  ;;  %v510_v42 = vpop.f32.mrb[3].mxu1 }
  0xf9   :  { %342 = vst [vmem:[%s797_s2] sm:$0xff] %v484_v37  ;;  %v487_v43 = vadd.f32 %v486_v41, %v485_v38  ;;  %350 = vst [vmem:[%s797_s2 + $0x40] sm:$0xff] %v715_v39  ;;  %v724_v44 = vadd.f32 %v510_v42, %v509_v40  ;;  %v383_v45 = vmul.f32 %v484_v37, %v484_v37 }
  0xfa   :  { %v391_v38 = vmul.f32 %v715_v39, %v715_v39 }
  0xfb   :  { %343 = vst [vmem:[%s797_s2 + $0x8] sm:$0xff] %v487_v43  ;;  %v359_v46 = vadd.f32 %v487_v43, %v484_v37  ;;  %v384_v47 = vmul.f32 %v487_v43, %v487_v43  ;;  %351 = vst [vmem:[%s797_s2 + $0x48] sm:$0xff] %v724_v44  ;;  %v392_v42 = vmul.f32 %v724_v44, %v724_v44 }
  0xfd   :  { %v399_v48 = vadd.f32 %v384_v47, %v383_v45  ;;  %v488_v49 = vpop.f32.mrb[4].mxu0  ;;  %v512_v50 = vpop.f32.mrb[4].mxu1 }
  0xfe   :  { %v489_v51 = vpop.f32.mrb[5].mxu0  ;;  %v513_v52 = vpop.f32.mrb[5].mxu1 }
  0xff   :  { %v490_v53 = vadd.f32 %v489_v51, %v488_v49  ;;  %v491_v54 = vpop.f32.mrb[6].mxu0  ;;  %v733_v55 = vadd.f32 %v513_v52, %v512_v50  ;;  %v515_v56 = vpop.f32.mrb[6].mxu1 }
 0x100   :  { %v492_v57 = vpop.f32.mrb[7].mxu0  ;;  %v516_v58 = vpop.f32.mrb[7].mxu1 }
 0x101   :  { %344 = vst [vmem:[%s797_s2 + $0x10] sm:$0xff] %v490_v53  ;;  %v360_v59 = vadd.f32 %v490_v53, %v359_v46  ;;  %v385_v60 = vmul.f32 %v490_v53, %v490_v53  ;;  %v493_v61 = vadd.f32 %v492_v57, %v491_v54  ;;  %352 = vst [vmem:[%s797_s2 + $0x50] sm:$0xff] %v733_v55 }
 0x102   :  { %v517_v62 = vadd.f32 %v516_v58, %v515_v56  ;;  %v393_v46 = vmul.f32 %v733_v55, %v733_v55 }
 0x103   :  { %v400_v63 = vadd.f32 %v399_v48, %v385_v60  ;;  %345 = vst [vmem:[%s797_s2 + $0x18] sm:$0xff] %v493_v61  ;;  %v361_v0 = vadd.f32 %v493_v61, %v360_v59  ;;  %v386_v1 = vmul.f32 %v493_v61, %v493_v61 }
 0x104   :  { %353 = vst [vmem:[%s797_s2 + $0x58] sm:$0xff] %v517_v62  ;;  %v394_v49 = vmul.f32 %v517_v62, %v517_v62 }
 0x105   :  { %v401_v2 = vadd.f32 %v400_v63, %v386_v1  ;;  %v494_v3 = vpop.f32.mrb[8].mxu0  ;;  %v518_v4 = vpop.f32.mrb[8].mxu1 }
 0x106   :  { %v495_v5 = vpop.f32.mrb[9].mxu0  ;;  %v519_v6 = vpop.f32.mrb[9].mxu1 }
 0x107   :  { %v496_v7 = vadd.f32 %v495_v5, %v494_v3  ;;  %v497_v8 = vpop.f32.mrb[10].mxu0  ;;  %v520_v9 = vadd.f32 %v519_v6, %v518_v4  ;;  %v521_v10 = vpop.f32.mrb[10].mxu1 }
 0x108   :  { %v498_v11 = vpop.f32.mrb[11].mxu0  ;;  %v522_v12 = vpop.f32.mrb[11].mxu1 }
 0x109   :  { %346 = vst [vmem:[%s797_s2 + $0x20] sm:$0xff] %v496_v7  ;;  %v362_v13 = vadd.f32 %v496_v7, %v361_v0  ;;  %v387_v14 = vmul.f32 %v496_v7, %v496_v7  ;;  %v499_v15 = vadd.f32 %v498_v11, %v497_v8  ;;  %354 = vst [vmem:[%s797_s2 + $0x60] sm:$0xff] %v520_v9  ;;  %v358_v8 = vld [vmem:[%s795_s3] sm:$0x1] }
 0x10a   :  { %v523_v16 = vadd.f32 %v522_v12, %v521_v10  ;;  %v395_v53 = vmul.f32 %v520_v9, %v520_v9  ;;  %v382_v11 = vld [vmem:[%s796_s4] sm:$0x1] }
 0x10b   :  { %v402_v17 = vadd.f32 %v401_v2, %v387_v14  ;;  %347 = vst [vmem:[%s797_s2 + $0x28] sm:$0xff] %v499_v15  ;;  %v363_v18 = vadd.f32 %v499_v15, %v362_v13  ;;  %v388_v19 = vmul.f32 %v499_v15, %v499_v15 }
 0x10c   :  { %355 = vst [vmem:[%s797_s2 + $0x68] sm:$0xff] %v523_v16  ;;  %v396_v57 = vmul.f32 %v523_v16, %v523_v16 }
 0x10d   :  { %v403_v20 = vadd.f32 %v402_v17, %v388_v19  ;;  %v500_v21 = vpop.f32.mrb[12].mxu0  ;;  %v524_v22 = vpop.f32.mrb[12].mxu1 }
 0x10e   :  { %v501_v23 = vpop.f32.mrb[13].mxu0  ;;  %v525_v24 = vpop.f32.mrb[13].mxu1 }
 0x10f   :  { %v502_v25 = vadd.f32 %v501_v23, %v500_v21  ;;  %v503_v26 = vpop.f32.mrb[14].mxu0  ;;  %v526_v27 = vadd.f32 %v525_v24, %v524_v22  ;;  %v527_v28 = vpop.f32.mrb[14].mxu1 }
 0x110   :  { %v504_v29 = vpop.f32.mrb[15].mxu0  ;;  %v528_v30 = vpop.f32.mrb[15].mxu1 }
 0x111   :  { %348 = vst [vmem:[%s797_s2 + $0x30] sm:$0xff] %v502_v25  ;;  %v364_v31 = vadd.f32 %v502_v25, %v363_v18  ;;  %v389_v32 = vmul.f32 %v502_v25, %v502_v25  ;;  %v505_v33 = vadd.f32 %v504_v29, %v503_v26  ;;  %356 = vst [vmem:[%s797_s2 + $0x70] sm:$0xff] %v526_v27 }
 0x112   :  { %v529_v34 = vadd.f32 %v528_v30, %v527_v28  ;;  %v397_v58 = vmul.f32 %v526_v27, %v526_v27 }
 0x113   :  { %v404_v35 = vadd.f32 %v403_v20, %v389_v32  ;;  %349 = vst [vmem:[%s797_s2 + $0x38] sm:$0xff] %v505_v33  ;;  %v365_v36 = vadd.f32 %v505_v33, %v364_v31  ;;  %v390_v37 = vmul.f32 %v505_v33, %v505_v33 }
 0x114   :  { %357 = vst [vmem:[%s797_s2 + $0x78] sm:$0xff] %v529_v34  ;;  %v398_v63 = vmul.f32 %v529_v34, %v529_v34 }
 0x115   :  { %v366_v40 = vadd.f32 %v715_v39, %v365_v36  ;;  %v405_v41 = vadd.f32 %v404_v35, %v390_v37 }
 0x117   :  { %v367_v43 = vadd.f32 %v724_v44, %v366_v40  ;;  %v406_v45 = vadd.f32 %v405_v41, %v391_v38 }
 0x119   :  { %v407_v47 = vadd.f32 %v406_v45, %v392_v42  ;;  %v368_v48 = vadd.f32 %v733_v55, %v367_v43 }
 0x11b   :  { %v369_v50 = vadd.f32 %v517_v62, %v368_v48  ;;  %v408_v51 = vadd.f32 %v407_v47, %v393_v46 }
 0x11d   :  { %v370_v52 = vadd.f32 %v520_v9, %v369_v50  ;;  %v409_v54 = vadd.f32 %v408_v51, %v394_v49 }
 0x11f   :  { %v410_v39 = vadd.f32 %v409_v54, %v395_v53  ;;  %v371_v56 = vadd.f32 %v523_v16, %v370_v52 }
 0x121   :  { %v411_v59 = vadd.f32 %v410_v39, %v396_v57  ;;  %v372_v60 = vadd.f32 %v526_v27, %v371_v56 }
 0x123   :  { %v412_v44 = vadd.f32 %v411_v59, %v397_v58  ;;  %v373_v61 = vadd.f32 %v529_v34, %v372_v60 }
 0x125   :  { %v374_v0 = vrot.slane %v373_v61, 4  ;;  %v413_v1 = vadd.f32 %v412_v44, %v398_v63 }
 0x127   :  { %v375_v2 = vadd.f32 %v374_v0, %v373_v61  ;;  %v414_v3 = vrot.slane %v413_v1, 4 }
 0x129   :  { %v376_v55 = vrot.slane %v375_v2, 2  ;;  %v415_v4 = vadd.f32 %v414_v3, %v413_v1 }
 0x12b   :  { %v377_v62 = vadd.f32 %v376_v55, %v375_v2  ;;  %v416_v5 = vrot.slane %v415_v4, 2 }
 0x12d   :  { %v378_v6 = vrot.slane %v377_v62, 1  ;;  %v417_v7 = vadd.f32 %v416_v5, %v415_v4 }
 0x12f   :  { %v379_v9 = vadd.f32 %v378_v6, %v377_v62  ;;  %v418_v10 = vrot.slane %v417_v7, 1 }
 0x131   :  { %v380_v12 = vadd.f32 %v379_v9, %v358_v8  ;;  %v419_v13 = vadd.f32 %v418_v10, %v417_v7 }
 0x133   :  { %381 = vst [vmem:[%s795_s3] sm:$0x1] %v380_v12  ;;  %v420_v14 = vadd.f32 %v419_v13, %v382_v11 }
 0x135   :  { %421 = vst [vmem:[%s796_s4] sm:$0x1] %v420_v14 }

// kernel: discriminator_forward.11
= control target key start
LH: loop header
LB: loop body
LE: loop exit
PB: predicated region body
PF: predicated region fallthrough
CT: control target
= control target key end

     0   :  { %s423_s0 = inlined_call_operand.vmem [shape: f32[128,128], index: 0, kind: input, shape index: {}]   ;;  %s424_s1 = inlined_call_operand.vmem [shape: f32[1,128], index: 1, kind: input, shape index: {}]   ;;  %s425_s2 = inlined_call_operand.vmem [shape: f32[1,128], index: 2, kind: input, shape index: {}]   ;;  %s426_s3 = inlined_call_operand.vmem [shape: bf16[128,128], index: 3, kind: output, shape index: {}]  }
   0x1   :  { %v14_v0 = vld [vmem:[%s423_s0] sm:$0xff]  ;;  %v15_v1 = vld [vmem:[%s423_s0 + $0x8] sm:$0xff]  ;;  %v16_v6 = vld [vmem:[%s423_s0 + $0x10] sm:$0xff] }
   0x2   :  { %v318_v2 = vld [vmem:[%s424_s1] ss:$0 sm:$0xff]  ;;  %v17_v7 = vld [vmem:[%s423_s0 + $0x18] sm:$0xff]  ;;  %v19_v11 = vld [vmem:[%s423_s0 + $0x28] sm:$0xff] }
   0x3   :  { %v37_v3 = vmul.f32 %v318_v2, %v14_v0  ;;  %v38_v4 = vmul.f32 %v318_v2, %v15_v1  ;;  %v325_v5 = vld [vmem:[%s425_s2] ss:$0 sm:$0xff]  ;;  %v39_v8 = vmul.f32 %v318_v2, %v16_v6  ;;  %v40_v9 = vmul.f32 %v318_v2, %v17_v7  ;;  %v20_v12 = vld [vmem:[%s423_s0 + $0x30] sm:$0xff]  ;;  %v21_v17 = vld [vmem:[%s423_s0 + $0x38] sm:$0xff] }
   0x4   :  { %v18_v10 = vld [vmem:[%s423_s0 + $0x20] sm:$0xff]  ;;  %v42_v16 = vmul.f32 %v318_v2, %v19_v11  ;;  %v43_v20 = vmul.f32 %v318_v2, %v20_v12  ;;  %v44_v21 = vmul.f32 %v318_v2, %v21_v17  ;;  %v23_v35 = vld [vmem:[%s423_s0 + $0x48] sm:$0xff]  ;;  %v24_v36 = vld [vmem:[%s423_s0 + $0x50] sm:$0xff] }
   0x5   :  { %v60_v13 = vadd.f32 %v325_v5, %v37_v3  ;;  %v61_v14 = vadd.f32 %v325_v5, %v38_v4  ;;  %v41_v15 = vmul.f32 %v318_v2, %v18_v10  ;;  %v62_v18 = vadd.f32 %v325_v5, %v39_v8  ;;  %v22_v34 = vld [vmem:[%s423_s0 + $0x40] sm:$0xff]  ;;  %v25_v42 = vld [vmem:[%s423_s0 + $0x58] sm:$0xff]  ;;  %v27_v48 = vld [vmem:[%s423_s0 + $0x68] sm:$0xff] }
   0x6   :  { %v63_v19 = vadd.f32 %v325_v5, %v40_v9  ;;  %v65_v29 = vadd.f32 %v325_v5, %v42_v16  ;;  %v66_v33 = vadd.f32 %v325_v5, %v43_v20  ;;  %v67_v40 = vadd.f32 %v325_v5, %v44_v21  ;;  %v26_v47 = vld [vmem:[%s423_s0 + $0x60] sm:$0xff]  ;;  %v28_v60 = vld [vmem:[%s423_s0 + $0x70] sm:$0xff]  ;;  %v29_v7 = vld [vmem:[%s423_s0 + $0x78] sm:$0xff] }
   0x7   :  { %vm76_vm0 = vcmp.ge.f32.partialorder %v60_v13, 0.0  ;;  %vm77_vm1 = vcmp.ge.f32.partialorder %v61_v14, 0.0  ;;  %v92_v22 = vmul.f32 0.2, %v60_v13  ;;  %v93_v23 = vmul.f32 0.2, %v61_v14 }
   0x8   :  { %vm78_vm2 = vcmp.ge.f32.partialorder %v62_v18, 0.0  ;;  %vm79_vm3 = vcmp.ge.f32.partialorder %v63_v19, 0.0  ;;  %v94_v24 = vmul.f32 0.2, %v62_v18  ;;  %v95_v25 = vmul.f32 0.2, %v63_v19 }
   0x9   :  { %v108_v26 = vsel %vm76_vm0, %v60_v13, %v92_v22  ;;  %v109_v27 = vsel %vm77_vm1, %v61_v14, %v93_v23  ;;  %v64_v28 = vadd.f32 %v325_v5, %v41_v15  ;;  %vm81_vm5 = vcmp.ge.f32.partialorder %v65_v29, 0.0 }
   0xa   :  { %v245_v30 = vpack.c.bf16 %v109_v27, %v108_v26  ;;  %v110_v31 = vsel %vm78_vm2, %v62_v18, %v94_v24  ;;  %v111_v32 = vsel %vm79_vm3, %v63_v19, %v95_v25  ;;  %v97_v39 = vmul.f32 0.2, %v65_v29 }
   0xb   :  { %v250_v37 = vpack.c.bf16 %v111_v32, %v110_v31  ;;  %vm80_vm4 = vcmp.ge.f32.partialorder %v64_v28, 0.0  ;;  %v96_v38 = vmul.f32 0.2, %v64_v28  ;;  %vm82_vm6 = vcmp.ge.f32.partialorder %v66_v33, 0.0 }
   0xc   :  { %246 = vst [vmem:[%s426_s3] sm:$0xff] %v245_v30   ;;  %v98_v41 = vmul.f32 0.2, %v66_v33  ;;  %v45_v44 = vmul.f32 %v318_v2, %v22_v34  ;;  %v46_v45 = vmul.f32 %v318_v2, %v23_v35  ;;  %v47_v46 = vmul.f32 %v318_v2, %v24_v36 }
   0xd   :  { %282 = vst [vmem:[%s426_s3 + $0x8] sm:$0xff] %v250_v37   ;;  %v112_v43 = vsel %vm80_vm4, %v64_v28, %v96_v38  ;;  %v113_v49 = vsel %vm81_vm5, %v65_v29, %v97_v39  ;;  %vm83_vm7 = vcmp.ge.f32.partialorder %v67_v40, 0.0  ;;  %v99_v50 = vmul.f32 0.2, %v67_v40 }
   0xe   :  { %v114_v51 = vsel %vm82_vm6, %v66_v33, %v98_v41  ;;  %v255_v52 = vpack.c.bf16 %v113_v49, %v112_v43  ;;  %v68_v53 = vadd.f32 %v325_v5, %v45_v44  ;;  %v69_v54 = vadd.f32 %v325_v5, %v46_v45 }
   0xf   :  { %v48_v55 = vmul.f32 %v318_v2, %v25_v42  ;;  %v115_v56 = vsel %vm83_vm7, %v67_v40, %v99_v50  ;;  %v70_v57 = vadd.f32 %v325_v5, %v47_v46  ;;  %v49_v58 = vmul.f32 %v318_v2, %v26_v47 }
  0x10   :  { %v50_v59 = vmul.f32 %v318_v2, %v27_v48  ;;  %283 = vst [vmem:[%s426_s3 + $0x10] sm:$0xff] %v255_v52   ;;  %v260_v61 = vpack.c.bf16 %v115_v56, %v114_v51  ;;  %vm84_vm8 = vcmp.ge.f32.partialorder %v68_v53, 0.0  ;;  %vm85_vm9 = vcmp.ge.f32.partialorder %v69_v54, 0.0 }
  0x11   :  { %v100_v62 = vmul.f32 0.2, %v68_v53  ;;  %v101_v63 = vmul.f32 0.2, %v69_v54  ;;  %v71_v0 = vadd.f32 %v325_v5, %v48_v55  ;;  %vm86_vm10 = vcmp.ge.f32.partialorder %v70_v57, 0.0 }
  0x12   :  { %v102_v1 = vmul.f32 0.2, %v70_v57  ;;  %284 = vst [vmem:[%s426_s3 + $0x18] sm:$0xff] %v260_v61   ;;  %v72_v4 = vadd.f32 %v325_v5, %v49_v58  ;;  %v73_v6 = vadd.f32 %v325_v5, %v50_v59  ;;  %v51_v8 = vmul.f32 %v318_v2, %v28_v60 }
  0x13   :  { %v116_v3 = vsel %vm84_vm8, %v68_v53, %v100_v62  ;;  %v117_v9 = vsel %vm85_vm9, %v69_v54, %v101_v63  ;;  %vm87_vm11 = vcmp.ge.f32.partialorder %v71_v0, 0.0  ;;  %v103_v10 = vmul.f32 0.2, %v71_v0 }
  0x14   :  { %v118_v11 = vsel %vm86_vm10, %v70_v57, %v102_v1  ;;  %v265_v12 = vpack.c.bf16 %v117_v9, %v116_v3  ;;  %vm88_vm12 = vcmp.ge.f32.partialorder %v72_v4, 0.0  ;;  %vm89_vm13 = vcmp.ge.f32.partialorder %v73_v6, 0.0 }
  0x15   :  { %v104_v13 = vmul.f32 0.2, %v72_v4  ;;  %v119_v14 = vsel %vm87_vm11, %v71_v0, %v103_v10  ;;  %v105_v15 = vmul.f32 0.2, %v73_v6  ;;  %v52_v16 = vmul.f32 %v318_v2, %v29_v7 }
  0x16   :  { %v74_v17 = vadd.f32 %v325_v5, %v51_v8  ;;  %285 = vst [vmem:[%s426_s3 + $0x20] sm:$0xff] %v265_v12   ;;  %v270_v18 = vpack.c.bf16 %v119_v14, %v118_v11 }
  0x17   :  { %v120_v19 = vsel %vm88_vm12, %v72_v4, %v104_v13  ;;  %v121_v20 = vsel %vm89_vm13, %v73_v6, %v105_v15  ;;  %v75_v21 = vadd.f32 %v325_v5, %v52_v16 }
  0x18   :  { %vm90_vm14 = vcmp.ge.f32.partialorder %v74_v17, 0.0  ;;  %v106_v22 = vmul.f32 0.2, %v74_v17  ;;  %286 = vst [vmem:[%s426_s3 + $0x28] sm:$0xff] %v270_v18   ;;  %v275_v23 = vpack.c.bf16 %v121_v20, %v120_v19 }
  0x19   :  { %vm91_vm15 = vcmp.ge.f32.partialorder %v75_v21, 0.0  ;;  %v107_v2 = vmul.f32 0.2, %v75_v21 }
  0x1a   :  { %v122_v24 = vsel %vm90_vm14, %v74_v17, %v106_v22  ;;  %287 = vst [vmem:[%s426_s3 + $0x30] sm:$0xff] %v275_v23  }
  0x1b   :  { %v123_v25 = vsel %vm91_vm15, %v75_v21, %v107_v2 }
  0x1c   :  { %v280_v26 = vpack.c.bf16 %v123_v25, %v122_v24 }
  0x1e   :  { %288 = vst [vmem:[%s426_s3 + $0x38] sm:$0xff] %v280_v26  }

// kernel: discriminator_forward.12
= control target key start
LH: loop header
LB: loop body
LE: loop exit
PB: predicated region body
PF: predicated region fallthrough
CT: control target
= control target key end

     0   :  { %v608_v40 = vmov 0.0   ;;  %s784_s1 = inlined_call_operand.vmem [shape: bf16[512,128], index: 1, kind: input, shape index: {}]   ;;  %s785_s0 = inlined_call_operand.vmem [shape: bf16[32,512], index: 0, kind: input, shape index: {}]   ;;  %s786_s3 = inlined_call_operand.vmem [shape: f32[1,128], index: 3, kind: output, shape index: {1}]   ;;  %s787_s4 = inlined_call_operand.vmem [shape: f32[1,128], index: 4, kind: output, shape index: {2}]   ;;  %s788_s2 = inlined_call_operand.vmem [shape: f32[32,128], index: 2, kind: output, shape index: {0}]  }
   0x1   :  { %v564_v0 = vld [vmem:[%s784_s1 + $0x40] sm:$0xff]   ;;  %v568_v4 = vld [vmem:[%s784_s1 + $0x48] sm:$0xff]   ;;  %v572_v8 = vld [vmem:[%s784_s1 + $0x50] sm:$0xff]   ;;  %19 = vst [vmem:[%s786_s3] sm:$0x1] %v608_v40 }
   0x2   :  { %v565_v1 = vld [vmem:[%s784_s1 + $0xc0] sm:$0xff]   ;;  %507 = vmatprep.subr.bf16.mxu0 %v564_v0  ;;  %v569_v5 = vld [vmem:[%s784_s1 + $0xc8] sm:$0xff]   ;;  %v573_v9 = vld [vmem:[%s784_s1 + $0xd0] sm:$0xff]   ;;  %20 = vst [vmem:[%s787_s4] sm:$0x1] %v608_v40 }
   0x3   :  { %v566_v2 = vld [vmem:[%s784_s1] sm:$0xff]   ;;  %535 = vmatprep.subr.bf16.mxu1 %v565_v1  ;;  %v570_v6 = vld [vmem:[%s784_s1 + $0x8] sm:$0xff]   ;;  %v574_v10 = vld [vmem:[%s784_s1 + $0x10] sm:$0xff]  }
   0x4   :  { %v567_v3 = vld [vmem:[%s784_s1 + $0x80] sm:$0xff]   ;;  %508 = vmatpush3.bf16.msra.mxu0 %v566_v2  ;;  %v571_v7 = vld [vmem:[%s784_s1 + $0x88] sm:$0xff]   ;;  %v575_v11 = vld [vmem:[%s784_s1 + $0x90] sm:$0xff]  }
   0x5   :  { %536 = vmatpush3.bf16.msra.mxu1 %v567_v3  ;;  %509 = vmatprep.subr.bf16.mxu0 %v568_v4  ;;  %v576_v12 = vld [vmem:[%s784_s1 + $0x58] sm:$0xff]   ;;  %v580_v16 = vld [vmem:[%s784_s1 + $0x60] sm:$0xff]   ;;  %v584_v20 = vld [vmem:[%s784_s1 + $0x68] sm:$0xff]  }
   0x6   :  { %537 = vmatprep.subr.bf16.mxu1 %v569_v5  ;;  %v577_v13 = vld [vmem:[%s784_s1 + $0xd8] sm:$0xff]   ;;  %v581_v17 = vld [vmem:[%s784_s1 + $0xe0] sm:$0xff]   ;;  %v585_v21 = vld [vmem:[%s784_s1 + $0xe8] sm:$0xff]  }
   0x7   :  { %v578_v14 = vld [vmem:[%s784_s1 + $0x18] sm:$0xff]   ;;  %v582_v18 = vld [vmem:[%s784_s1 + $0x20] sm:$0xff]   ;;  %v586_v22 = vld [vmem:[%s784_s1 + $0x28] sm:$0xff]  }
   0x8   :  { %510 = vmatpush3.bf16.msra.mxu0 %v570_v6  ;;  %v579_v15 = vld [vmem:[%s784_s1 + $0x98] sm:$0xff]   ;;  %v583_v19 = vld [vmem:[%s784_s1 + $0xa0] sm:$0xff]   ;;  %v587_v23 = vld [vmem:[%s784_s1 + $0xa8] sm:$0xff]  }
   0x9   :  { %538 = vmatpush3.bf16.msra.mxu1 %v571_v7  ;;  %511 = vmatprep.subr.bf16.mxu0 %v572_v8  ;;  %v588_v24 = vld [vmem:[%s784_s1 + $0x70] sm:$0xff]   ;;  %v592_v28 = vld [vmem:[%s784_s1 + $0x78] sm:$0xff]  }
   0xa   :  { %539 = vmatprep.subr.bf16.mxu1 %v573_v9  ;;  %v589_v25 = vld [vmem:[%s784_s1 + $0xf0] sm:$0xff]   ;;  %v593_v29 = vld [vmem:[%s784_s1 + $0xf8] sm:$0xff]  }
   0xb   :  { %v590_v26 = vld [vmem:[%s784_s1 + $0x30] sm:$0xff]   ;;  %v594_v30 = vld [vmem:[%s784_s1 + $0x38] sm:$0xff]  }
   0xc   :  { %512 = vmatpush3.bf16.msra.mxu0 %v574_v10  ;;  %v591_v27 = vld [vmem:[%s784_s1 + $0xb0] sm:$0xff]   ;;  %v595_v31 = vld [vmem:[%s784_s1 + $0xb8] sm:$0xff]  }
   0xd   :  { %540 = vmatpush3.bf16.msra.mxu1 %v575_v11  ;;  %513 = vmatprep.subr.bf16.mxu0 %v576_v12  ;;  %v596_v32 = vld [vmem:[%s785_s0] ss:$16 sps:$4 sm:$0xff]   ;;  %v598_v33 = vld [vmem:[%s785_s0 + $0x4] ss:$16 sps:$4 sm:$0xff]   ;;  %v599_v34 = vld [vmem:[%s785_s0 + $0x8] ss:$16 sps:$4 sm:$0xff]  }
   0xe   :  { %541 = vmatprep.subr.bf16.mxu1 %v577_v13  ;;  %v601_v35 = vld [vmem:[%s785_s0 + $0xc] ss:$16 sps:$4 sm:$0xff]   ;;  %357 = vmatprep.mubr.bf16.mxu0 %v598_v33  ;;  %v602_v36 = vld [vmem:[%s785_s0 + $0x24] ss:$16 sps:$4 sm:$0xff]   ;;  %v606_v38 = vld [vmem:[%s785_s0 + $0x20] ss:$16 sps:$4 sm:$0xff]  }
   0xf   :  { %406 = vmatprep.mubr.bf16.mxu1 %v601_v35  ;;  %v604_v37 = vld [vmem:[%s785_s0 + $0x2c] ss:$16 sps:$4 sm:$0xff]   ;;  %v607_v39 = vld [vmem:[%s785_s0 + $0x28] ss:$16 sps:$4 sm:$0xff]  }
  0x10   :  { %514 = vmatpush3.bf16.msra.mxu0 %v578_v14 }
  0x11   :  { %542 = vmatpush3.bf16.msra.mxu1 %v579_v15  ;;  %515 = vmatprep.subr.bf16.mxu0 %v580_v16 }
  0x12   :  { %543 = vmatprep.subr.bf16.mxu1 %v581_v17 }
  0x14   :  { %516 = vmatpush3.bf16.msra.mxu0 %v582_v18 }
  0x15   :  { %544 = vmatpush3.bf16.msra.mxu1 %v583_v19  ;;  %517 = vmatprep.subr.bf16.mxu0 %v584_v20 }
  0x16   :  { %545 = vmatprep.subr.bf16.mxu1 %v585_v21 }
  0x18   :  { %518 = vmatpush3.bf16.msra.mxu0 %v586_v22 }
  0x19   :  { %546 = vmatpush3.bf16.msra.mxu1 %v587_v23  ;;  %519 = vmatprep.subr.bf16.mxu0 %v588_v24  ;;  %v427_v24 = vld [vmem:[%s786_s3] sm:$0x1] }
  0x1a   :  { %547 = vmatprep.subr.bf16.mxu1 %v589_v25 }
  0x1c   :  { %520 = vmatpush3.bf16.msra.mxu0 %v590_v26 }
  0x1d   :  { %548 = vmatpush3.bf16.msra.mxu1 %v591_v27  ;;  %521 = vmatprep.subr.bf16.mxu0 %v592_v28  ;;  %v439_v27 = vld [vmem:[%s787_s4] sm:$0x1] }
  0x1e   :  { %549 = vmatprep.subr.bf16.mxu1 %v593_v29 }
  0x20   :  { %522 = vmatpush3.bf16.msra.mxu0 %v594_v30 }
  0x21   :  { %550 = vmatpush3.bf16.msra.mxu1 %v595_v31 }
  0x23   :  { %358 = vmatmul.mubr.bf16.vlgmr.msra.gmra.mrb[0].mxu0 %v596_v32 }
  0x24   :  { %407 = vmatmul.mubr.bf16.vlgmr.msra.gmra.mrb[0].mxu1 %v599_v34  ;;  %365 = vmatprep.mubr.bf16.mxu0 %v602_v36 }
  0x25   :  { %414 = vmatprep.mubr.bf16.mxu1 %v604_v37 }
  0x2b   :  { %366 = vmatmul.mubr.bf16.gmra.mrb[4].mxu0 %v606_v38 }
  0x2c   :  { %415 = vmatmul.mubr.bf16.gmra.mrb[4].mxu1 %v607_v39 }
  0xf6   :  { %v523_v41 = vpop.f32.mrb[0].mxu0 }
  0xf7   :  { %v551_v42 = vpop.f32.mrb[0].mxu1  ;;  %v524_v43 = vpop.f32.mrb[1].mxu0 }
  0xf8   :  { %v525_v44 = vadd.f32 %v524_v43, %v523_v41  ;;  %v552_v45 = vpop.f32.mrb[1].mxu1  ;;  %v526_v46 = vpop.f32.mrb[2].mxu0 }
  0xf9   :  { %v553_v47 = vadd.f32 %v552_v45, %v551_v42  ;;  %v554_v48 = vpop.f32.mrb[2].mxu1  ;;  %v527_v49 = vpop.f32.mrb[3].mxu0 }
  0xfa   :  { %v528_v50 = vadd.f32 %v527_v49, %v526_v46  ;;  %v555_v51 = vpop.f32.mrb[3].mxu1 }
  0xfb   :  { %v409_v52 = vadd.f32 %v553_v47, %v525_v44  ;;  %v556_v53 = vadd.f32 %v555_v51, %v554_v48 }
  0xfd   :  { %423 = vst [vmem:[%s788_s2] sm:$0xff] %v409_v52  ;;  %v412_v54 = vadd.f32 %v556_v53, %v528_v50  ;;  %v440_v56 = vmul.f32 %v409_v52, %v409_v52 }
  0xfe   :  { %v529_v55 = vpop.f32.mrb[4].mxu0 }
  0xff   :  { %424 = vst [vmem:[%s788_s2 + $0x8] sm:$0xff] %v412_v54  ;;  %v428_v57 = vadd.f32 %v412_v54, %v409_v52  ;;  %v441_v58 = vmul.f32 %v412_v54, %v412_v54  ;;  %v557_v59 = vpop.f32.mrb[4].mxu1  ;;  %v530_v60 = vpop.f32.mrb[5].mxu0 }
 0x100   :  { %v531_v61 = vadd.f32 %v530_v60, %v529_v55  ;;  %v558_v62 = vpop.f32.mrb[5].mxu1  ;;  %v532_v63 = vpop.f32.mrb[6].mxu0 }
 0x101   :  { %v444_v0 = vadd.f32 %v441_v58, %v440_v56  ;;  %v559_v1 = vadd.f32 %v558_v62, %v557_v59  ;;  %v560_v2 = vpop.f32.mrb[6].mxu1  ;;  %v533_v3 = vpop.f32.mrb[7].mxu0 }
 0x102   :  { %v534_v4 = vadd.f32 %v533_v3, %v532_v63  ;;  %v561_v5 = vpop.f32.mrb[7].mxu1 }
 0x103   :  { %v417_v6 = vadd.f32 %v559_v1, %v531_v61  ;;  %v562_v7 = vadd.f32 %v561_v5, %v560_v2 }
 0x105   :  { %425 = vst [vmem:[%s788_s2 + $0x10] sm:$0xff] %v417_v6  ;;  %v429_v8 = vadd.f32 %v428_v57, %v417_v6  ;;  %v442_v9 = vmul.f32 %v417_v6, %v417_v6  ;;  %v420_v10 = vadd.f32 %v562_v7, %v534_v4 }
 0x107   :  { %v445_v11 = vadd.f32 %v444_v0, %v442_v9  ;;  %426 = vst [vmem:[%s788_s2 + $0x18] sm:$0xff] %v420_v10  ;;  %v430_v12 = vadd.f32 %v429_v8, %v420_v10  ;;  %v443_v13 = vmul.f32 %v420_v10, %v420_v10 }
 0x109   :  { %v431_v14 = vrot.slane %v430_v12, 4  ;;  %v446_v15 = vadd.f32 %v445_v11, %v443_v13 }
 0x10b   :  { %v432_v16 = vadd.f32 %v431_v14, %v430_v12  ;;  %v447_v17 = vrot.slane %v446_v15, 4 }
 0x10d   :  { %v433_v18 = vrot.slane %v432_v16, 2  ;;  %v448_v19 = vadd.f32 %v447_v17, %v446_v15 }
 0x10f   :  { %v434_v20 = vadd.f32 %v433_v18, %v432_v16  ;;  %v449_v21 = vrot.slane %v448_v19, 2 }
 0x111   :  { %v435_v22 = vrot.slane %v434_v20, 1  ;;  %v450_v23 = vadd.f32 %v449_v21, %v448_v19 }
 0x113   :  { %v436_v25 = vadd.f32 %v435_v22, %v434_v20  ;;  %v451_v26 = vrot.slane %v450_v23, 1 }
 0x115   :  { %v437_v28 = vadd.f32 %v436_v25, %v427_v24  ;;  %v452_v29 = vadd.f32 %v451_v26, %v450_v23 }
 0x117   :  { %438 = vst [vmem:[%s786_s3] sm:$0x1] %v437_v28  ;;  %v453_v30 = vadd.f32 %v452_v29, %v439_v27 }
 0x119   :  { %454 = vst [vmem:[%s787_s4] sm:$0x1] %v453_v30 }

// kernel: discriminator_forward.13
= control target key start
LH: loop header
LB: loop body
LE: loop exit
PB: predicated region body
PF: predicated region fallthrough
CT: control target
= control target key end

     0   :  { %v22_v19 = vlaneseq  ;;  %v1130_v27 = vmov 1983009808   ;;  %s1388_s3 = inlined_call_operand.vmem [shape: bf16[1024,128], index: 3, kind: input, shape index: {}]   ;;  %s1389_s1 = inlined_call_operand.vmem [shape: f32[1,1024], index: 1, kind: input, shape index: {}]   ;;  %s1390_s2 = inlined_call_operand.vmem [shape: f32[1,1024], index: 2, kind: input, shape index: {}]   ;;  %s1391_s0 = inlined_call_operand.vmem [shape: f32[2,1024], index: 0, kind: input, shape index: {}]   ;;  %s1392_s4 = inlined_call_operand.vmem [shape: f32[2,128], index: 4, kind: output, shape index: {}]  }
   0x1   :  { %v1062_v0 = vld [vmem:[%s1388_s3 + $0x40] sm:$0xff]   ;;  %v1066_v4 = vld [vmem:[%s1388_s3 + $0x48] sm:$0xff]   ;;  %v1070_v8 = vld [vmem:[%s1388_s3 + $0x50] sm:$0xff]   ;;  %v57_v28 = vunpack.c.l.s4 %v1130_v27 }
   0x2   :  { %v1063_v1 = vld [vmem:[%s1388_s3 + $0xc0] sm:$0xff]   ;;  %973 = vmatprep.subr.bf16.mxu0 %v1062_v0  ;;  %v1067_v5 = vld [vmem:[%s1388_s3 + $0xc8] sm:$0xff]   ;;  %v1071_v9 = vld [vmem:[%s1388_s3 + $0xd0] sm:$0xff]   ;;  %v1225_v24 = vshrl.u32 %v22_v19, 7 }
   0x3   :  { %v1064_v2 = vld [vmem:[%s1388_s3] sm:$0xff]   ;;  %995 = vmatprep.subr.bf16.mxu1 %v1063_v1  ;;  %v1068_v6 = vld [vmem:[%s1388_s3 + $0x8] sm:$0xff]   ;;  %v1072_v10 = vld [vmem:[%s1388_s3 + $0x10] sm:$0xff]   ;;  %v58_v36 = vunpack.c.0.s8 %v57_v28 }
   0x4   :  { %v1065_v3 = vld [vmem:[%s1388_s3 + $0x80] sm:$0xff]   ;;  %974 = vmatpush3.bf16.msra.mxu0 %v1064_v2  ;;  %v1069_v7 = vld [vmem:[%s1388_s3 + $0x88] sm:$0xff]   ;;  %v1073_v11 = vld [vmem:[%s1388_s3 + $0x90] sm:$0xff]   ;;  %v24_v31 = vsub.s32 0, %v1225_v24  ;;  %v28_v33 = vsub.s32 1, %v1225_v24  ;;  %v32_v35 = vsub.s32 2, %v1225_v24 }
   0x5   :  { %996 = vmatpush3.bf16.msra.mxu1 %v1065_v3  ;;  %975 = vmatprep.subr.bf16.mxu0 %v1066_v4  ;;  %v1074_v12 = vld [vmem:[%s1388_s3 + $0x58] sm:$0xff]   ;;  %v1078_v16 = vld [vmem:[%s1388_s3 + $0x60] sm:$0xff]   ;;  %v1082_v21 = vld [vmem:[%s1388_s3 + $0x68] sm:$0xff]   ;;  %v36_v38 = vsub.s32 3, %v1225_v24  ;;  %v1262_v42 = vsub.s32 %v58_v36, %v1225_v24  ;;  %v40_v43 = vsub.s32 4, %v1225_v24  ;;  %v44_v44 = vsub.s32 5, %v1225_v24 }
   0x6   :  { %997 = vmatprep.subr.bf16.mxu1 %v1067_v5  ;;  %v1075_v13 = vld [vmem:[%s1388_s3 + $0xd8] sm:$0xff]   ;;  %v1079_v17 = vld [vmem:[%s1388_s3 + $0xe0] sm:$0xff]   ;;  %v1083_v22 = vld [vmem:[%s1388_s3 + $0xe8] sm:$0xff]   ;;  %v48_v45 = vsub.s32 6, %v1225_v24  ;;  %v52_v59 = vsub.s32 7, %v1225_v24 }
   0x7   :  { %v1076_v14 = vld [vmem:[%s1388_s3 + $0x18] sm:$0xff]   ;;  %v1080_v18 = vld [vmem:[%s1388_s3 + $0x20] sm:$0xff]   ;;  %v1084_v23 = vld [vmem:[%s1388_s3 + $0x28] sm:$0xff]  }
   0x8   :  { %976 = vmatpush3.bf16.msra.mxu0 %v1068_v6  ;;  %v1077_v15 = vld [vmem:[%s1388_s3 + $0x98] sm:$0xff]   ;;  %v1081_v20 = vld [vmem:[%s1388_s3 + $0xa0] sm:$0xff]   ;;  %v1085_v25 = vld [vmem:[%s1388_s3 + $0xa8] sm:$0xff]  }
   0x9   :  { %998 = vmatpush3.bf16.msra.mxu1 %v1069_v7  ;;  %977 = vmatprep.subr.bf16.mxu0 %v1070_v8  ;;  %v1086_v26 = vld [vmem:[%s1388_s3 + $0x70] sm:$0xff]   ;;  %v1090_v34 = vld [vmem:[%s1388_s3 + $0x78] sm:$0xff]   ;;  %v20_v41 = vld [vmem:[%s1389_s1] sm:$0xff] }
   0xa   :  { %999 = vmatprep.subr.bf16.mxu1 %v1071_v9  ;;  %v1087_v29 = vld [vmem:[%s1388_s3 + $0xf0] sm:$0xff]   ;;  %v1091_v37 = vld [vmem:[%s1388_s3 + $0xf8] sm:$0xff]   ;;  %v25_v46 = vrot.slane %v20_v41, %v24_v31  ;;  %v29_v47 = vrot.slane %v20_v41, %v28_v33  ;;  %v33_v48 = vrot.slane %v20_v41, %v32_v35  ;;  %v37_v49 = vrot.slane %v20_v41, %v36_v38  ;;  %v92_v50 = vld [vmem:[%s1390_s2] sm:$0xff] }
   0xb   :  { %v1088_v30 = vld [vmem:[%s1388_s3 + $0x30] sm:$0xff]   ;;  %v1092_v39 = vld [vmem:[%s1388_s3 + $0x38] sm:$0xff]   ;;  %v97_v51 = vrot.slane %v92_v50, %v24_v31  ;;  %v101_v52 = vrot.slane %v92_v50, %v28_v33  ;;  %v105_v53 = vrot.slane %v92_v50, %v32_v35  ;;  %v109_v54 = vrot.slane %v92_v50, %v36_v38  ;;  %v1094_v55 = vld [vmem:[%s1388_s3 + $0x140] sm:$0xff]  }
   0xc   :  { %978 = vmatpush3.bf16.msra.mxu0 %v1072_v10  ;;  %v1089_v32 = vld [vmem:[%s1388_s3 + $0xb0] sm:$0xff]   ;;  %v1093_v40 = vld [vmem:[%s1388_s3 + $0xb8] sm:$0xff]   ;;  %v54_v56 = vcombine.low %v25_v46, %v29_v47  ;;  %v55_v57 = vcombine.low %v33_v48, %v37_v49  ;;  %v1095_v58 = vld [vmem:[%s1388_s3 + $0x1c0] sm:$0xff]   ;;  %v41_v3 = vrot.slane %v20_v41, %v40_v43  ;;  %v45_v5 = vrot.slane %v20_v41, %v44_v44 }
   0xd   :  { %1000 = vmatpush3.bf16.msra.mxu1 %v1073_v11  ;;  %979 = vmatprep.subr.bf16.mxu0 %v1074_v12  ;;  %v126_v60 = vcombine.low %v97_v51, %v101_v52  ;;  %v127_v61 = vcombine.low %v105_v53, %v109_v54  ;;  %v18_v0 = vld [vmem:[%s1391_s0] sm:$0xff]  ;;  %v49_v6 = vrot.slane %v20_v41, %v48_v45  ;;  %v19_v27 = vld [vmem:[%s1391_s0 + $0x8] sm:$0xff]  ;;  %v1103_v46 = vld [vmem:[%s1388_s3 + $0x1d0] sm:$0xff]  }
   0xe   :  { %1001 = vmatprep.subr.bf16.mxu1 %v1075_v13  ;;  %v62_v62 = vrot.slane %v54_v56, %v1262_v42  ;;  %v69_v63 = vrot.slane %v55_v57, %v1262_v42  ;;  %v53_v7 = vrot.slane %v20_v41, %v52_v59  ;;  %v71_v11 = vcombine.low %v41_v3, %v45_v5  ;;  %v1098_v36 = vld [vmem:[%s1388_s3 + $0x148] sm:$0xff]   ;;  %v1097_v38 = vld [vmem:[%s1388_s3 + $0x180] sm:$0xff]   ;;  %v1104_v47 = vld [vmem:[%s1388_s3 + $0x110] sm:$0xff]  }
   0xf   :  { %v134_v1 = vrot.slane %v126_v60, %v1262_v42  ;;  %v141_v2 = vrot.slane %v127_v61, %v1262_v42  ;;  %v113_v13 = vrot.slane %v92_v50, %v40_v43  ;;  %v1106_v49 = vld [vmem:[%s1388_s3 + $0x158] sm:$0xff]   ;;  %v1110_v53 = vld [vmem:[%s1388_s3 + $0x160] sm:$0xff]   ;;  %v1114_v61 = vld [vmem:[%s1388_s3 + $0x168] sm:$0xff]  }
  0x10   :  { %980 = vmatpush3.bf16.msra.mxu0 %v1076_v14  ;;  %v70_v4 = vcombine.low %v62_v62, %v69_v63  ;;  %v72_v12 = vcombine.low %v49_v6, %v53_v7  ;;  %v117_v14 = vrot.slane %v92_v50, %v44_v44  ;;  %v79_v19 = vrot.slane %v71_v11, %v1262_v42  ;;  %v1102_v44 = vld [vmem:[%s1388_s3 + $0x150] sm:$0xff]   ;;  %v1107_v51 = vld [vmem:[%s1388_s3 + $0x1d8] sm:$0xff]   ;;  %v1111_v56 = vld [vmem:[%s1388_s3 + $0x1e0] sm:$0xff]  }
  0x11   :  { %1002 = vmatpush3.bf16.msra.mxu1 %v1077_v15  ;;  %981 = vmatprep.subr.bf16.mxu0 %v1078_v16  ;;  %v142_v8 = vcombine.low %v134_v1, %v141_v2  ;;  %v121_v15 = vrot.slane %v92_v50, %v48_v45  ;;  %v125_v16 = vrot.slane %v92_v50, %v52_v59  ;;  %v1101_v45 = vld [vmem:[%s1388_s3 + $0x188] sm:$0xff]   ;;  %v1105_v50 = vld [vmem:[%s1388_s3 + $0x190] sm:$0xff]   ;;  %v1108_v52 = vld [vmem:[%s1388_s3 + $0x118] sm:$0xff]  }
  0x12   :  { %1003 = vmatprep.subr.bf16.mxu1 %v1079_v17  ;;  %v90_v9 = vmul.f32 %v70_v4, %v18_v0  ;;  %v1113_v62 = vld [vmem:[%s1388_s3 + $0x1a0] sm:$0xff]   ;;  %v1115_v1 = vld [vmem:[%s1388_s3 + $0x1e8] sm:$0xff]   ;;  %v1118_v5 = vld [vmem:[%s1388_s3 + $0x170] sm:$0xff]  }
  0x13   :  { %v144_v24 = vcombine.low %v121_v15, %v125_v16  ;;  %v1116_v2 = vld [vmem:[%s1388_s3 + $0x128] sm:$0xff]   ;;  %v1119_v7 = vld [vmem:[%s1388_s3 + $0x1f0] sm:$0xff]   ;;  %v1123_v11 = vld [vmem:[%s1388_s3 + $0x1f8] sm:$0xff]  }
  0x14   :  { %982 = vmatpush3.bf16.msra.mxu0 %v1080_v18  ;;  %v162_v10 = vadd.f32 %v142_v8, %v90_v9  ;;  %v1120_v8 = vld [vmem:[%s1388_s3 + $0x130] sm:$0xff]   ;;  %v1122_v9 = vld [vmem:[%s1388_s3 + $0x178] sm:$0xff]  }
  0x15   :  { %1004 = vmatpush3.bf16.msra.mxu1 %v1081_v20  ;;  %983 = vmatprep.subr.bf16.mxu0 %v1082_v21  ;;  %v86_v20 = vrot.slane %v72_v12, %v1262_v42  ;;  %v1124_v12 = vld [vmem:[%s1388_s3 + $0x138] sm:$0xff]  }
  0x16   :  { %1005 = vmatprep.subr.bf16.mxu1 %v1083_v22  ;;  %vm164_vm0 = vcmp.ge.f32.partialorder %v162_v10, 0.0  ;;  %v166_v17 = vmul.f32 0.2, %v162_v10 }
  0x18   :  { %984 = vmatpush3.bf16.msra.mxu0 %v1084_v23  ;;  %v168_v18 = vsel %vm164_vm0, %v162_v10, %v166_v17  ;;  %v143_v23 = vcombine.low %v113_v13, %v117_v14  ;;  %v1121_v10 = vld [vmem:[%s1388_s3 + $0x1b0] sm:$0xff]   ;;  %v1125_v13 = vld [vmem:[%s1388_s3 + $0x1b8] sm:$0xff]  }
  0x19   :  { %1006 = vmatpush3.bf16.msra.mxu1 %v1085_v25  ;;  %985 = vmatprep.subr.bf16.mxu0 %v1086_v26  ;;  %v179_v21 = vrot.slane %v168_v18, %v1262_v42  ;;  %v172_v22 = vcombine.high %v168_v18, %v168_v18 }
  0x1a   :  { %1007 = vmatprep.subr.bf16.mxu1 %v1087_v29  ;;  %v87_v29 = vcombine.low %v79_v19, %v86_v20  ;;  %v151_v33 = vrot.slane %v143_v23, %v1262_v42 }
  0x1b   :  { %v187_v25 = vcombine.high %v179_v21, %v179_v21  ;;  %v186_v26 = vrot.slane %v172_v22, %v1262_v42  ;;  %v214_v28 = vpack.c.bf16 %v179_v21, %v179_v21 }
  0x1c   :  { %986 = vmatpush3.bf16.msra.mxu0 %v1088_v30  ;;  %v91_v41 = vmul.f32 %v87_v29, %v19_v27 }
  0x1d   :  { %1008 = vmatpush3.bf16.msra.mxu1 %v1089_v32  ;;  %987 = vmatprep.subr.bf16.mxu0 %v1090_v34  ;;  %v215_v30 = vpack.c.bf16 %v187_v25, %v187_v25  ;;  %v188_v31 = vcombine.high %v186_v26, %v186_v26  ;;  %v1096_v32 = vld [vmem:[%s1388_s3 + $0x100] sm:$0xff]   ;;  %v158_v34 = vrot.slane %v144_v24, %v1262_v42 }
  0x1e   :  { %1009 = vmatprep.subr.bf16.mxu1 %v1091_v37  ;;  %v216_v35 = vpack.c.bf16 %v186_v26, %v186_v26 }
  0x1f   :  { %766 = vmatprep.mubr.bf16.mxu0 %v215_v30  ;;  %v217_v37 = vpack.c.bf16 %v188_v31, %v188_v31  ;;  %v159_v43 = vcombine.low %v151_v33, %v158_v34 }
  0x20   :  { %988 = vmatpush3.bf16.msra.mxu0 %v1092_v39  ;;  %v1099_v39 = vld [vmem:[%s1388_s3 + $0x1c8] sm:$0xff]  }
  0x21   :  { %1010 = vmatpush3.bf16.msra.mxu1 %v1093_v40  ;;  %1017 = vmatprep.subr.bf16.mxu0 %v1094_v55  ;;  %v1100_v40 = vld [vmem:[%s1388_s3 + $0x108] sm:$0xff]   ;;  %v163_v48 = vadd.f32 %v159_v43, %v91_v41  ;;  %v1109_v55 = vld [vmem:[%s1388_s3 + $0x198] sm:$0xff]  }
  0x22   :  { %1039 = vmatprep.subr.bf16.mxu1 %v1095_v58  ;;  %806 = vmatprep.mubr.bf16.mxu1 %v217_v37  ;;  %v1112_v58 = vld [vmem:[%s1388_s3 + $0x120] sm:$0xff]  }
  0x23   :  { %767 = vmatmul.mubr.bf16.vlgmr.msra.gmra.mrb[0].mxu0 %v214_v28  ;;  %vm165_vm1 = vcmp.ge.f32.partialorder %v163_v48, 0.0  ;;  %v167_v54 = vmul.f32 0.2, %v163_v48 }
  0x24   :  { %1018 = vmatpush3.bf16.msra.mxu0 %v1096_v32  ;;  %807 = vmatmul.mubr.bf16.vlgmr.msra.gmra.mrb[0].mxu1 %v216_v35 }
  0x25   :  { %1019 = vmatprep.subr.bf16.mxu0 %v1098_v36  ;;  %1040 = vmatpush3.bf16.msra.mxu1 %v1097_v38  ;;  %v169_v57 = vsel %vm165_vm1, %v163_v48, %v167_v54 }
  0x26   :  { %1041 = vmatprep.subr.bf16.mxu1 %v1099_v39  ;;  %v196_v59 = vrot.slane %v169_v57, %v1262_v42  ;;  %v189_v60 = vcombine.high %v169_v57, %v169_v57 }
  0x28   :  { %1020 = vmatpush3.bf16.msra.mxu0 %v1100_v40  ;;  %v204_v63 = vcombine.high %v196_v59, %v196_v59  ;;  %v203_v0 = vrot.slane %v189_v60, %v1262_v42  ;;  %v1117_v42 = vld [vmem:[%s1388_s3 + $0x1a8] sm:$0xff]   ;;  %v218_v14 = vpack.c.bf16 %v196_v59, %v196_v59 }
  0x29   :  { %1021 = vmatprep.subr.bf16.mxu0 %v1102_v44  ;;  %1042 = vmatpush3.bf16.msra.mxu1 %v1101_v45 }
  0x2a   :  { %1043 = vmatprep.subr.bf16.mxu1 %v1103_v46  ;;  %v219_v3 = vpack.c.bf16 %v204_v63, %v204_v63  ;;  %v205_v4 = vcombine.high %v203_v0, %v203_v0  ;;  %v220_v15 = vpack.c.bf16 %v203_v0, %v203_v0 }
  0x2c   :  { %1022 = vmatpush3.bf16.msra.mxu0 %v1104_v47  ;;  %846 = vmatprep.mubr.bf16.mxu0 %v219_v3  ;;  %v221_v6 = vpack.c.bf16 %v205_v4, %v205_v4 }
  0x2d   :  { %1023 = vmatprep.subr.bf16.mxu0 %v1106_v49  ;;  %1044 = vmatpush3.bf16.msra.mxu1 %v1105_v50 }
  0x2e   :  { %1045 = vmatprep.subr.bf16.mxu1 %v1107_v51  ;;  %886 = vmatprep.mubr.bf16.mxu1 %v221_v6 }
  0x30   :  { %1024 = vmatpush3.bf16.msra.mxu0 %v1108_v52 }
  0x31   :  { %1025 = vmatprep.subr.bf16.mxu0 %v1110_v53  ;;  %1046 = vmatpush3.bf16.msra.mxu1 %v1109_v55 }
  0x32   :  { %1047 = vmatprep.subr.bf16.mxu1 %v1111_v56 }
  0x34   :  { %1026 = vmatpush3.bf16.msra.mxu0 %v1112_v58 }
  0x35   :  { %1027 = vmatprep.subr.bf16.mxu0 %v1114_v61  ;;  %1048 = vmatpush3.bf16.msra.mxu1 %v1113_v62 }
  0x36   :  { %1049 = vmatprep.subr.bf16.mxu1 %v1115_v1 }
  0x38   :  { %1028 = vmatpush3.bf16.msra.mxu0 %v1116_v2 }
  0x39   :  { %1029 = vmatprep.subr.bf16.mxu0 %v1118_v5  ;;  %1050 = vmatpush3.bf16.msra.mxu1 %v1117_v42 }
  0x3a   :  { %1051 = vmatprep.subr.bf16.mxu1 %v1119_v7 }
  0x3c   :  { %1030 = vmatpush3.bf16.msra.mxu0 %v1120_v8 }
  0x3d   :  { %1031 = vmatprep.subr.bf16.mxu0 %v1122_v9  ;;  %1052 = vmatpush3.bf16.msra.mxu1 %v1121_v10 }
  0x3e   :  { %1053 = vmatprep.subr.bf16.mxu1 %v1123_v11 }
  0x40   :  { %1032 = vmatpush3.bf16.msra.mxu0 %v1124_v12 }
  0x41   :  { %1054 = vmatpush3.bf16.msra.mxu1 %v1125_v13 }
  0x43   :  { %847 = vmatmul.mubr.bf16.vlgmr.msra.gmra.mrb[4].mxu0 %v218_v14 }
  0x44   :  { %887 = vmatmul.mubr.bf16.vlgmr.msra.gmra.mrb[4].mxu1 %v220_v15 }
  0xf6   :  { %v989_v16 = vpop.f32.mrb[0].mxu0 }
  0xf7   :  { %v990_v17 = vpop.f32.mrb[1].mxu0  ;;  %v1011_v18 = vpop.f32.mrb[0].mxu1 }
  0xf8   :  { %v991_v19 = vadd.f32 %v990_v17, %v989_v16  ;;  %v992_v20 = vpop.f32.mrb[2].mxu0  ;;  %v1012_v21 = vpop.f32.mrb[1].mxu1 }
  0xf9   :  { %v993_v22 = vpop.f32.mrb[3].mxu0  ;;  %v1013_v23 = vadd.f32 %v1012_v21, %v1011_v18  ;;  %v1014_v24 = vpop.f32.mrb[2].mxu1 }
  0xfa   :  { %v1015_v25 = vpop.f32.mrb[3].mxu1 }
  0xfb   :  { %v809_v26 = vadd.f32 %v1013_v23, %v991_v19 }
 0x116   :  { %v1033_v27 = vpop.f32.mrb[4].mxu0 }
 0x117   :  { %v1034_v28 = vpop.f32.mrb[5].mxu0  ;;  %v1055_v29 = vpop.f32.mrb[4].mxu1 }
 0x118   :  { %v1035_v30 = vadd.f32 %v1034_v28, %v1033_v27  ;;  %v1036_v31 = vpop.f32.mrb[6].mxu0  ;;  %v1056_v32 = vpop.f32.mrb[5].mxu1 }
 0x119   :  { %v1037_v33 = vpop.f32.mrb[7].mxu0  ;;  %v1057_v35 = vadd.f32 %v1056_v32, %v1055_v29  ;;  %v1058_v36 = vpop.f32.mrb[6].mxu1 }
 0x11a   :  { %v849_v34 = vadd.f32 %v1035_v30, %v809_v26  ;;  %v1059_v37 = vpop.f32.mrb[7].mxu1 }
 0x11c   :  { %v889_v38 = vadd.f32 %v1057_v35, %v849_v34 }
 0x11e   :  { %v894_v39 = vand.u32 2147483647, %v889_v38  ;;  %vm898_vm2 = vcmp.ge.f32.partialorder %v889_v38, 0.0 }
 0x120   :  { %v895_v40 = vsub.f32 0.0, %v894_v39 }
 0x122   :  { %v896_v41 = vmul.f32 1.442695, %v895_v40 }
 0x124   :  { %1126 = vpow2.f32 %v896_v41 }
 0x12e   :  { %v1127_v43 = vpop.eup %1126 }
 0x12f   :  { %v899_v44 = vadd.f32 1.0, %v1127_v43 }
 0x131   :  { %1128 = vrcp.f32 %v899_v44 }
 0x13b   :  { %v1129_v45 = vpop.eup %1128 }
 0x13c   :  { %v902_v46 = vmul.f32 %v1129_v45, %v1127_v43 }
 0x13e   :  { %v903_v47 = vsel %vm898_vm2, %v1129_v45, %v902_v46 }
 0x13f   :  { %904 = vst [vmem:[%s1392_s4] sm:$0x3] %v903_v47 }

</bundles_post_ra>
